<compile_context>
chip_gen: v7x
topology: tpu7x:2x2x1
jax: 0.10.0
libtpu: 0.0.40
codegen_flags: <defaults>
</compile_context>

<pallas_src>
import functools

import jax
import jax.numpy as jnp
from jax.experimental import pallas as pl
from jax.experimental.pallas import tpu as pltpu

HIDDEN = 512   # fixed by the PyTorch module
LANE = 128


def _round_up(x, m):
    return ((x + m - 1) // m) * m


def _choose_tm(batch, block_m):
    """Batch-tile choice (perf review):
       - round B up to a multiple of 8 first, minimize padding waste,
       - medium batches: exactly 2 grid steps so both v7x TensorCores work,
       - large batches: tm in {512, 256, 128}, least padding, prefer larger."""
    b8 = _round_up(batch, 8)
    if b8 <= 64:
        return b8                                   # one step, zero padding
    if b8 <= block_m:
        return _round_up((b8 + 1) // 2, 16)         # exactly 2 steps
    best_tm, best_waste = None, None
    for t in (512, 256, 128):
        if t > block_m:
            continue
        waste = _round_up(b8, t) - b8
        if best_waste is None or waste < best_waste:
            best_tm, best_waste = t, waste
    if best_tm is None:
        best_tm = _round_up(min(b8, block_m), 16)
    return best_tm


def _ensemble_kernel(num_models, *refs):
    # refs layout (inputs, all VMEM blocks):
    #   x_0 .. x_{M-1}   : [TM, F_m]     bf16  (batch tile, pipelined)
    #   w_0 .. w_{M-1}   : [F_m, 512]    bf16  (resident)
    #   b_0 .. b_{M-1}   : [1, 512]      f32   (resident)
    #   w_t1 [M*512,512] bf16, b_t1 [1,512] f32
    #   w_t2 [512,C_pad] bf16, b_t2 [1,C_pad] f32
    # outputs:
    #   out  [TM, C_pad] f32
    # scratch:
    #   h    [TM, M*512] bf16  (staged "concat" of the per-model heads)
    M = num_models
    x_refs = refs[:M]
    w_refs = refs[M:2 * M]
    b_refs = refs[2 * M:3 * M]
    w_t1, b_t1, w_t2, b_t2 = refs[3 * M:3 * M + 4]
    out_ref = refs[3 * M + 4]
    h_ref = refs[3 * M + 5]

    # Per-model heads: bf16 x bf16 -> f32 accumulate, bias + ReLU in f32,
    # result staged (bf16) into its slot of the concat scratch.
    for m in range(M):
        h = jnp.dot(x_refs[m][...], w_refs[m][...],
                    preferred_element_type=jnp.float32)
        h = jnp.maximum(h + b_refs[m][...], 0.0)
        h_ref[:, m * HIDDEN:(m + 1) * HIDDEN] = h.astype(jnp.bfloat16)

    # Tail Linear #1 as ONE big-K (M*512) matmul against the resident w_t1.
    t1 = jnp.dot(h_ref[...], w_t1[...], preferred_element_type=jnp.float32)
    t1 = jnp.maximum(t1 + b_t1[...], 0.0)

    # Tail Linear #2 (bf16 x bf16 -> f32), lane-dense store.
    out = jnp.dot(t1.astype(jnp.bfloat16), w_t2[...],
                  preferred_element_type=jnp.float32) + b_t2[...]
    out_ref[...] = out.astype(out_ref.dtype)


def ensemble_forward(feature_list, params, *, block_m=512):
    """feature_list: list of [B, F_m] f32 arrays.
    params: dict with 'fc_w' (list of [F_m,512]), 'fc_b' (list of [512]),
            'tail_w1' [M*512,512], 'tail_b1' [512],
            'tail_w2' [512,C],     'tail_b2' [C]   (f32, [in,out] layout)."""
    M = len(feature_list)
    B = feature_list[0].shape[0]
    C = params["tail_w2"].shape[1]
    feats = [int(x.shape[1]) for x in feature_list]

    # --- batch tiling ---
    tm = _choose_tm(B, block_m)
    b_pad = _round_up(_round_up(B, 8), tm)
    grid = (b_pad // tm,)

    # --- activations: pad batch rows, cast to bf16 (halves recurring x DMA,
    #     native MXU LHS) ---
    xs = [jnp.pad(x, ((0, b_pad - B), (0, 0))).astype(jnp.bfloat16)
          for x in feature_list]

    # --- weights bf16 (one-time DMA, fed straight to the MXU); biases f32 ---
    fc_w = [w.astype(jnp.bfloat16) for w in params["fc_w"]]
    w_t1 = params["tail_w1"].astype(jnp.bfloat16)

    # --- lane-dense output: pad num_classes up to a multiple of 128 ---
    c_pad = _round_up(max(C, LANE), LANE)
    w_t2 = jnp.pad(params["tail_w2"],
                   ((0, 0), (0, c_pad - C))).astype(jnp.bfloat16)
    b_t2 = jnp.pad(params["tail_b2"],
                   (0, c_pad - C)).reshape(1, c_pad).astype(jnp.float32)
    fc_b = [b.reshape(1, HIDDEN).astype(jnp.float32) for b in params["fc_b"]]
    b_t1 = params["tail_b1"].reshape(1, HIDDEN).astype(jnp.float32)

    args = xs + fc_w + fc_b + [w_t1, b_t1, w_t2, b_t2]

    # --- explicit VMEM budget (worst case: resident weights double-buffered),
    #     capped at v7x's 64 MiB/TC ---
    vmem_est = (
        (sum(f * HIDDEN for f in feats) + M * HIDDEN * HIDDEN
         + HIDDEN * c_pad) * 2 * 2                       # bf16 weights x2 buf
        + (M * HIDDEN + HIDDEN + c_pad) * 4 * 2          # f32 biases  x2 buf
        + sum(tm * f for f in feats) * 2 * 2             # bf16 x tiles x2 buf
        + tm * c_pad * 4 * 2                             # f32 out tile x2 buf
        + tm * M * HIDDEN * 2)                           # bf16 h scratch
    vmem_limit = min(64 << 20, max(32 << 20, 2 * vmem_est + (4 << 20)))

    flops = 2 * b_pad * (sum(feats) * HIDDEN
                         + M * HIDDEN * HIDDEN
                         + HIDDEN * c_pad)
    bytes_accessed = (
        sum(x.size * 2 for x in xs)                      # bf16 activations
        + sum(w.size * 2 for w in fc_w) + w_t1.size * 2 + w_t2.size * 2
        + sum(b.size * 4 for b in fc_b) + b_t1.size * 4 + b_t2.size * 4
        + b_pad * c_pad * 4)                             # f32 output

    def build(resident_mode):
        extra = {} if resident_mode is None else {"pipeline_mode": resident_mode}
        # x / out tile over the batch; weights & biases map to block (0, 0)
        # every step -> fetched once, VMEM-resident.
        x_specs = [pl.BlockSpec((tm, f), lambda i: (i, 0)) for f in feats]
        w_specs = [pl.BlockSpec((f, HIDDEN), lambda i: (0, 0), **extra)
                   for f in feats]
        b_specs = [pl.BlockSpec((1, HIDDEN), lambda i: (0, 0), **extra)
                   for _ in feats]
        tail_specs = [
            pl.BlockSpec((M * HIDDEN, HIDDEN), lambda i: (0, 0), **extra),
            pl.BlockSpec((1, HIDDEN), lambda i: (0, 0), **extra),
            pl.BlockSpec((HIDDEN, c_pad), lambda i: (0, 0), **extra),
            pl.BlockSpec((1, c_pad), lambda i: (0, 0), **extra),
        ]
        out_spec = pl.BlockSpec((tm, c_pad), lambda i: (i, 0))
        return pl.pallas_call(
            functools.partial(_ensemble_kernel, M),
            out_shape=jax.ShapeDtypeStruct((b_pad, c_pad), jnp.float32),
            grid=grid,
            in_specs=x_specs + w_specs + b_specs + tail_specs,
            out_specs=out_spec,
            scratch_shapes=[pltpu.VMEM((tm, M * HIDDEN), jnp.bfloat16)],
            compiler_params=pltpu.CompilerParams(
                dimension_semantics=("parallel",),     # megacore batch shard
                vmem_limit_bytes=vmem_limit),
            cost_estimate=pl.CostEstimate(
                flops=flops, transcendentals=0,
                bytes_accessed=bytes_accessed),
        )

    try:
        # Resident (constant-index) weight blocks only need ONE VMEM buffer.
        out = build(pl.Buffered(1))(*args)
    except Exception:
        # Fallback: this jax version rejects pipeline_mode on top-level
        # pallas_call specs -> default double-buffering (harmless here).
        out = build(None)(*args)

    return out[:B, :C]


def init_params(key, num_features, num_classes):
    """Deterministic synthetic init (PyTorch-Linear-style uniform +-1/sqrt(in)),
    with weights already transposed to [in, out]."""
    M = len(num_features)
    keys = jax.random.split(key, 2 * M + 4)
    fc_w, fc_b = [], []
    for m, f in enumerate(num_features):
        bound = 1.0 / jnp.sqrt(f)
        fc_w.append(jax.random.uniform(keys[2 * m], (f, HIDDEN),
                                       jnp.float32, -bound, bound))
        fc_b.append(jax.random.uniform(keys[2 * m + 1], (HIDDEN,),
                                       jnp.float32, -bound, bound))
    in_t1 = M * HIDDEN
    b1 = 1.0 / jnp.sqrt(in_t1)
    tail_w1 = jax.random.uniform(keys[2 * M], (in_t1, HIDDEN),
                                 jnp.float32, -b1, b1)
    tail_b1 = jax.random.uniform(keys[2 * M + 1], (HIDDEN,),
                                 jnp.float32, -b1, b1)
    b2 = 1.0 / jnp.sqrt(HIDDEN)
    tail_w2 = jax.random.uniform(keys[2 * M + 2], (HIDDEN, num_classes),
                                 jnp.float32, -b2, b2)
    tail_b2 = jax.random.uniform(keys[2 * M + 3], (num_classes,),
                                 jnp.float32, -b2, b2)
    return {"fc_w": fc_w, "fc_b": fc_b,
            "tail_w1": tail_w1, "tail_b1": tail_b1,
            "tail_w2": tail_w2, "tail_b2": tail_b2}


def reference_forward(feature_list, params, *, mirror_kernel=True):
    """Pure-JAX reference mirroring the PyTorch module.  With
    mirror_kernel=True it reproduces the kernel's numerics (bf16 inputs /
    weights / intermediate activations, f32 MXU accumulation and f32 bias+ReLU)
    so the comparison can be tight; mirror_kernel=False is the full-f32 path."""
    cvt = (lambda a: a.astype(jnp.bfloat16)) if mirror_kernel else (lambda a: a)
    ys = []
    for x, wm, b in zip(feature_list, params["fc_w"], params["fc_b"]):
        h = jnp.dot(cvt(x), cvt(wm), preferred_element_type=jnp.float32) + b
        ys.append(cvt(jnp.maximum(h, 0.0)))
    y = jnp.concatenate(ys, axis=-1)
    t = jnp.dot(y, cvt(params["tail_w1"]),
                preferred_element_type=jnp.float32) + params["tail_b1"]
    t = cvt(jnp.maximum(t, 0.0))
    return jnp.dot(t, cvt(params["tail_w2"]),
                   preferred_element_type=jnp.float32) + params["tail_b2"]


if __name__ == "__main__":
    key = jax.random.PRNGKey(0)

    num_models = 3
    num_features = [32, 48, 64]   # one per model (list, as the module asserts)
    num_classes = 10
    batch = 2

    pkey, *xkeys = jax.random.split(key, num_models + 1)
    params = init_params(pkey, num_features, num_classes)
    feature_list = [jax.random.normal(xk, (batch, f), jnp.float32)
                    for xk, f in zip(xkeys, num_features)]

    out = ensemble_forward(feature_list, params)
    out = jax.block_until_ready(out)

    ref = reference_forward(feature_list, params, mirror_kernel=True)
    assert out.shape == (batch, num_classes)
    assert jnp.allclose(out, ref, atol=2e-3, rtol=2e-3), "mismatch vs reference"

    print("KERNEL_OK")
</pallas_src>

<mosaic_0001>
module attributes {stable_mosaic.version = 11 : i64} {
  func.func @_ensemble_kernel(%arg0: i32, %arg1: memref<8x32xbf16, #tpu.memory_space<vmem>>, %arg2: memref<8x48xbf16, #tpu.memory_space<vmem>>, %arg3: memref<8x64xbf16, #tpu.memory_space<vmem>>, %arg4: memref<32x512xbf16, #tpu.memory_space<vmem>>, %arg5: memref<48x512xbf16, #tpu.memory_space<vmem>>, %arg6: memref<64x512xbf16, #tpu.memory_space<vmem>>, %arg7: memref<1x512xf32, #tpu.memory_space<vmem>>, %arg8: memref<1x512xf32, #tpu.memory_space<vmem>>, %arg9: memref<1x512xf32, #tpu.memory_space<vmem>>, %arg10: memref<1536x512xbf16, #tpu.memory_space<vmem>>, %arg11: memref<1x512xf32, #tpu.memory_space<vmem>>, %arg12: memref<512x128xbf16, #tpu.memory_space<vmem>>, %arg13: memref<1x128xf32, #tpu.memory_space<vmem>>, %arg14: memref<8x128xf32, #tpu.memory_space<vmem>>, %arg15: memref<8x1536xbf16, #tpu.memory_space<vmem>>) attributes {dimension_semantics = [#tpu.dimension_semantics<parallel>], iteration_bounds = array<i64: 1>, scalar_prefetch = 0 : i64, scratch_operands = 1 : i64, tpu.core_type = #tpu.core_type<tc>, window_params = [{transform_indices = @transform_0, window_bounds = array<i64: 8, 32>}, {transform_indices = @transform_1, window_bounds = array<i64: 8, 48>}, {transform_indices = @transform_2, window_bounds = array<i64: 8, 64>}, {pipeline_mode = #tpu.pipeline_mode<synchronous>, transform_indices = @transform_3, window_bounds = array<i64: 32, 512>}, {pipeline_mode = #tpu.pipeline_mode<synchronous>, transform_indices = @transform_4, window_bounds = array<i64: 48, 512>}, {pipeline_mode = #tpu.pipeline_mode<synchronous>, transform_indices = @transform_5, window_bounds = array<i64: 64, 512>}, {pipeline_mode = #tpu.pipeline_mode<synchronous>, transform_indices = @transform_6, window_bounds = array<i64: 1, 512>}, {pipeline_mode = #tpu.pipeline_mode<synchronous>, transform_indices = @transform_7, window_bounds = array<i64: 1, 512>}, {pipeline_mode = #tpu.pipeline_mode<synchronous>, transform_indices = @transform_8, window_bounds = array<i64: 1, 512>}, {pipeline_mode = #tpu.pipeline_mode<synchronous>, transform_indices = @transform_9, window_bounds = array<i64: 1536, 512>}, {pipeline_mode = #tpu.pipeline_mode<synchronous>, transform_indices = @transform_10, window_bounds = array<i64: 1, 512>}, {pipeline_mode = #tpu.pipeline_mode<synchronous>, transform_indices = @transform_11, window_bounds = array<i64: 512, 128>}, {pipeline_mode = #tpu.pipeline_mode<synchronous>, transform_indices = @transform_12, window_bounds = array<i64: 1, 128>}, {transform_indices = @transform_13, window_bounds = array<i64: 8, 128>}]} {
    %c0 = arith.constant 0 : index
    %c0_0 = arith.constant 0 : index
    %0 = vector.load %arg1[%c0, %c0_0] : memref<8x32xbf16, #tpu.memory_space<vmem>>, vector<8x32xbf16>
    %c0_1 = arith.constant 0 : index
    %c0_2 = arith.constant 0 : index
    %1 = vector.load %arg4[%c0_1, %c0_2] : memref<32x512xbf16, #tpu.memory_space<vmem>>, vector<32x512xbf16>
    %cst = arith.constant dense<0.000000e+00> : vector<8x512xf32>
    %2 = tpu.matmul %0, %1, %cst {dimension_numbers = #tpu.dot_dimension_numbers<[1], [0], [0], [1], [0, 0, 1, 1], [], []>} : vector<8x32xbf16>, vector<32x512xbf16>, vector<8x512xf32> -> vector<8x512xf32>
    %c0_3 = arith.constant 0 : index
    %c0_4 = arith.constant 0 : index
    %3 = vector.load %arg7[%c0_3, %c0_4] : memref<1x512xf32, #tpu.memory_space<vmem>>, vector<1x512xf32>
    %4 = vector.broadcast %3 : vector<1x512xf32> to vector<8x512xf32>
    %5 = arith.addf %2, %4 : vector<8x512xf32>
    %cst_5 = arith.constant 0.000000e+00 : f32
    %6 = vector.broadcast %cst_5 : f32 to vector<8x512xf32>
    %7 = arith.maximumf %5, %6 : vector<8x512xf32>
    %8 = arith.truncf %7 : vector<8x512xf32> to vector<8x512xbf16>
    %c0_6 = arith.constant 0 : index
    %c0_7 = arith.constant 0 : index
    %9 = vector.load %arg15[%c0_6, %c0_7] : memref<8x1536xbf16, #tpu.memory_space<vmem>>, vector<8x512xbf16>
    tpu.vector_store %arg15[%c0_6, %c0_7], %8 {strides = array<i32>} : memref<8x1536xbf16, #tpu.memory_space<vmem>>, vector<8x512xbf16>,
    %c0_8 = arith.constant 0 : index
    %c0_9 = arith.constant 0 : index
    %10 = vector.load %arg2[%c0_8, %c0_9] : memref<8x48xbf16, #tpu.memory_space<vmem>>, vector<8x48xbf16>
    %c0_10 = arith.constant 0 : index
    %c0_11 = arith.constant 0 : index
    %11 = vector.load %arg5[%c0_10, %c0_11] : memref<48x512xbf16, #tpu.memory_space<vmem>>, vector<48x512xbf16>
    %cst_12 = arith.constant dense<0.000000e+00> : vector<8x512xf32>
    %12 = tpu.matmul %10, %11, %cst_12 {dimension_numbers = #tpu.dot_dimension_numbers<[1], [0], [0], [1], [0, 0, 1, 1], [], []>} : vector<8x48xbf16>, vector<48x512xbf16>, vector<8x512xf32> -> vector<8x512xf32>
    %c0_13 = arith.constant 0 : index
    %c0_14 = arith.constant 0 : index
    %13 = vector.load %arg8[%c0_13, %c0_14] : memref<1x512xf32, #tpu.memory_space<vmem>>, vector<1x512xf32>
    %14 = vector.broadcast %13 : vector<1x512xf32> to vector<8x512xf32>
    %15 = arith.addf %12, %14 : vector<8x512xf32>
    %cst_15 = arith.constant 0.000000e+00 : f32
    %16 = vector.broadcast %cst_15 : f32 to vector<8x512xf32>
    %17 = arith.maximumf %15, %16 : vector<8x512xf32>
    %18 = arith.truncf %17 : vector<8x512xf32> to vector<8x512xbf16>
    %c0_16 = arith.constant 0 : index
    %c512 = arith.constant 512 : index
    %19 = vector.load %arg15[%c0_16, %c512] : memref<8x1536xbf16, #tpu.memory_space<vmem>>, vector<8x512xbf16>
    tpu.vector_store %arg15[%c0_16, %c512], %18 {strides = array<i32>} : memref<8x1536xbf16, #tpu.memory_space<vmem>>, vector<8x512xbf16>,
    %c0_17 = arith.constant 0 : index
    %c0_18 = arith.constant 0 : index
    %20 = vector.load %arg3[%c0_17, %c0_18] : memref<8x64xbf16, #tpu.memory_space<vmem>>, vector<8x64xbf16>
    %c0_19 = arith.constant 0 : index
    %c0_20 = arith.constant 0 : index
    %21 = vector.load %arg6[%c0_19, %c0_20] : memref<64x512xbf16, #tpu.memory_space<vmem>>, vector<64x512xbf16>
    %cst_21 = arith.constant dense<0.000000e+00> : vector<8x512xf32>
    %22 = tpu.matmul %20, %21, %cst_21 {dimension_numbers = #tpu.dot_dimension_numbers<[1], [0], [0], [1], [0, 0, 1, 1], [], []>} : vector<8x64xbf16>, vector<64x512xbf16>, vector<8x512xf32> -> vector<8x512xf32>
    %c0_22 = arith.constant 0 : index
    %c0_23 = arith.constant 0 : index
    %23 = vector.load %arg9[%c0_22, %c0_23] : memref<1x512xf32, #tpu.memory_space<vmem>>, vector<1x512xf32>
    %24 = vector.broadcast %23 : vector<1x512xf32> to vector<8x512xf32>
    %25 = arith.addf %22, %24 : vector<8x512xf32>
    %cst_24 = arith.constant 0.000000e+00 : f32
    %26 = vector.broadcast %cst_24 : f32 to vector<8x512xf32>
    %27 = arith.maximumf %25, %26 : vector<8x512xf32>
    %28 = arith.truncf %27 : vector<8x512xf32> to vector<8x512xbf16>
    %c0_25 = arith.constant 0 : index
    %c1024 = arith.constant 1024 : index
    %29 = vector.load %arg15[%c0_25, %c1024] : memref<8x1536xbf16, #tpu.memory_space<vmem>>, vector<8x512xbf16>
    tpu.vector_store %arg15[%c0_25, %c1024], %28 {strides = array<i32>} : memref<8x1536xbf16, #tpu.memory_space<vmem>>, vector<8x512xbf16>,
    %c0_26 = arith.constant 0 : index
    %c0_27 = arith.constant 0 : index
    %30 = vector.load %arg15[%c0_26, %c0_27] : memref<8x1536xbf16, #tpu.memory_space<vmem>>, vector<8x1536xbf16>
    %c0_28 = arith.constant 0 : index
    %c0_29 = arith.constant 0 : index
    %31 = vector.load %arg10[%c0_28, %c0_29] : memref<1536x512xbf16, #tpu.memory_space<vmem>>, vector<1536x512xbf16>
    %cst_30 = arith.constant dense<0.000000e+00> : vector<8x512xf32>
    %32 = tpu.matmul %30, %31, %cst_30 {dimension_numbers = #tpu.dot_dimension_numbers<[1], [0], [0], [1], [0, 0, 1, 1], [], []>} : vector<8x1536xbf16>, vector<1536x512xbf16>, vector<8x512xf32> -> vector<8x512xf32>
    %c0_31 = arith.constant 0 : index
    %c0_32 = arith.constant 0 : index
    %33 = vector.load %arg11[%c0_31, %c0_32] : memref<1x512xf32, #tpu.memory_space<vmem>>, vector<1x512xf32>
    %34 = vector.broadcast %33 : vector<1x512xf32> to vector<8x512xf32>
    %35 = arith.addf %32, %34 : vector<8x512xf32>
    %cst_33 = arith.constant 0.000000e+00 : f32
    %36 = vector.broadcast %cst_33 : f32 to vector<8x512xf32>
    %37 = arith.maximumf %35, %36 : vector<8x512xf32>
    %38 = arith.truncf %37 : vector<8x512xf32> to vector<8x512xbf16>
    %c0_34 = arith.constant 0 : index
    %c0_35 = arith.constant 0 : index
    %39 = vector.load %arg12[%c0_34, %c0_35] : memref<512x128xbf16, #tpu.memory_space<vmem>>, vector<512x128xbf16>
    %cst_36 = arith.constant dense<0.000000e+00> : vector<8x128xf32>
    %40 = tpu.matmul %38, %39, %cst_36 {dimension_numbers = #tpu.dot_dimension_numbers<[1], [0], [0], [1], [0, 0, 1, 1], [], []>} : vector<8x512xbf16>, vector<512x128xbf16>, vector<8x128xf32> -> vector<8x128xf32>
    %c0_37 = arith.constant 0 : index
    %c0_38 = arith.constant 0 : index
    %41 = vector.load %arg13[%c0_37, %c0_38] : memref<1x128xf32, #tpu.memory_space<vmem>>, vector<1x128xf32>
    %42 = vector.broadcast %41 : vector<1x128xf32> to vector<8x128xf32>
    %43 = arith.addf %40, %42 : vector<8x128xf32>
    %c0_39 = arith.constant 0 : index
    %c0_40 = arith.constant 0 : index
    %44 = vector.load %arg14[%c0_39, %c0_40] : memref<8x128xf32, #tpu.memory_space<vmem>>, vector<8x128xf32>
    tpu.vector_store %arg14[%c0_39, %c0_40], %43 {strides = array<i32>} : memref<8x128xf32, #tpu.memory_space<vmem>>, vector<8x128xf32>,
    return
  }
  func.func @transform_0(%arg0: i32) -> (i32, i32) {
    %c0_i32 = arith.constant 0 : i32
    %c0_i32_0 = arith.constant 0 : i32
    return %arg0, %c0_i32 : i32, i32
  }
  func.func @transform_1(%arg0: i32) -> (i32, i32) {
    %c0_i32 = arith.constant 0 : i32
    %c0_i32_0 = arith.constant 0 : i32
    return %arg0, %c0_i32 : i32, i32
  }
  func.func @transform_2(%arg0: i32) -> (i32, i32) {
    %c0_i32 = arith.constant 0 : i32
    %c0_i32_0 = arith.constant 0 : i32
    return %arg0, %c0_i32 : i32, i32
  }
  func.func @transform_3(%arg0: i32) -> (i32, i32) {
    %c0_i32 = arith.constant 0 : i32
    %c0_i32_0 = arith.constant 0 : i32
    %c0_i32_1 = arith.constant 0 : i32
    return %c0_i32, %c0_i32_0 : i32, i32
  }
  func.func @transform_4(%arg0: i32) -> (i32, i32) {
    %c0_i32 = arith.constant 0 : i32
    %c0_i32_0 = arith.constant 0 : i32
    %c0_i32_1 = arith.constant 0 : i32
    return %c0_i32, %c0_i32_0 : i32, i32
  }
  func.func @transform_5(%arg0: i32) -> (i32, i32) {
    %c0_i32 = arith.constant 0 : i32
    %c0_i32_0 = arith.constant 0 : i32
    %c0_i32_1 = arith.constant 0 : i32
    return %c0_i32, %c0_i32_0 : i32, i32
  }
  func.func @transform_6(%arg0: i32) -> (i32, i32) {
    %c0_i32 = arith.constant 0 : i32
    %c0_i32_0 = arith.constant 0 : i32
    %c0_i32_1 = arith.constant 0 : i32
    return %c0_i32, %c0_i32_0 : i32, i32
  }
  func.func @transform_7(%arg0: i32) -> (i32, i32) {
    %c0_i32 = arith.constant 0 : i32
    %c0_i32_0 = arith.constant 0 : i32
    %c0_i32_1 = arith.constant 0 : i32
    return %c0_i32, %c0_i32_0 : i32, i32
  }
  func.func @transform_8(%arg0: i32) -> (i32, i32) {
    %c0_i32 = arith.constant 0 : i32
    %c0_i32_0 = arith.constant 0 : i32
    %c0_i32_1 = arith.constant 0 : i32
    return %c0_i32, %c0_i32_0 : i32, i32
  }
  func.func @transform_9(%arg0: i32) -> (i32, i32) {
    %c0_i32 = arith.constant 0 : i32
    %c0_i32_0 = arith.constant 0 : i32
    %c0_i32_1 = arith.constant 0 : i32
    return %c0_i32, %c0_i32_0 : i32, i32
  }
  func.func @transform_10(%arg0: i32) -> (i32, i32) {
    %c0_i32 = arith.constant 0 : i32
    %c0_i32_0 = arith.constant 0 : i32
    %c0_i32_1 = arith.constant 0 : i32
    return %c0_i32, %c0_i32_0 : i32, i32
  }
  func.func @transform_11(%arg0: i32) -> (i32, i32) {
    %c0_i32 = arith.constant 0 : i32
    %c0_i32_0 = arith.constant 0 : i32
    %c0_i32_1 = arith.constant 0 : i32
    return %c0_i32, %c0_i32_0 : i32, i32
  }
  func.func @transform_12(%arg0: i32) -> (i32, i32) {
    %c0_i32 = arith.constant 0 : i32
    %c0_i32_0 = arith.constant 0 : i32
    %c0_i32_1 = arith.constant 0 : i32
    return %c0_i32, %c0_i32_0 : i32, i32
  }
  func.func @transform_13(%arg0: i32) -> (i32, i32) {
    %c0_i32 = arith.constant 0 : i32
    %c0_i32_0 = arith.constant 0 : i32
    return %arg0, %c0_i32 : i32, i32
  }
}

module attributes {stable_mosaic.version = 11 : i64} {
  func.func @_ensemble_kernel(%arg0: i32, %arg1: memref<8x32xbf16, #tpu.memory_space<vmem>>, %arg2: memref<8x48xbf16, #tpu.memory_space<vmem>>, %arg3: memref<8x64xbf16, #tpu.memory_space<vmem>>, %arg4: memref<32x512xbf16, #tpu.memory_space<vmem>>, %arg5: memref<48x512xbf16, #tpu.memory_space<vmem>>, %arg6: memref<64x512xbf16, #tpu.memory_space<vmem>>, %arg7: memref<1x512xf32, #tpu.memory_space<vmem>>, %arg8: memref<1x512xf32, #tpu.memory_space<vmem>>, %arg9: memref<1x512xf32, #tpu.memory_space<vmem>>, %arg10: memref<1536x512xbf16, #tpu.memory_space<vmem>>, %arg11: memref<1x512xf32, #tpu.memory_space<vmem>>, %arg12: memref<512x128xbf16, #tpu.memory_space<vmem>>, %arg13: memref<1x128xf32, #tpu.memory_space<vmem>>, %arg14: memref<8x128xf32, #tpu.memory_space<vmem>>, %arg15: memref<8x1536xbf16, #tpu.memory_space<vmem>>) attributes {dimension_semantics = [#tpu.dimension_semantics<parallel>], iteration_bounds = array<i64: 1>, scalar_prefetch = 0 : i64, scratch_operands = 1 : i64, tpu.core_type = #tpu.core_type<tc>, window_params = [{transform_indices = @transform_0, window_bounds = array<i64: 8, 32>}, {transform_indices = @transform_1, window_bounds = array<i64: 8, 48>}, {transform_indices = @transform_2, window_bounds = array<i64: 8, 64>}, {pipeline_mode = #tpu.pipeline_mode<synchronous>, transform_indices = @transform_3, window_bounds = array<i64: 32, 512>}, {pipeline_mode = #tpu.pipeline_mode<synchronous>, transform_indices = @transform_4, window_bounds = array<i64: 48, 512>}, {pipeline_mode = #tpu.pipeline_mode<synchronous>, transform_indices = @transform_5, window_bounds = array<i64: 64, 512>}, {pipeline_mode = #tpu.pipeline_mode<synchronous>, transform_indices = @transform_6, window_bounds = array<i64: 1, 512>}, {pipeline_mode = #tpu.pipeline_mode<synchronous>, transform_indices = @transform_7, window_bounds = array<i64: 1, 512>}, {pipeline_mode = #tpu.pipeline_mode<synchronous>, transform_indices = @transform_8, window_bounds = array<i64: 1, 512>}, {pipeline_mode = #tpu.pipeline_mode<synchronous>, transform_indices = @transform_9, window_bounds = array<i64: 1536, 512>}, {pipeline_mode = #tpu.pipeline_mode<synchronous>, transform_indices = @transform_10, window_bounds = array<i64: 1, 512>}, {pipeline_mode = #tpu.pipeline_mode<synchronous>, transform_indices = @transform_11, window_bounds = array<i64: 512, 128>}, {pipeline_mode = #tpu.pipeline_mode<synchronous>, transform_indices = @transform_12, window_bounds = array<i64: 1, 128>}, {transform_indices = @transform_13, window_bounds = array<i64: 8, 128>}]} {
    %c0 = arith.constant 0 : index
    %c0_0 = arith.constant 0 : index
    %0 = vector.load %arg1[%c0, %c0_0] : memref<8x32xbf16, #tpu.memory_space<vmem>>, vector<8x32xbf16>
    %c0_1 = arith.constant 0 : index
    %c0_2 = arith.constant 0 : index
    %1 = vector.load %arg4[%c0_1, %c0_2] : memref<32x512xbf16, #tpu.memory_space<vmem>>, vector<32x512xbf16>
    %cst = arith.constant dense<0.000000e+00> : vector<8x512xf32>
    %2 = tpu.matmul %0, %1, %cst {dimension_numbers = #tpu.dot_dimension_numbers<[1], [0], [0], [1], [0, 0, 1, 1], [], []>} : vector<8x32xbf16>, vector<32x512xbf16>, vector<8x512xf32> -> vector<8x512xf32>
    %c0_3 = arith.constant 0 : index
    %c0_4 = arith.constant 0 : index
    %3 = vector.load %arg7[%c0_3, %c0_4] : memref<1x512xf32, #tpu.memory_space<vmem>>, vector<1x512xf32>
    %4 = vector.broadcast %3 : vector<1x512xf32> to vector<8x512xf32>
    %5 = arith.addf %2, %4 : vector<8x512xf32>
    %cst_5 = arith.constant 0.000000e+00 : f32
    %6 = vector.broadcast %cst_5 : f32 to vector<8x512xf32>
    %7 = arith.maximumf %5, %6 : vector<8x512xf32>
    %8 = arith.truncf %7 : vector<8x512xf32> to vector<8x512xbf16>
    %c0_6 = arith.constant 0 : index
    %c0_7 = arith.constant 0 : index
    %9 = vector.load %arg15[%c0_6, %c0_7] : memref<8x1536xbf16, #tpu.memory_space<vmem>>, vector<8x512xbf16>
    tpu.vector_store %arg15[%c0_6, %c0_7], %8 {strides = array<i32>} : memref<8x1536xbf16, #tpu.memory_space<vmem>>, vector<8x512xbf16>,
    %c0_8 = arith.constant 0 : index
    %c0_9 = arith.constant 0 : index
    %10 = vector.load %arg2[%c0_8, %c0_9] : memref<8x48xbf16, #tpu.memory_space<vmem>>, vector<8x48xbf16>
    %c0_10 = arith.constant 0 : index
    %c0_11 = arith.constant 0 : index
    %11 = vector.load %arg5[%c0_10, %c0_11] : memref<48x512xbf16, #tpu.memory_space<vmem>>, vector<48x512xbf16>
    %cst_12 = arith.constant dense<0.000000e+00> : vector<8x512xf32>
    %12 = tpu.matmul %10, %11, %cst_12 {dimension_numbers = #tpu.dot_dimension_numbers<[1], [0], [0], [1], [0, 0, 1, 1], [], []>} : vector<8x48xbf16>, vector<48x512xbf16>, vector<8x512xf32> -> vector<8x512xf32>
    %c0_13 = arith.constant 0 : index
    %c0_14 = arith.constant 0 : index
    %13 = vector.load %arg8[%c0_13, %c0_14] : memref<1x512xf32, #tpu.memory_space<vmem>>, vector<1x512xf32>
    %14 = vector.broadcast %13 : vector<1x512xf32> to vector<8x512xf32>
    %15 = arith.addf %12, %14 : vector<8x512xf32>
    %cst_15 = arith.constant 0.000000e+00 : f32
    %16 = vector.broadcast %cst_15 : f32 to vector<8x512xf32>
    %17 = arith.maximumf %15, %16 : vector<8x512xf32>
    %18 = arith.truncf %17 : vector<8x512xf32> to vector<8x512xbf16>
    %c0_16 = arith.constant 0 : index
    %c512 = arith.constant 512 : index
    %19 = vector.load %arg15[%c0_16, %c512] : memref<8x1536xbf16, #tpu.memory_space<vmem>>, vector<8x512xbf16>
    tpu.vector_store %arg15[%c0_16, %c512], %18 {strides = array<i32>} : memref<8x1536xbf16, #tpu.memory_space<vmem>>, vector<8x512xbf16>,
    %c0_17 = arith.constant 0 : index
    %c0_18 = arith.constant 0 : index
    %20 = vector.load %arg3[%c0_17, %c0_18] : memref<8x64xbf16, #tpu.memory_space<vmem>>, vector<8x64xbf16>
    %c0_19 = arith.constant 0 : index
    %c0_20 = arith.constant 0 : index
    %21 = vector.load %arg6[%c0_19, %c0_20] : memref<64x512xbf16, #tpu.memory_space<vmem>>, vector<64x512xbf16>
    %cst_21 = arith.constant dense<0.000000e+00> : vector<8x512xf32>
    %22 = tpu.matmul %20, %21, %cst_21 {dimension_numbers = #tpu.dot_dimension_numbers<[1], [0], [0], [1], [0, 0, 1, 1], [], []>} : vector<8x64xbf16>, vector<64x512xbf16>, vector<8x512xf32> -> vector<8x512xf32>
    %c0_22 = arith.constant 0 : index
    %c0_23 = arith.constant 0 : index
    %23 = vector.load %arg9[%c0_22, %c0_23] : memref<1x512xf32, #tpu.memory_space<vmem>>, vector<1x512xf32>
    %24 = vector.broadcast %23 : vector<1x512xf32> to vector<8x512xf32>
    %25 = arith.addf %22, %24 : vector<8x512xf32>
    %cst_24 = arith.constant 0.000000e+00 : f32
    %26 = vector.broadcast %cst_24 : f32 to vector<8x512xf32>
    %27 = arith.maximumf %25, %26 : vector<8x512xf32>
    %28 = arith.truncf %27 : vector<8x512xf32> to vector<8x512xbf16>
    %c0_25 = arith.constant 0 : index
    %c1024 = arith.constant 1024 : index
    %29 = vector.load %arg15[%c0_25, %c1024] : memref<8x1536xbf16, #tpu.memory_space<vmem>>, vector<8x512xbf16>
    tpu.vector_store %arg15[%c0_25, %c1024], %28 {strides = array<i32>} : memref<8x1536xbf16, #tpu.memory_space<vmem>>, vector<8x512xbf16>,
    %c0_26 = arith.constant 0 : index
    %c0_27 = arith.constant 0 : index
    %30 = vector.load %arg15[%c0_26, %c0_27] : memref<8x1536xbf16, #tpu.memory_space<vmem>>, vector<8x1536xbf16>
    %c0_28 = arith.constant 0 : index
    %c0_29 = arith.constant 0 : index
    %31 = vector.load %arg10[%c0_28, %c0_29] : memref<1536x512xbf16, #tpu.memory_space<vmem>>, vector<1536x512xbf16>
    %cst_30 = arith.constant dense<0.000000e+00> : vector<8x512xf32>
    %32 = tpu.matmul %30, %31, %cst_30 {dimension_numbers = #tpu.dot_dimension_numbers<[1], [0], [0], [1], [0, 0, 1, 1], [], []>} : vector<8x1536xbf16>, vector<1536x512xbf16>, vector<8x512xf32> -> vector<8x512xf32>
    %c0_31 = arith.constant 0 : index
    %c0_32 = arith.constant 0 : index
    %33 = vector.load %arg11[%c0_31, %c0_32] : memref<1x512xf32, #tpu.memory_space<vmem>>, vector<1x512xf32>
    %34 = vector.broadcast %33 : vector<1x512xf32> to vector<8x512xf32>
    %35 = arith.addf %32, %34 : vector<8x512xf32>
    %cst_33 = arith.constant 0.000000e+00 : f32
    %36 = vector.broadcast %cst_33 : f32 to vector<8x512xf32>
    %37 = arith.maximumf %35, %36 : vector<8x512xf32>
    %38 = arith.truncf %37 : vector<8x512xf32> to vector<8x512xbf16>
    %c0_34 = arith.constant 0 : index
    %c0_35 = arith.constant 0 : index
    %39 = vector.load %arg12[%c0_34, %c0_35] : memref<512x128xbf16, #tpu.memory_space<vmem>>, vector<512x128xbf16>
    %cst_36 = arith.constant dense<0.000000e+00> : vector<8x128xf32>
    %40 = tpu.matmul %38, %39, %cst_36 {dimension_numbers = #tpu.dot_dimension_numbers<[1], [0], [0], [1], [0, 0, 1, 1], [], []>} : vector<8x512xbf16>, vector<512x128xbf16>, vector<8x128xf32> -> vector<8x128xf32>
    %c0_37 = arith.constant 0 : index
    %c0_38 = arith.constant 0 : index
    %41 = vector.load %arg13[%c0_37, %c0_38] : memref<1x128xf32, #tpu.memory_space<vmem>>, vector<1x128xf32>
    %42 = vector.broadcast %41 : vector<1x128xf32> to vector<8x128xf32>
    %43 = arith.addf %40, %42 : vector<8x128xf32>
    %c0_39 = arith.constant 0 : index
    %c0_40 = arith.constant 0 : index
    %44 = vector.load %arg14[%c0_39, %c0_40] : memref<8x128xf32, #tpu.memory_space<vmem>>, vector<8x128xf32>
    tpu.vector_store %arg14[%c0_39, %c0_40], %43 {strides = array<i32>} : memref<8x128xf32, #tpu.memory_space<vmem>>, vector<8x128xf32>,
    return
  }
  func.func @transform_0(%arg0: i32) -> (i32, i32) {
    %c0_i32 = arith.constant 0 : i32
    %c0_i32_0 = arith.constant 0 : i32
    return %arg0, %c0_i32 : i32, i32
  }
  func.func @transform_1(%arg0: i32) -> (i32, i32) {
    %c0_i32 = arith.constant 0 : i32
    %c0_i32_0 = arith.constant 0 : i32
    return %arg0, %c0_i32 : i32, i32
  }
  func.func @transform_2(%arg0: i32) -> (i32, i32) {
    %c0_i32 = arith.constant 0 : i32
    %c0_i32_0 = arith.constant 0 : i32
    return %arg0, %c0_i32 : i32, i32
  }
  func.func @transform_3(%arg0: i32) -> (i32, i32) {
    %c0_i32 = arith.constant 0 : i32
    %c0_i32_0 = arith.constant 0 : i32
    %c0_i32_1 = arith.constant 0 : i32
    return %c0_i32, %c0_i32_0 : i32, i32
  }
  func.func @transform_4(%arg0: i32) -> (i32, i32) {
    %c0_i32 = arith.constant 0 : i32
    %c0_i32_0 = arith.constant 0 : i32
    %c0_i32_1 = arith.constant 0 : i32
    return %c0_i32, %c0_i32_0 : i32, i32
  }
  func.func @transform_5(%arg0: i32) -> (i32, i32) {
    %c0_i32 = arith.constant 0 : i32
    %c0_i32_0 = arith.constant 0 : i32
    %c0_i32_1 = arith.constant 0 : i32
    return %c0_i32, %c0_i32_0 : i32, i32
  }
  func.func @transform_6(%arg0: i32) -> (i32, i32) {
    %c0_i32 = arith.constant 0 : i32
    %c0_i32_0 = arith.constant 0 : i32
    %c0_i32_1 = arith.constant 0 : i32
    return %c0_i32, %c0_i32_0 : i32, i32
  }
  func.func @transform_7(%arg0: i32) -> (i32, i32) {
    %c0_i32 = arith.constant 0 : i32
    %c0_i32_0 = arith.constant 0 : i32
    %c0_i32_1 = arith.constant 0 : i32
    return %c0_i32, %c0_i32_0 : i32, i32
  }
  func.func @transform_8(%arg0: i32) -> (i32, i32) {
    %c0_i32 = arith.constant 0 : i32
    %c0_i32_0 = arith.constant 0 : i32
    %c0_i32_1 = arith.constant 0 : i32
    return %c0_i32, %c0_i32_0 : i32, i32
  }
  func.func @transform_9(%arg0: i32) -> (i32, i32) {
    %c0_i32 = arith.constant 0 : i32
    %c0_i32_0 = arith.constant 0 : i32
    %c0_i32_1 = arith.constant 0 : i32
    return %c0_i32, %c0_i32_0 : i32, i32
  }
  func.func @transform_10(%arg0: i32) -> (i32, i32) {
    %c0_i32 = arith.constant 0 : i32
    %c0_i32_0 = arith.constant 0 : i32
    %c0_i32_1 = arith.constant 0 : i32
    return %c0_i32, %c0_i32_0 : i32, i32
  }
  func.func @transform_11(%arg0: i32) -> (i32, i32) {
    %c0_i32 = arith.constant 0 : i32
    %c0_i32_0 = arith.constant 0 : i32
    %c0_i32_1 = arith.constant 0 : i32
    return %c0_i32, %c0_i32_0 : i32, i32
  }
  func.func @transform_12(%arg0: i32) -> (i32, i32) {
    %c0_i32 = arith.constant 0 : i32
    %c0_i32_0 = arith.constant 0 : i32
    %c0_i32_1 = arith.constant 0 : i32
    return %c0_i32, %c0_i32_0 : i32, i32
  }
  func.func @transform_13(%arg0: i32) -> (i32, i32) {
    %c0_i32 = arith.constant 0 : i32
    %c0_i32_0 = arith.constant 0 : i32
    return %arg0, %c0_i32 : i32, i32
  }
}

</mosaic_0001>

<bundles_post_ra>
// kernel: tpu_custom_call.1
= control target key start
LH: loop header
LB: loop body
LE: loop exit
PB: predicated region body
PF: predicated region fallthrough
CT: control target
= control target key end

     0   :  { %18 = vsyncpa [#allocation4], 0  ;;  %s6000_s0 = inlined_call_operand.hbm [shape: bf16[8,32], index: 0, kind: input, shape index: {}]   ;;  %s6001_s1 = inlined_call_operand.hbm [shape: bf16[8,48], index: 1, kind: input, shape index: {}]   ;;  %s6002_s2 = inlined_call_operand.hbm [shape: bf16[8,64], index: 2, kind: input, shape index: {}]   ;;  %s6003_s3 = inlined_call_operand.hbm [shape: bf16[32,512], index: 3, kind: input, shape index: {}]   ;;  %s6004_s4 = inlined_call_operand.hbm [shape: bf16[48,512], index: 4, kind: input, shape index: {}]   ;;  %s6005_s5 = inlined_call_operand.hbm [shape: bf16[64,512], index: 5, kind: input, shape index: {}]   ;;  %s6006_s6 = inlined_call_operand.hbm [shape: f32[1,512], index: 6, kind: input, shape index: {}]   ;;  %s6007_s7 = inlined_call_operand.hbm [shape: f32[1,512], index: 7, kind: input, shape index: {}]   ;;  %s6008_s8 = inlined_call_operand.hbm [shape: f32[1,512], index: 8, kind: input, shape index: {}]   ;;  %s6009_s9 = inlined_call_operand.hbm [shape: bf16[1536,512], index: 9, kind: input, shape index: {}]   ;;  %s6010_s10 = inlined_call_operand.hbm [shape: f32[1,512], index: 10, kind: input, shape index: {}]   ;;  %s6011_s11 = inlined_call_operand.hbm [shape: bf16[512,128], index: 11, kind: input, shape index: {}]   ;;  %s6012_s12 = inlined_call_operand.hbm [shape: f32[1,128], index: 12, kind: input, shape index: {}]   ;;  %s6013_s13 = inlined_call_operand.hbm [shape: f32[8,128], index: 13, kind: output, shape index: {}]  }
   0x1   :  { %19 = vsyncpa [#allocation7], 0 }
   0x2   :  { %20 = vsyncpa [#allocation10], 0 }
   0x3   :  { %21 = vsyncpa [#allocation13], 0 }
   0x4   :  { %22 = vsyncpa [#allocation16], 0 }
   0x5   :  { %23 = vsyncpa [#allocation19], 0 }
   0x6   :  { %24 = vsyncpa [#allocation22], 0 }
   0x7   :  { %25 = vsyncpa [#allocation5], 0  ;;  %s5642_s25 = smov [#allocation6]   ;;  %s5643_s27 = smov [#allocation9]  }
   0x8   :  { %s42_s26 = sshll.u32 %s5642_s25, 4  ;;  %s61_s28 = sshll.u32 %s5643_s27, 4  ;;  %s43_s26 = int_to_ptr.vmem [resolvable:$true] %s42_s26  ;;  %s5731_s28 = int_to_ptr.vmem [resolvable:$true] %s61_s28 }
   0x9   :  { %s5318_s14 = scalar_lea.hbm %s6001_s1, 64 }
   0xa   :  { %p5319_p0 = scmp.ne.s32.totalorder %s6001_s1, %s5318_s14  ;;  %p5322_p1 = scmp.lt.u32.totalorder %s5318_s14, %s6001_s1 }
   0xc   :  { %p5324_p2 = pnand %p5322_p1, %p5319_p0 }
   0xe   :  { %5327 = shalt.err (!%p5324_p2)
}
   0xf   :  { %s5328_s19 = scalar_lea.vmem %s43_s26, 64  ;;  %p5333_p4 = scmp.lt.s32.totalorder %s43_s26, %s43_s26 }
  0x10   :  { %p5329_p3 = scmp.ne.s32.totalorder %s43_s26, %s5328_s19  ;;  %p5334_p5 = scmp.lt.s32.totalorder %s5328_s19, %s5328_s19 }
  0x12   :  { %p5335_p6 = por %p5334_p5, %p5333_p4 }
  0x14   :  { %p5336_p7 = pnand %p5335_p6, %p5329_p3 }
  0x16   :  { %5339 = shalt.err (!%p5336_p7)
}
  0x17   :  { %45 = dma.hbm_to_vmem [thread:$0]  %s6001_s1, 64, %s43_s26, [#allocation7]  }
  0x18   :  { %s5340_s24 = scalar_lea.hbm %s6003_s3, 1024 }
  0x19   :  { %p5341_p8 = scmp.ne.s32.totalorder %s6003_s3, %s5340_s24  ;;  %p5344_p9 = scmp.lt.u32.totalorder %s5340_s24, %s6003_s3 }
  0x1b   :  { %p5346_p10 = pnand %p5344_p9, %p5341_p8 }
  0x1d   :  { %5349 = shalt.err (!%p5346_p10)
}
  0x1e   :  { %s5350_s14 = scalar_lea.vmem %s5731_s28, 1024  ;;  %p5355_p12 = scmp.lt.s32.totalorder %s5731_s28, %s5731_s28 }
  0x1f   :  { %p5351_p11 = scmp.ne.s32.totalorder %s5731_s28, %s5350_s14  ;;  %p5356_p13 = scmp.lt.s32.totalorder %s5350_s14, %s5350_s14 }
  0x21   :  { %p5357_p0 = por %p5356_p13, %p5355_p12 }
  0x23   :  { %p5358_p1 = pnand %p5357_p0, %p5351_p11 }
  0x25   :  { %5361 = shalt.err (!%p5358_p1)
}
  0x26   :  { %s5644_s1 = smov 256   ;;  %s5645_s26 = smov 16  }
  0x27   :  { %67 = dma.hbm_to_vmem [thread:$0]  %s6003_s3, 1024, %s5731_s28, [#allocation10], %s5644_s1, %s5644_s1, %s5645_s26  }
  0x28   :  { %s5646_s17 = smov [#allocation12]   ;;  %s5647_s19 = smov [#allocation15]  }
  0x29   :  { %s85_s18 = sshll.u32 %s5646_s17, 4  ;;  %s108_s20 = sshll.u32 %s5647_s19, 4  ;;  %s86_s18 = int_to_ptr.vmem [resolvable:$true] %s85_s18  ;;  %s109_s20 = int_to_ptr.vmem [resolvable:$true] %s108_s20 }
  0x2a   :  { %s5362_s23 = scalar_lea.hbm %s6005_s5, 2048 }
  0x2b   :  { %p5363_p2 = scmp.ne.s32.totalorder %s6005_s5, %s5362_s23  ;;  %p5366_p3 = scmp.lt.u32.totalorder %s5362_s23, %s6005_s5 }
  0x2d   :  { %p5368_p4 = pnand %p5366_p3, %p5363_p2 }
  0x2f   :  { %5371 = shalt.err (!%p5368_p4)
}
  0x30   :  { %s5372_s3 = scalar_lea.vmem %s86_s18, 2048  ;;  %p5377_p6 = scmp.lt.s32.totalorder %s86_s18, %s86_s18 }
  0x31   :  { %p5373_p5 = scmp.ne.s32.totalorder %s86_s18, %s5372_s3  ;;  %p5378_p7 = scmp.lt.s32.totalorder %s5372_s3, %s5372_s3 }
  0x33   :  { %p5379_p8 = por %p5378_p7, %p5377_p6 }
  0x35   :  { %p5380_p9 = pnand %p5379_p8, %p5373_p5 }
  0x37   :  { %5383 = shalt.err (!%p5380_p9)
}
  0x38   :  { %91 = dma.hbm_to_vmem [thread:$0]  %s6005_s5, 2048, %s86_s18, [#allocation13], %s5644_s1, %s5644_s1, %s5645_s26  }
  0x39   :  { %s5384_s16 = scalar_lea.hbm %s6007_s7, 64 }
  0x3a   :  { %p5385_p10 = scmp.ne.s32.totalorder %s6007_s7, %s5384_s16  ;;  %p5388_p11 = scmp.lt.u32.totalorder %s5384_s16, %s6007_s7 }
  0x3c   :  { %p5390_p12 = pnand %p5388_p11, %p5385_p10 }
  0x3e   :  { %5393 = shalt.err (!%p5390_p12)
}
  0x3f   :  { %s5394_s23 = scalar_lea.vmem %s109_s20, 64  ;;  %p5399_p0 = scmp.lt.s32.totalorder %s109_s20, %s109_s20 }
  0x40   :  { %p5395_p13 = scmp.ne.s32.totalorder %s109_s20, %s5394_s23  ;;  %p5400_p1 = scmp.lt.s32.totalorder %s5394_s23, %s5394_s23 }
  0x42   :  { %p5401_p2 = por %p5400_p1, %p5399_p0 }
  0x44   :  { %p5402_p3 = pnand %p5401_p2, %p5395_p13 }
  0x46   :  { %5405 = shalt.err (!%p5402_p3)
}
  0x47   :  { %111 = dma.hbm_to_vmem [thread:$0]  %s6007_s7, 64, %s109_s20, [#allocation16]  }
  0x48   :  { %s5648_s24 = smov [#allocation18]   ;;  %s5649_s27 = smov [#allocation21]  }
  0x49   :  { %s127_s25 = sshll.u32 %s5648_s24, 4  ;;  %s149_s29 = sshll.u32 %s5649_s27, 4  ;;  %s128_s25 = int_to_ptr.vmem [resolvable:$true] %s127_s25  ;;  %s5792_s29 = int_to_ptr.vmem [resolvable:$true] %s149_s29 }
  0x4a   :  { %s5406_s30 = scalar_lea.hbm %s6009_s9, 49152 }
  0x4b   :  { %p5407_p4 = scmp.ne.s32.totalorder %s6009_s9, %s5406_s30  ;;  %p5410_p5 = scmp.lt.u32.totalorder %s5406_s30, %s6009_s9 }
  0x4d   :  { %p5412_p6 = pnand %p5410_p5, %p5407_p4 }
  0x4f   :  { %5415 = shalt.err (!%p5412_p6)
}
  0x50   :  { %s5416_s7 = scalar_lea.vmem %s128_s25, 49152  ;;  %p5421_p8 = scmp.lt.s32.totalorder %s128_s25, %s128_s25 }
  0x51   :  { %p5417_p7 = scmp.ne.s32.totalorder %s128_s25, %s5416_s7  ;;  %p5422_p9 = scmp.lt.s32.totalorder %s5416_s7, %s5416_s7 }
  0x53   :  { %p5423_p10 = por %p5422_p9, %p5421_p8 }
  0x55   :  { %p5424_p11 = pnand %p5423_p10, %p5417_p7 }
  0x57   :  { %5427 = shalt.err (!%p5424_p11)
}
  0x58   :  { %133 = dma.hbm_to_vmem [thread:$0]  %s6009_s9, 49152, %s128_s25, [#allocation19], %s5644_s1, %s5644_s1, %s5645_s26  }
  0x59   :  { %s5428_s23 = scalar_lea.hbm %s6011_s11, 4096 }
  0x5a   :  { %p5429_p12 = scmp.ne.s32.totalorder %s6011_s11, %s5428_s23  ;;  %p5432_p13 = scmp.lt.u32.totalorder %s5428_s23, %s6011_s11 }
  0x5c   :  { %p5434_p0 = pnand %p5432_p13, %p5429_p12 }
  0x5e   :  { %5437 = shalt.err (!%p5434_p0)
}
  0x5f   :  { %s5438_s3 = scalar_lea.vmem %s5792_s29, 4096  ;;  %p5443_p2 = scmp.lt.s32.totalorder %s5792_s29, %s5792_s29 }
  0x60   :  { %p5439_p1 = scmp.ne.s32.totalorder %s5792_s29, %s5438_s3  ;;  %p5444_p3 = scmp.lt.s32.totalorder %s5438_s3, %s5438_s3 }
  0x62   :  { %p5445_p4 = por %p5444_p3, %p5443_p2 }
  0x64   :  { %p5446_p5 = pnand %p5445_p4, %p5439_p1 }
  0x66   :  { %5449 = shalt.err (!%p5446_p5)
}
  0x67   :  { %s5650_s9 = smov 64   ;;  %s5651_s25 = smov 4  }
  0x68   :  { %155 = dma.hbm_to_vmem [thread:$0]  %s6011_s11, 4096, %s5792_s29, [#allocation22], %s5650_s9, %s5650_s9, %s5651_s25  }
  0x69   :  { %s5652_s14 = smov [#allocation3]   ;;  %s5653_s16 = smov [#allocation8]  }
  0x6a   :  { %s32_s15 = sshll.u32 %s5652_s14, 4  ;;  %s52_s17 = sshll.u32 %s5653_s16, 4  ;;  %s33_s15 = int_to_ptr.vmem [resolvable:$true] %s32_s15  ;;  %s53_s17 = int_to_ptr.vmem [resolvable:$true] %s52_s17 }
  0x6b   :  { %s5450_s19 = scalar_lea.hbm %s6000_s0, 64 }
  0x6c   :  { %p5451_p6 = scmp.ne.s32.totalorder %s6000_s0, %s5450_s19  ;;  %p5454_p7 = scmp.lt.u32.totalorder %s5450_s19, %s6000_s0 }
  0x6e   :  { %p5456_p8 = pnand %p5454_p7, %p5451_p6 }
  0x70   :  { %5459 = shalt.err (!%p5456_p8)
}
  0x71   :  { %s5460_s11 = scalar_lea.vmem %s33_s15, 64  ;;  %p5465_p10 = scmp.lt.s32.totalorder %s33_s15, %s33_s15 }
  0x72   :  { %p5461_p9 = scmp.ne.s32.totalorder %s33_s15, %s5460_s11  ;;  %p5466_p11 = scmp.lt.s32.totalorder %s5460_s11, %s5460_s11 }
  0x74   :  { %p5467_p12 = por %p5466_p11, %p5465_p10 }
  0x76   :  { %p5468_p13 = pnand %p5467_p12, %p5461_p9 }
  0x78   :  { %5471 = shalt.err (!%p5468_p13)
}
  0x79   :  { %35 = dma.hbm_to_vmem [thread:$0]  %s6000_s0, 64, %s33_s15, [#allocation4]  }
  0x7a   :  { %s5472_s3 = scalar_lea.hbm %s6002_s2, 64 }
  0x7b   :  { %p5473_p0 = scmp.ne.s32.totalorder %s6002_s2, %s5472_s3  ;;  %p5476_p1 = scmp.lt.u32.totalorder %s5472_s3, %s6002_s2 }
  0x7d   :  { %p5478_p2 = pnand %p5476_p1, %p5473_p0 }
  0x7f   :  { %5481 = shalt.err (!%p5478_p2)
}
  0x80   :  { %s5482_s14 = scalar_lea.vmem %s53_s17, 64  ;;  %p5487_p4 = scmp.lt.s32.totalorder %s53_s17, %s53_s17 }
  0x81   :  { %p5483_p3 = scmp.ne.s32.totalorder %s53_s17, %s5482_s14  ;;  %p5488_p5 = scmp.lt.s32.totalorder %s5482_s14, %s5482_s14 }
  0x83   :  { %p5489_p6 = por %p5488_p5, %p5487_p4 }
  0x85   :  { %p5490_p7 = pnand %p5489_p6, %p5483_p3 }
  0x87   :  { %5493 = shalt.err (!%p5490_p7)
}
  0x88   :  { %55 = dma.hbm_to_vmem [thread:$0]  %s6002_s2, 64, %s53_s17, [#allocation7]  }
  0x89   :  { %s5654_s16 = smov [#allocation11]   ;;  %s5655_s20 = smov [#allocation14]  }
  0x8a   :  { %s73_s7 = sshll.u32 %s5654_s16, 4  ;;  %s98_s19 = sshll.u32 %s5655_s20, 4  ;;  %s74_s7 = int_to_ptr.vmem [resolvable:$true] %s73_s7  ;;  %s99_s19 = int_to_ptr.vmem [resolvable:$true] %s98_s19 }
  0x8b   :  { %s5494_s23 = scalar_lea.hbm %s6004_s4, 1536 }
  0x8c   :  { %p5495_p8 = scmp.ne.s32.totalorder %s6004_s4, %s5494_s23  ;;  %p5498_p9 = scmp.lt.u32.totalorder %s5494_s23, %s6004_s4 }
  0x8e   :  { %p5500_p10 = pnand %p5498_p9, %p5495_p8 }
  0x90   :  { %5503 = shalt.err (!%p5500_p10)
}
  0x91   :  { %s5504_s2 = scalar_lea.vmem %s74_s7, 1536  ;;  %p5509_p12 = scmp.lt.s32.totalorder %s74_s7, %s74_s7 }
  0x92   :  { %p5505_p11 = scmp.ne.s32.totalorder %s74_s7, %s5504_s2  ;;  %p5510_p13 = scmp.lt.s32.totalorder %s5504_s2, %s5504_s2 }
  0x94   :  { %p5511_p0 = por %p5510_p13, %p5509_p12 }
  0x96   :  { %p5512_p1 = pnand %p5511_p0, %p5505_p11 }
  0x98   :  { %5515 = shalt.err (!%p5512_p1)
}
  0x99   :  { %79 = dma.hbm_to_vmem [thread:$0]  %s6004_s4, 1536, %s74_s7, [#allocation10], %s5644_s1, %s5644_s1, %s5645_s26  }
  0x9a   :  { %s5516_s9 = scalar_lea.hbm %s6006_s6, 64 }
  0x9b   :  { %p5517_p2 = scmp.ne.s32.totalorder %s6006_s6, %s5516_s9  ;;  %p5520_p3 = scmp.lt.u32.totalorder %s5516_s9, %s6006_s6 }
  0x9d   :  { %p5522_p4 = pnand %p5520_p3, %p5517_p2 }
  0x9f   :  { %5525 = shalt.err (!%p5522_p4)
}
  0xa0   :  { %s5526_s0 = scalar_lea.vmem %s99_s19, 64  ;;  %p5531_p6 = scmp.lt.s32.totalorder %s99_s19, %s99_s19 }
  0xa1   :  { %p5527_p5 = scmp.ne.s32.totalorder %s99_s19, %s5526_s0  ;;  %p5532_p7 = scmp.lt.s32.totalorder %s5526_s0, %s5526_s0 }
  0xa3   :  { %p5533_p8 = por %p5532_p7, %p5531_p6 }
  0xa5   :  { %p5534_p9 = pnand %p5533_p8, %p5527_p5 }
  0xa7   :  { %5537 = shalt.err (!%p5534_p9)
}
  0xa8   :  { %101 = dma.hbm_to_vmem [thread:$0]  %s6006_s6, 64, %s99_s19, [#allocation13]  }
  0xa9   :  { %s5656_s26 = smov [#allocation17]   ;;  %s5657_s16 = smov [#allocation20]  }
  0xaa   :  { %s118_s15 = sshll.u32 %s5656_s26, 4  ;;  %s140_s7 = sshll.u32 %s5657_s16, 4  ;;  %s119_s15 = int_to_ptr.vmem [resolvable:$true] %s118_s15  ;;  %s141_s7 = int_to_ptr.vmem [resolvable:$true] %s140_s7 }
  0xab   :  { %s5538_s22 = scalar_lea.hbm %s6008_s8, 64 }
  0xac   :  { %p5539_p10 = scmp.ne.s32.totalorder %s6008_s8, %s5538_s22  ;;  %p5542_p11 = scmp.lt.u32.totalorder %s5538_s22, %s6008_s8 }
  0xae   :  { %p5544_p12 = pnand %p5542_p11, %p5539_p10 }
  0xb0   :  { %5547 = shalt.err (!%p5544_p12)
}
  0xb1   :  { %s5548_s6 = scalar_lea.vmem %s119_s15, 64  ;;  %p5553_p0 = scmp.lt.s32.totalorder %s119_s15, %s119_s15 }
  0xb2   :  { %p5549_p13 = scmp.ne.s32.totalorder %s119_s15, %s5548_s6  ;;  %p5554_p1 = scmp.lt.s32.totalorder %s5548_s6, %s5548_s6 }
  0xb4   :  { %p5555_p2 = por %p5554_p1, %p5553_p0 }
  0xb6   :  { %p5556_p3 = pnand %p5555_p2, %p5549_p13 }
  0xb8   :  { %5559 = shalt.err (!%p5556_p3)
}
  0xb9   :  { %121 = dma.hbm_to_vmem [thread:$0]  %s6008_s8, 64, %s119_s15, [#allocation16]  }
  0xba   :  { %s5560_s24 = scalar_lea.hbm %s6010_s10, 64 }
  0xbb   :  { %p5561_p4 = scmp.ne.s32.totalorder %s6010_s10, %s5560_s24  ;;  %p5564_p5 = scmp.lt.u32.totalorder %s5560_s24, %s6010_s10 }
  0xbd   :  { %p5566_p6 = pnand %p5564_p5, %p5561_p4 }
  0xbf   :  { %5569 = shalt.err (!%p5566_p6)
}
  0xc0   :  { %s5570_s28 = scalar_lea.vmem %s141_s7, 64  ;;  %p5575_p8 = scmp.lt.s32.totalorder %s141_s7, %s141_s7 }
  0xc1   :  { %p5571_p7 = scmp.ne.s32.totalorder %s141_s7, %s5570_s28  ;;  %p5576_p9 = scmp.lt.s32.totalorder %s5570_s28, %s5570_s28 }
  0xc3   :  { %p5577_p10 = por %p5576_p9, %p5575_p8 }
  0xc5   :  { %p5578_p11 = pnand %p5577_p10, %p5571_p7 }
  0xc7   :  { %5581 = shalt.err (!%p5578_p11)
}
  0xc8   :  { %143 = dma.hbm_to_vmem [thread:$0]  %s6010_s10, 64, %s141_s7, [#allocation19]  }
  0xc9   :  { %s5658_s14 = smov [#allocation23]   ;;  %s5582_s26 = scalar_lea.hbm %s6012_s12, 16 }
  0xca   :  { %s162_s0 = sshll.u32 %s5658_s14, 4  ;;  %p5583_p12 = scmp.ne.s32.totalorder %s6012_s12, %s5582_s26  ;;  %s163_s0 = int_to_ptr.vmem [resolvable:$true] %s162_s0 }
  0xcb   :  { %p5586_p13 = scmp.lt.u32.totalorder %s5582_s26, %s6012_s12 }
  0xcd   :  { %p5588_p0 = pnand %p5586_p13, %p5583_p12 }
  0xcf   :  { %5591 = shalt.err (!%p5588_p0)
}
  0xd0   :  { %s5592_s22 = scalar_lea.vmem %s163_s0, 16  ;;  %s5596_s10 = scalar_lea.vmem %s163_s0, 32 }
  0xd1   :  { %p5593_p1 = scmp.ne.s32.totalorder %s163_s0, %s5592_s22  ;;  %p5597_p2 = scmp.lt.s32.totalorder %s163_s0, %s163_s0 }
  0xd2   :  { %p5598_p3 = scmp.lt.s32.totalorder %s5596_s10, %s5592_s22 }
  0xd4   :  { %p5599_p4 = por %p5598_p3, %p5597_p2 }
  0xd6   :  { %p5600_p5 = pnand %p5599_p4, %p5593_p1 }
  0xd8   :  { %5603 = shalt.err (!%p5600_p5)
}
  0xd9   :  { %165 = dma.hbm_to_vmem [thread:$0]  %s6012_s12, 16, %s163_s0, [#allocation22]  }
  0xda   :  { %5626 = dma.done.wait [#allocation4], 64  }
  0xdb   :  { %5627 = vsyncadd [#allocation4], 4294967232 }
  0xdc   :  { %5628 = dma.done.wait [#allocation7], 128  }
  0xdd   :  { %5629 = vsyncadd [#allocation7], 4294967168 }
  0xde   :  { %5630 = dma.done.wait [#allocation10], 2560  }
  0xdf   :  { %5631 = vsyncadd [#allocation10], 4294964736 }
  0xe0   :  { %5632 = dma.done.wait [#allocation13], 2112  }
  0xe1   :  { %5633 = vsyncadd [#allocation13], 4294965184 }
  0xe2   :  { %5634 = dma.done.wait [#allocation16], 128  }
  0xe3   :  { %5635 = vsyncadd [#allocation16], 4294967168 }
  0xe4   :  { %5636 = dma.done.wait [#allocation19], 49216  }
  0xe5   :  { %5637 = vsyncadd [#allocation19], 4294918080 }
  0xe6   :  { %5638 = dma.done.wait [#allocation22], 4112  }
  0xe7   :  { %5639 = vsyncadd [#allocation22], 4294963184  ;;  %v5659_v0 = vmov 0   ;;  %v4656_v1 = vld [vmem:[#allocation9 + $0x4] ss:$16 sps:$4 sm:$0xff]   ;;  %vm277_vm0 = vcmask 261120  }
  0xe8   :  { %313 = vmatprep.mubr.bf16.mxu0 %v5659_v0  ;;  %354 = vmatprep.mubr.bf16.mxu1 %v5659_v0  ;;  %v4658_v2 = vld [vmem:[#allocation9] ss:$16 sps:$4 sm:$0xff]   ;;  %v4659_v3 = vld [vmem:[#allocation9 + $0x24] ss:$16 sps:$4 sm:$0xff]   ;;  %v4662_v5 = vld [vmem:[#allocation9 + $0xc] ss:$16 sps:$4 sm:$0xff]  }
  0xe9   :  { %281 = vmatprep.subr.bf16.mxu0 %v4656_v1  ;;  %v4661_v4 = vld [vmem:[#allocation9 + $0x20] ss:$16 sps:$4 sm:$0xff]   ;;  %v4664_v6 = vld [vmem:[#allocation9 + $0x8] ss:$16 sps:$4 sm:$0xff]   ;;  %v206_v7 = vld [vmem:[#allocation3] sm:$0xf]  ;;  %322 = vmatprep.subr.bf16.mxu1 %v4662_v5 }
  0xea   :  { %282 = vmatpush1.bf16.msra.mxu0 %v4658_v2  ;;  %v4665_v8 = vld [vmem:[#allocation9 + $0x2c] ss:$16 sps:$4 sm:$0xff]   ;;  %323 = vmatpush1.bf16.msra.mxu1 %v4664_v6  ;;  %v4667_v9 = vld [vmem:[#allocation9 + $0x28] ss:$16 sps:$4 sm:$0xff]   ;;  %v4670_v10 = vld [vmem:[#allocation11 + $0x4] ss:$16 sps:$4 sm:$0xff]  }
  0xeb   :  { %283 = vmatprep.subr.bf16.mxu0 %v4659_v3  ;;  %324 = vmatprep.subr.bf16.mxu1 %v4665_v8  ;;  %v4668_v11 = vld [vmem:[#allocation11] ss:$16 sps:$4 sm:$0xff]   ;;  %v4673_v12 = vld [vmem:[#allocation11 + $0x24] ss:$16 sps:$4 sm:$0xff]   ;;  %v4677_v14 = vld [vmem:[#allocation11 + $0x8] ss:$16 sps:$4 sm:$0xff]  }
  0xec   :  { %v4671_v13 = vld [vmem:[#allocation11 + $0x20] ss:$16 sps:$4 sm:$0xff]   ;;  %v4679_v15 = vld [vmem:[#allocation11 + $0xc] ss:$16 sps:$4 sm:$0xff]   ;;  %v4676_v16 = vld [vmem:[#allocation11 + $0x44] ss:$16 sps:$4 sm:$0xff]  }
  0xed   :  { %v4682_v17 = vld [vmem:[#allocation11 + $0x2c] ss:$16 sps:$4 sm:$0xff]   ;;  %v4674_v18 = vld [vmem:[#allocation11 + $0x40] ss:$16 sps:$4 sm:$0xff]   ;;  %v4680_v19 = vld [vmem:[#allocation11 + $0x28] ss:$16 sps:$4 sm:$0xff]  }
  0xee   :  { %284 = vmatpush1.bf16.msra.mxu0 %v4661_v4  ;;  %325 = vmatpush1.bf16.msra.mxu1 %v4667_v9  ;;  %v4685_v20 = vld [vmem:[#allocation11 + $0x4c] ss:$16 sps:$4 sm:$0xff]   ;;  %v4688_v21 = vld [vmem:[#allocation12 + $0x4] ss:$16 sps:$4 sm:$0xff]   ;;  %v385_v22 = vld [vmem:[#allocation6] sm:$0xf] }
  0xef   :  { %484 = vmatprep.subr.bf16.mxu0 %v4670_v10  ;;  %525 = vmatprep.subr.bf16.mxu1 %v4679_v15  ;;  %v4683_v23 = vld [vmem:[#allocation11 + $0x48] ss:$16 sps:$4 sm:$0xff]   ;;  %v4686_v24 = vld [vmem:[#allocation12] ss:$16 sps:$4 sm:$0xff]   ;;  %vm480_vm1 = vcmask 392192   ;;  %vm707_vm2 = vcmask 523264  }
  0xf0   :  { %v4691_v25 = vld [vmem:[#allocation12 + $0xc] ss:$16 sps:$4 sm:$0xff]   ;;  %v4694_v26 = vld [vmem:[#allocation12 + $0x24] ss:$16 sps:$4 sm:$0xff]   ;;  %v4689_v27 = vld [vmem:[#allocation12 + $0x8] ss:$16 sps:$4 sm:$0xff]  }
  0xf1   :  { %4062 = vmatmul.mubr.msk.bf16.vlgmr.msra.gmra.mrb[0].mxu0 %vm277_vm0, %v206_v7  ;;  %4063 = vmatmul.mubr.msk.bf16.vlgmr.msra.gmra.mrb[0].mxu1 %vm277_vm0, %v206_v7  ;;  %v4692_v28 = vld [vmem:[#allocation12 + $0x20] ss:$16 sps:$4 sm:$0xff]   ;;  %v4697_v29 = vld [vmem:[#allocation12 + $0x2c] ss:$16 sps:$4 sm:$0xff]   ;;  %v4700_v30 = vld [vmem:[#allocation12 + $0x44] ss:$16 sps:$4 sm:$0xff]  }
  0xf2   :  { %485 = vmatpush1.bf16.msra.mxu0 %v4668_v11  ;;  %516 = vmatprep.mubr.bf16.mxu0 %v5659_v0  ;;  %v4695_v31 = vld [vmem:[#allocation12 + $0x28] ss:$16 sps:$4 sm:$0xff]   ;;  %v4698_v32 = vld [vmem:[#allocation12 + $0x40] ss:$16 sps:$4 sm:$0xff]   ;;  %v4703_v33 = vld [vmem:[#allocation12 + $0x4c] ss:$16 sps:$4 sm:$0xff]  }
  0xf3   :  { %486 = vmatprep.subr.bf16.mxu0 %v4673_v12  ;;  %526 = vmatpush1.bf16.msra.mxu1 %v4677_v14  ;;  %v4706_v34 = vld [vmem:[#allocation12 + $0x64] ss:$16 sps:$4 sm:$0xff]   ;;  %v4701_v35 = vld [vmem:[#allocation12 + $0x48] ss:$16 sps:$4 sm:$0xff]   ;;  %v4704_v36 = vld [vmem:[#allocation12 + $0x60] ss:$16 sps:$4 sm:$0xff]  }
  0xf4   :  { %557 = vmatprep.mubr.bf16.mxu1 %v5659_v0  ;;  %527 = vmatprep.subr.bf16.mxu1 %v4682_v17  ;;  %v4709_v37 = vld [vmem:[#allocation12 + $0x6c] ss:$16 sps:$4 sm:$0xff]   ;;  %v4712_v38 = vld [vmem:[#allocation18 + $0x4] ss:$16 sps:$4 sm:$0xff]   ;;  %v4707_v39 = vld [vmem:[#allocation12 + $0x68] ss:$16 sps:$4 sm:$0xff]  }
  0xf5   :  { %v588_v40 = vld [vmem:[#allocation8] sm:$0xf]  ;;  %v4715_v42 = vld [vmem:[#allocation18 + $0xc] ss:$16 sps:$4 sm:$0xff]   ;;  %v4718_v43 = vld [vmem:[#allocation18 + $0x24] ss:$16 sps:$4 sm:$0xff]  }
  0xf6   :  { %487 = vmatpush1.bf16.msra.mxu0 %v4671_v13  ;;  %v4710_v41 = vld [vmem:[#allocation18] ss:$16 sps:$4 sm:$0xff]   ;;  %v4713_v44 = vld [vmem:[#allocation18 + $0x8] ss:$16 sps:$4 sm:$0xff]   ;;  %v4721_v46 = vld [vmem:[#allocation18 + $0x2c] ss:$16 sps:$4 sm:$0xff]  }
  0xf7   :  { %488 = vmatprep.subr.bf16.mxu0 %v4676_v16  ;;  %528 = vmatpush1.bf16.msra.mxu1 %v4680_v19  ;;  %v4716_v45 = vld [vmem:[#allocation18 + $0x20] ss:$16 sps:$4 sm:$0xff]   ;;  %v4724_v47 = vld [vmem:[#allocation18 + $0x44] ss:$16 sps:$4 sm:$0xff]   ;;  %v4719_v48 = vld [vmem:[#allocation18 + $0x28] ss:$16 sps:$4 sm:$0xff]  }
  0xf8   :  { %529 = vmatprep.subr.bf16.mxu1 %v4685_v20  ;;  %v4722_v49 = vld [vmem:[#allocation18 + $0x40] ss:$16 sps:$4 sm:$0xff]   ;;  %v4727_v50 = vld [vmem:[#allocation18 + $0x4c] ss:$16 sps:$4 sm:$0xff]   ;;  %v4730_v51 = vld [vmem:[#allocation18 + $0x64] ss:$16 sps:$4 sm:$0xff]  }
  0xf9   :  { %v4725_v52 = vld [vmem:[#allocation18 + $0x48] ss:$16 sps:$4 sm:$0xff]   ;;  %v4728_v53 = vld [vmem:[#allocation18 + $0x60] ss:$16 sps:$4 sm:$0xff]   ;;  %v4733_v54 = vld [vmem:[#allocation18 + $0x6c] ss:$16 sps:$4 sm:$0xff]  }
  0xfa   :  { %489 = vmatpush1.bf16.msra.mxu0 %v4674_v18  ;;  %v4736_v55 = vld [vmem:[#allocation18 + $0x84] ss:$16 sps:$4 sm:$0xff]   ;;  %v4731_v56 = vld [vmem:[#allocation18 + $0x68] ss:$16 sps:$4 sm:$0xff]   ;;  %v4734_v57 = vld [vmem:[#allocation18 + $0x80] ss:$16 sps:$4 sm:$0xff]  }
  0xfb   :  { %711 = vmatprep.subr.bf16.mxu0 %v4688_v21  ;;  %530 = vmatpush1.bf16.msra.mxu1 %v4683_v23  ;;  %v4739_v58 = vld [vmem:[#allocation18 + $0x8c] ss:$16 sps:$4 sm:$0xff]   ;;  %v4742_v59 = vld [vmem:[#allocation18 + $0xa4] ss:$16 sps:$4 sm:$0xff]   ;;  %v4737_v60 = vld [vmem:[#allocation18 + $0x88] ss:$16 sps:$4 sm:$0xff]  }
  0xfc   :  { %752 = vmatprep.subr.bf16.mxu1 %v4691_v25  ;;  %v4740_v61 = vld [vmem:[#allocation18 + $0xa0] ss:$16 sps:$4 sm:$0xff]   ;;  %v4745_v62 = vld [vmem:[#allocation18 + $0xac] ss:$16 sps:$4 sm:$0xff]   ;;  %v4748_v63 = vld [vmem:[#allocation18 + $0xc4] ss:$16 sps:$4 sm:$0xff]  }
  0xfd   :  { %4078 = vmatmul.mubr.msk.bf16.vlgmr.msra.gmra.mrb[4].mxu0 %vm480_vm1, %v385_v22  ;;  %v4746_v1 = vld [vmem:[#allocation18 + $0xc0] ss:$16 sps:$4 sm:$0xff]   ;;  %v4751_v2 = vld [vmem:[#allocation18 + $0xcc] ss:$16 sps:$4 sm:$0xff]   ;;  %v4749_v3 = vld [vmem:[#allocation18 + $0xc8] ss:$16 sps:$4 sm:$0xff]  }
  0xfe   :  { %712 = vmatpush1.bf16.msra.mxu0 %v4686_v24  ;;  %743 = vmatprep.mubr.bf16.mxu0 %v5659_v0  ;;  %v4754_v4 = vld [vmem:[#allocation18 + $0xe4] ss:$16 sps:$4 sm:$0xff]   ;;  %v4752_v5 = vld [vmem:[#allocation18 + $0xe0] ss:$16 sps:$4 sm:$0xff]   ;;  %v4757_v6 = vld [vmem:[#allocation18 + $0xec] ss:$16 sps:$4 sm:$0xff]  }
  0xff   :  { %713 = vmatprep.subr.bf16.mxu0 %v4694_v26  ;;  %4079 = vmatmul.mubr.msk.bf16.vlgmr.msra.gmra.mrb[4].mxu1 %vm480_vm1, %v385_v22  ;;  %v4760_v7 = vld [vmem:[#allocation18 + $0x104] ss:$16 sps:$4 sm:$0xff]   ;;  %v4755_v8 = vld [vmem:[#allocation18 + $0xe8] ss:$16 sps:$4 sm:$0xff]   ;;  %v4758_v9 = vld [vmem:[#allocation18 + $0x100] ss:$16 sps:$4 sm:$0xff]  }
 0x100   :  { %753 = vmatpush1.bf16.msra.mxu1 %v4689_v27  ;;  %784 = vmatprep.mubr.bf16.mxu1 %v5659_v0  ;;  %v4743_v0 = vld [vmem:[#allocation18 + $0xa8] ss:$16 sps:$4 sm:$0xff]   ;;  %v4763_v10 = vld [vmem:[#allocation18 + $0x10c] ss:$16 sps:$4 sm:$0xff]   ;;  %v4766_v11 = vld [vmem:[#allocation18 + $0x124] ss:$16 sps:$4 sm:$0xff]  }
 0x101   :  { %754 = vmatprep.subr.bf16.mxu1 %v4697_v29  ;;  %v4761_v12 = vld [vmem:[#allocation18 + $0x108] ss:$16 sps:$4 sm:$0xff]   ;;  %v4764_v13 = vld [vmem:[#allocation18 + $0x120] ss:$16 sps:$4 sm:$0xff]   ;;  %v4769_v14 = vld [vmem:[#allocation18 + $0x12c] ss:$16 sps:$4 sm:$0xff]  }
 0x102   :  { %714 = vmatpush1.bf16.msra.mxu0 %v4692_v28  ;;  %v4772_v15 = vld [vmem:[#allocation18 + $0x144] ss:$16 sps:$4 sm:$0xff]   ;;  %v4767_v16 = vld [vmem:[#allocation18 + $0x128] ss:$16 sps:$4 sm:$0xff]   ;;  %v4770_v17 = vld [vmem:[#allocation18 + $0x140] ss:$16 sps:$4 sm:$0xff]  }
 0x103   :  { %715 = vmatprep.subr.bf16.mxu0 %v4700_v30  ;;  %v4775_v18 = vld [vmem:[#allocation18 + $0x14c] ss:$16 sps:$4 sm:$0xff]   ;;  %v4778_v19 = vld [vmem:[#allocation18 + $0x164] ss:$16 sps:$4 sm:$0xff]   ;;  %v4773_v20 = vld [vmem:[#allocation18 + $0x148] ss:$16 sps:$4 sm:$0xff]  }
 0x104   :  { %755 = vmatpush1.bf16.msra.mxu1 %v4695_v31  ;;  %v4776_v21 = vld [vmem:[#allocation18 + $0x160] ss:$16 sps:$4 sm:$0xff]   ;;  %v4781_v22 = vld [vmem:[#allocation18 + $0x16c] ss:$16 sps:$4 sm:$0xff]   ;;  %v4784_v23 = vld [vmem:[#allocation18 + $0x184] ss:$16 sps:$4 sm:$0xff]  }
 0x105   :  { %756 = vmatprep.subr.bf16.mxu1 %v4703_v33  ;;  %v4779_v24 = vld [vmem:[#allocation18 + $0x168] ss:$16 sps:$4 sm:$0xff]   ;;  %v4782_v25 = vld [vmem:[#allocation18 + $0x180] ss:$16 sps:$4 sm:$0xff]   ;;  %v4787_v26 = vld [vmem:[#allocation18 + $0x18c] ss:$16 sps:$4 sm:$0xff]  }
 0x106   :  { %716 = vmatpush1.bf16.msra.mxu0 %v4698_v32  ;;  %v4790_v27 = vld [vmem:[#allocation18 + $0x1a4] ss:$16 sps:$4 sm:$0xff]   ;;  %v4785_v28 = vld [vmem:[#allocation18 + $0x188] ss:$16 sps:$4 sm:$0xff]   ;;  %v4788_v29 = vld [vmem:[#allocation18 + $0x1a0] ss:$16 sps:$4 sm:$0xff]  }
 0x107   :  { %717 = vmatprep.subr.bf16.mxu0 %v4706_v34  ;;  %v4793_v30 = vld [vmem:[#allocation18 + $0x1ac] ss:$16 sps:$4 sm:$0xff]   ;;  %v4791_v31 = vld [vmem:[#allocation18 + $0x1a8] ss:$16 sps:$4 sm:$0xff]   ;;  %v4796_v32 = vld [vmem:[#allocation18 + $0x1c4] ss:$16 sps:$4 sm:$0xff]  }
 0x108   :  { %757 = vmatpush1.bf16.msra.mxu1 %v4701_v35  ;;  %v4799_v33 = vld [vmem:[#allocation18 + $0x1cc] ss:$16 sps:$4 sm:$0xff]   ;;  %v4794_v34 = vld [vmem:[#allocation18 + $0x1c0] ss:$16 sps:$4 sm:$0xff]   ;;  %v4797_v35 = vld [vmem:[#allocation18 + $0x1c8] ss:$16 sps:$4 sm:$0xff]  }
 0x109   :  { %758 = vmatprep.subr.bf16.mxu1 %v4709_v37  ;;  %v4805_v37 = vld [vmem:[#allocation18 + $0x1ec] ss:$16 sps:$4 sm:$0xff]   ;;  %s5660_s12 = smov [#allocation24]  }
 0x10a   :  { %718 = vmatpush1.bf16.msra.mxu0 %v4704_v36  ;;  %v4802_v36 = vld [vmem:[#allocation18 + $0x1e4] ss:$16 sps:$4 sm:$0xff]   ;;  %s4039_s5 = sshll.u32 %s5660_s12, 4  ;;  %s4040_s5 = int_to_ptr.vmem [resolvable:$true] %s4039_s5 }
 0x10b   :  { %3189 = vmatprep.subr.bf16.mxu0 %v4712_v38  ;;  %v4800_v38 = vld [vmem:[#allocation18 + $0x1e0] ss:$16 sps:$4 sm:$0xff]   ;;  %s5604_s11 = scalar_lea.vmem %s4040_s5, 128  ;;  %p5609_p7 = scmp.lt.s32.totalorder %s4040_s5, %s4040_s5 }
 0x10c   :  { %759 = vmatpush1.bf16.msra.mxu1 %v4707_v39  ;;  %v4803_v39 = vld [vmem:[#allocation18 + $0x1e8] ss:$16 sps:$4 sm:$0xff]   ;;  %p5605_p6 = scmp.ne.s32.totalorder %s4040_s5, %s5604_s11  ;;  %p5610_p8 = scmp.lt.s32.totalorder %s5604_s11, %s5604_s11 }
 0x10d   :  { %4098 = vmatmul.mubr.msk.bf16.vlgmr.msra.gmra.mrb[8].mxu0 %vm707_vm2, %v588_v40  ;;  %3435 = vmatprep.subr.bf16.mxu1 %v4715_v42  ;;  %v217_v42 = vlaneseq }
 0x10e   :  { %3190 = vmatpush1.bf16.msra.mxu0 %v4710_v41  ;;  %v4811_v41 = vld [vmem:[#allocation18 + $0x20c] ss:$16 sps:$4 sm:$0xff]   ;;  %p5611_p9 = por %p5610_p8, %p5609_p7 }
 0x10f   :  { %3191 = vmatprep.subr.bf16.mxu0 %v4718_v43  ;;  %4099 = vmatmul.mubr.msk.bf16.vlgmr.msra.gmra.mrb[8].mxu1 %vm707_vm2, %v588_v40  ;;  %v4808_v40 = vld [vmem:[#allocation18 + $0x204] ss:$16 sps:$4 sm:$0xff]   ;;  %v218_v43 = vshrl.u32 %v217_v42, 7  ;;  %v5951_v42 = vld [vmem:[#allocation17] sm:$0xf] }
 0x110   :  { %3436 = vmatpush1.bf16.msra.mxu1 %v4713_v44  ;;  %p5612_p10 = pnand %p5611_p9, %p5605_p6 }
 0x111   :  { %3437 = vmatprep.subr.bf16.mxu1 %v4721_v46  ;;  %v5919_v44 = vsub.s32 0, %v218_v43  ;;  %v5923_v46 = vsub.s32 1, %v218_v43 }
 0x112   :  { %3192 = vmatpush1.bf16.msra.mxu0 %v4716_v45  ;;  %v5921_v45 = vld [vmem:[#allocation14] sm:$0xf] }
 0x113   :  { %3193 = vmatprep.subr.bf16.mxu0 %v4724_v47  ;;  %v5925_v47 = vsub.s32 3, %v218_v43 }
 0x114   :  { %3438 = vmatpush1.bf16.msra.mxu1 %v4719_v48  ;;  %v220_v48 = vrot.slane %v5921_v45, %v5919_v44 }
 0x115   :  { %3439 = vmatprep.subr.bf16.mxu1 %v4727_v50 }
 0x116   :  { %3194 = vmatpush1.bf16.msra.mxu0 %v4722_v49  ;;  %v224_v49 = vrot.slane %v5921_v45, %v5923_v46 }
 0x117   :  { %3195 = vmatprep.subr.bf16.mxu0 %v4730_v51 }
 0x118   :  { %3440 = vmatpush1.bf16.msra.mxu1 %v4725_v52 }
 0x119   :  { %3441 = vmatprep.subr.bf16.mxu1 %v4733_v54 }
 0x11a   :  { %3196 = vmatpush1.bf16.msra.mxu0 %v4728_v53  ;;  %v232_v53 = vrot.slane %v5921_v45, %v5925_v47 }
 0x11b   :  { %3197 = vmatprep.subr.bf16.mxu0 %v4736_v55 }
 0x11c   :  { %3442 = vmatpush1.bf16.msra.mxu1 %v4731_v56 }
 0x11d   :  { %3443 = vmatprep.subr.bf16.mxu1 %v4739_v58 }
 0x11e   :  { %3198 = vmatpush1.bf16.msra.mxu0 %v4734_v57 }
 0x11f   :  { %3199 = vmatprep.subr.bf16.mxu0 %v4742_v59 }
 0x120   :  { %3444 = vmatpush1.bf16.msra.mxu1 %v4737_v60  ;;  %v4806_v60 = vld [vmem:[#allocation18 + $0x200] ss:$16 sps:$4 sm:$0xff]  }
 0x121   :  { %3445 = vmatprep.subr.bf16.mxu1 %v4745_v62 }
 0x122   :  { %3200 = vmatpush1.bf16.msra.mxu0 %v4740_v61  ;;  %v4809_v61 = vld [vmem:[#allocation18 + $0x208] ss:$16 sps:$4 sm:$0xff]  }
 0x123   :  { %3201 = vmatprep.subr.bf16.mxu0 %v4748_v63 }
 0x124   :  { %3446 = vmatpush1.bf16.msra.mxu1 %v4743_v0 }
 0x125   :  { %3447 = vmatprep.subr.bf16.mxu1 %v4751_v2 }
 0x126   :  { %3202 = vmatpush1.bf16.msra.mxu0 %v4746_v1 }
 0x127   :  { %3203 = vmatprep.subr.bf16.mxu0 %v4754_v4  ;;  %v4814_v4 = vld [vmem:[#allocation18 + $0x224] ss:$16 sps:$4 sm:$0xff]  }
 0x128   :  { %3448 = vmatpush1.bf16.msra.mxu1 %v4749_v3 }
 0x129   :  { %3449 = vmatprep.subr.bf16.mxu1 %v4757_v6 }
 0x12a   :  { %3204 = vmatpush1.bf16.msra.mxu0 %v4752_v5  ;;  %v4817_v5 = vld [vmem:[#allocation18 + $0x22c] ss:$16 sps:$4 sm:$0xff]  }
 0x12b   :  { %3205 = vmatprep.subr.bf16.mxu0 %v4760_v7  ;;  %v4812_v7 = vld [vmem:[#allocation18 + $0x220] ss:$16 sps:$4 sm:$0xff]  }
 0x12c   :  { %3450 = vmatpush1.bf16.msra.mxu1 %v4755_v8  ;;  %v4815_v8 = vld [vmem:[#allocation18 + $0x228] ss:$16 sps:$4 sm:$0xff]  }
 0x12d   :  { %3451 = vmatprep.subr.bf16.mxu1 %v4763_v10  ;;  %v4820_v10 = vld [vmem:[#allocation18 + $0x244] ss:$16 sps:$4 sm:$0xff]  }
 0x12e   :  { %3206 = vmatpush1.bf16.msra.mxu0 %v4758_v9 }
 0x12f   :  { %3207 = vmatprep.subr.bf16.mxu0 %v4766_v11  ;;  %v5935_v11 = vsub.s32 2, %v218_v43 }
 0x130   :  { %3452 = vmatpush1.bf16.msra.mxu1 %v4761_v12  ;;  %v4823_v12 = vld [vmem:[#allocation18 + $0x24c] ss:$16 sps:$4 sm:$0xff]  }
 0x131   :  { %3453 = vmatprep.subr.bf16.mxu1 %v4769_v14 }
 0x132   :  { %3208 = vmatpush1.bf16.msra.mxu0 %v4764_v13  ;;  %v5937_v13 = vld [vmem:[#allocation15] sm:$0xf] }
 0x133   :  { %3209 = vmatprep.subr.bf16.mxu0 %v4772_v15  ;;  %v411_v15 = vrot.slane %v5937_v13, %v5935_v11 }
 0x134   :  { %3454 = vmatpush1.bf16.msra.mxu1 %v4767_v16 }
 0x135   :  { %3455 = vmatprep.subr.bf16.mxu1 %v4775_v18  ;;  %v4818_v18 = vld [vmem:[#allocation18 + $0x240] ss:$16 sps:$4 sm:$0xff]  }
 0x136   :  { %3210 = vmatpush1.bf16.msra.mxu0 %v4770_v17  ;;  %v415_v17 = vrot.slane %v5937_v13, %v5925_v47 }
 0x137   :  { %3211 = vmatprep.subr.bf16.mxu0 %v4778_v19  ;;  %v4821_v19 = vld [vmem:[#allocation18 + $0x248] ss:$16 sps:$4 sm:$0xff]  }
 0x138   :  { %3456 = vmatpush1.bf16.msra.mxu1 %v4773_v20 }
 0x139   :  { %3457 = vmatprep.subr.bf16.mxu1 %v4781_v22  ;;  %v4829_v22 = vld [vmem:[#allocation18 + $0x26c] ss:$16 sps:$4 sm:$0xff]  }
 0x13a   :  { %3212 = vmatpush1.bf16.msra.mxu0 %v4776_v21  ;;  %v4826_v21 = vld [vmem:[#allocation18 + $0x264] ss:$16 sps:$4 sm:$0xff]  }
 0x13b   :  { %3213 = vmatprep.subr.bf16.mxu0 %v4784_v23 }
 0x13c   :  { %3458 = vmatpush1.bf16.msra.mxu1 %v4779_v24 }
 0x13d   :  { %3459 = vmatprep.subr.bf16.mxu1 %v4787_v26 }
 0x13e   :  { %3214 = vmatpush1.bf16.msra.mxu0 %v4782_v25 }
 0x13f   :  { %3215 = vmatprep.subr.bf16.mxu0 %v4790_v27 }
 0x140   :  { %3460 = vmatpush1.bf16.msra.mxu1 %v4785_v28 }
 0x141   :  { %3461 = vmatprep.subr.bf16.mxu1 %v4793_v30  ;;  %v4827_v30 = vld [vmem:[#allocation18 + $0x268] ss:$16 sps:$4 sm:$0xff]  }
 0x142   :  { %3216 = vmatpush1.bf16.msra.mxu0 %v4788_v29  ;;  %v4824_v29 = vld [vmem:[#allocation18 + $0x260] ss:$16 sps:$4 sm:$0xff]  }
 0x143   :  { %3217 = vmatprep.subr.bf16.mxu0 %v4796_v32  ;;  %v4832_v32 = vld [vmem:[#allocation18 + $0x284] ss:$16 sps:$4 sm:$0xff]  }
 0x144   :  { %3462 = vmatpush1.bf16.msra.mxu1 %v4791_v31 }
 0x145   :  { %3463 = vmatprep.subr.bf16.mxu1 %v4799_v33  ;;  %v4835_v33 = vld [vmem:[#allocation18 + $0x28c] ss:$16 sps:$4 sm:$0xff]  }
 0x146   :  { %3218 = vmatpush1.bf16.msra.mxu0 %v4794_v34  ;;  %v4830_v34 = vld [vmem:[#allocation18 + $0x280] ss:$16 sps:$4 sm:$0xff]  }
 0x147   :  { %3219 = vmatprep.subr.bf16.mxu0 %v4802_v36  ;;  %v4838_v36 = vld [vmem:[#allocation18 + $0x2a4] ss:$16 sps:$4 sm:$0xff]  }
 0x148   :  { %3464 = vmatpush1.bf16.msra.mxu1 %v4797_v35  ;;  %v4833_v35 = vld [vmem:[#allocation18 + $0x288] ss:$16 sps:$4 sm:$0xff]  }
 0x149   :  { %3465 = vmatprep.subr.bf16.mxu1 %v4805_v37  ;;  %v4841_v37 = vld [vmem:[#allocation18 + $0x2ac] ss:$16 sps:$4 sm:$0xff]  }
 0x14a   :  { %3220 = vmatpush1.bf16.msra.mxu0 %v4800_v38  ;;  %v4836_v38 = vld [vmem:[#allocation18 + $0x2a0] ss:$16 sps:$4 sm:$0xff]  }
 0x14b   :  { %3230 = vmatprep.subr.bf16.mxu0 %v4808_v40  ;;  %v4844_v40 = vld [vmem:[#allocation18 + $0x2c4] ss:$16 sps:$4 sm:$0xff]  }
 0x14c   :  { %3466 = vmatpush1.bf16.msra.mxu1 %v4803_v39  ;;  %v4839_v39 = vld [vmem:[#allocation18 + $0x2a8] ss:$16 sps:$4 sm:$0xff]  }
 0x14d   :  { %3476 = vmatprep.subr.bf16.mxu1 %v4811_v41  ;;  %v4847_v41 = vld [vmem:[#allocation18 + $0x2cc] ss:$16 sps:$4 sm:$0xff]  }
 0x1c4   :  { %v315_v50 = vpop.f32.mrb[0].mxu0  ;;  %v5933_v58 = vpop.f32.mrb[0].mxu1 }
 0x1c5   :  { %v316_v51 = vadd.f32 %v315_v50, %v220_v48  ;;  %v317_v52 = vpop.f32.mrb[1].mxu0  ;;  %v358_v62 = vpop.f32.mrb[1].mxu1  ;;  %v618_v48 = vrot.slane %v5951_v42, %v5935_v11  ;;  %v622_v50 = vrot.slane %v5951_v42, %v5925_v47 }
 0x1c6   :  { %v318_v54 = vadd.f32 %v317_v52, %v224_v49  ;;  %v319_v55 = vpop.f32.mrb[2].mxu0  ;;  %v359_v63 = vadd.f32 %v358_v62, %v232_v53  ;;  %v360_v0 = vpop.f32.mrb[2].mxu1  ;;  %v4845_v52 = vld [vmem:[#allocation18 + $0x2c8] ss:$16 sps:$4 sm:$0xff]  }
 0x1c7   :  { %v363_v56 = vmax.f32 %v316_v51, 0.0  ;;  %v320_v57 = vpop.f32.mrb[3].mxu0  ;;  %v361_v2 = vpop.f32.mrb[3].mxu1  ;;  %v4842_v51 = vld [vmem:[#allocation18 + $0x2c0] ss:$16 sps:$4 sm:$0xff]  }
 0x1c8   :  { %v364_v59 = vmax.f32 %v318_v54, 0.0  ;;  %v366_v6 = vmax.f32 %v359_v63, 0.0  ;;  %v4850_v54 = vld [vmem:[#allocation18 + $0x2e4] ss:$16 sps:$4 sm:$0xff]   ;;  %v4853_v55 = vld [vmem:[#allocation18 + $0x2ec] ss:$16 sps:$4 sm:$0xff]  }
 0x1c9   :  { %v4537_v3 = vpack.c.bf16 %v363_v56, %v363_v56  ;;  %v4848_v63 = vld [vmem:[#allocation18 + $0x2e0] ss:$16 sps:$4 sm:$0xff]   ;;  %v4851_v0 = vld [vmem:[#allocation18 + $0x2e8] ss:$16 sps:$4 sm:$0xff]   ;;  %v4856_v2 = vld [vmem:[#allocation18 + $0x304] ss:$16 sps:$4 sm:$0xff]  }
 0x1ca   :  { %v4538_v1 = vpack.c.bf16 %v364_v59, %v364_v59  ;;  %v4540_v9 = vpack.c.bf16 %v366_v6, %v366_v6  ;;  %v4862_v6 = vld [vmem:[#allocation18 + $0x324] ss:$16 sps:$4 sm:$0xff]  }
 0x1cc   :  { %3221 = vmatprep.mubr.bf16.mxu0 %v4538_v1  ;;  %3467 = vmatprep.mubr.bf16.mxu1 %v4538_v1 }
 0x1cd   :  { %3222 = vmatmul.mubr.bf16.vlgmr.msra.gmra.mrb[12].mxu0 %v4537_v3  ;;  %3468 = vmatmul.mubr.bf16.vlgmr.msra.gmra.mrb[12].mxu1 %v4537_v3  ;;  %v4859_v3 = vld [vmem:[#allocation18 + $0x30c] ss:$16 sps:$4 sm:$0xff]  }
 0x1ce   :  { %3231 = vmatpush1.bf16.msra.mxu0 %v4806_v60  ;;  %3477 = vmatpush1.bf16.msra.mxu1 %v4809_v61 }
 0x1cf   :  { %3232 = vmatprep.subr.bf16.mxu0 %v4814_v4  ;;  %3478 = vmatprep.subr.bf16.mxu1 %v4817_v5  ;;  %v4854_v4 = vld [vmem:[#allocation18 + $0x300] ss:$16 sps:$4 sm:$0xff]   ;;  %v4857_v5 = vld [vmem:[#allocation18 + $0x308] ss:$16 sps:$4 sm:$0xff]  }
 0x1d0   :  { %3262 = vmatprep.mubr.bf16.mxu0 %v4540_v9  ;;  %3508 = vmatprep.mubr.bf16.mxu1 %v4540_v9  ;;  %v5939_v14 = vpop.f32.mrb[4].mxu0  ;;  %v4863_v9 = vld [vmem:[#allocation18 + $0x328] ss:$16 sps:$4 sm:$0xff]  }
 0x1d1   :  { %v5943_v16 = vpop.f32.mrb[5].mxu0 }
 0x1d2   :  { %3233 = vmatpush1.bf16.msra.mxu0 %v4812_v7  ;;  %3479 = vmatpush1.bf16.msra.mxu1 %v4815_v8  ;;  %v522_v20 = vpop.f32.mrb[6].mxu0  ;;  %v559_v24 = vpop.f32.mrb[4].mxu1  ;;  %v4865_v7 = vld [vmem:[#allocation18 + $0x32c] ss:$16 sps:$4 sm:$0xff]   ;;  %v4860_v8 = vld [vmem:[#allocation18 + $0x320] ss:$16 sps:$4 sm:$0xff]  }
 0x1d3   :  { %3234 = vmatprep.subr.bf16.mxu0 %v4820_v10  ;;  %3480 = vmatprep.subr.bf16.mxu1 %v4823_v12  ;;  %v523_v23 = vpop.f32.mrb[7].mxu0  ;;  %v5947_v25 = vadd.f32 %v559_v24, %v411_v15  ;;  %v561_v26 = vpop.f32.mrb[5].mxu1  ;;  %v4868_v10 = vld [vmem:[#allocation18 + $0x344] ss:$16 sps:$4 sm:$0xff]   ;;  %v4871_v12 = vld [vmem:[#allocation18 + $0x34c] ss:$16 sps:$4 sm:$0xff]  }
 0x1d4   :  { %v5949_v27 = vadd.f32 %v561_v26, %v415_v17  ;;  %v563_v28 = vpop.f32.mrb[6].mxu1  ;;  %v4866_v15 = vld [vmem:[#allocation18 + $0x340] ss:$16 sps:$4 sm:$0xff]   ;;  %v4869_v17 = vld [vmem:[#allocation18 + $0x348] ss:$16 sps:$4 sm:$0xff]  }
 0x1d5   :  { %v564_v31 = vpop.f32.mrb[7].mxu1  ;;  %v4872_v20 = vld [vmem:[#allocation18 + $0x360] ss:$16 sps:$4 sm:$0xff]   ;;  %v4883_v23 = vld [vmem:[#allocation18 + $0x38c] ss:$16 sps:$4 sm:$0xff]  }
 0x1d6   :  { %3235 = vmatpush1.bf16.msra.mxu0 %v4818_v18  ;;  %3481 = vmatpush1.bf16.msra.mxu1 %v4821_v19  ;;  %v4874_v18 = vld [vmem:[#allocation18 + $0x364] ss:$16 sps:$4 sm:$0xff]   ;;  %v4877_v19 = vld [vmem:[#allocation18 + $0x36c] ss:$16 sps:$4 sm:$0xff]   ;;  %v4878_v24 = vld [vmem:[#allocation18 + $0x380] ss:$16 sps:$4 sm:$0xff]  }
 0x1d7   :  { %3236 = vmatprep.subr.bf16.mxu0 %v4826_v21  ;;  %3482 = vmatprep.subr.bf16.mxu1 %v4829_v22  ;;  %v4875_v21 = vld [vmem:[#allocation18 + $0x368] ss:$16 sps:$4 sm:$0xff]   ;;  %v4880_v22 = vld [vmem:[#allocation18 + $0x384] ss:$16 sps:$4 sm:$0xff]   ;;  %v4884_v31 = vld [vmem:[#allocation18 + $0x3a0] ss:$16 sps:$4 sm:$0xff]  }
 0x1d8   :  { %v4881_v26 = vld [vmem:[#allocation18 + $0x388] ss:$16 sps:$4 sm:$0xff]   ;;  %v4886_v28 = vld [vmem:[#allocation18 + $0x3a4] ss:$16 sps:$4 sm:$0xff]  }
 0x1da   :  { %3237 = vmatpush1.bf16.msra.mxu0 %v4824_v29  ;;  %3483 = vmatpush1.bf16.msra.mxu1 %v4827_v30  ;;  %v4889_v29 = vld [vmem:[#allocation18 + $0x3ac] ss:$16 sps:$4 sm:$0xff]   ;;  %v228_v30 = vrot.slane %v5921_v45, %v5935_v11  ;;  %v4898_v45 = vld [vmem:[#allocation18 + $0x3e4] ss:$16 sps:$4 sm:$0xff]  }
 0x1db   :  { %3238 = vmatprep.subr.bf16.mxu0 %v4832_v32  ;;  %3484 = vmatprep.subr.bf16.mxu1 %v4835_v33  ;;  %v4887_v32 = vld [vmem:[#allocation18 + $0x3a8] ss:$16 sps:$4 sm:$0xff]   ;;  %v4892_v33 = vld [vmem:[#allocation18 + $0x3c4] ss:$16 sps:$4 sm:$0xff]  }
 0x1de   :  { %3239 = vmatpush1.bf16.msra.mxu0 %v4830_v34  ;;  %3485 = vmatpush1.bf16.msra.mxu1 %v4833_v35  ;;  %v4895_v34 = vld [vmem:[#allocation18 + $0x3cc] ss:$16 sps:$4 sm:$0xff]   ;;  %v407_v35 = vrot.slane %v5937_v13, %v5923_v46 }
 0x1df   :  { %3240 = vmatprep.subr.bf16.mxu0 %v4838_v36  ;;  %3486 = vmatprep.subr.bf16.mxu1 %v4841_v37  ;;  %v357_v36 = vadd.f32 %v5933_v58, %v228_v30  ;;  %v4890_v37 = vld [vmem:[#allocation18 + $0x3c0] ss:$16 sps:$4 sm:$0xff]   ;;  %v4955_v30 = vld [vmem:[#allocation18 + $0x50c] ss:$16 sps:$4 sm:$0xff]  }
 0x1e0   :  { %v5953_v43 = vpop.f32.mrb[8].mxu0 }
 0x1e1   :  { %v5957_v49 = vpop.f32.mrb[9].mxu0 }
 0x1e2   :  { %3241 = vmatpush1.bf16.msra.mxu0 %v4836_v38  ;;  %3487 = vmatpush1.bf16.msra.mxu1 %v4839_v39  ;;  %v749_v53 = vpop.f32.mrb[10].mxu0  ;;  %v786_v56 = vpop.f32.mrb[8].mxu1  ;;  %v4893_v38 = vld [vmem:[#allocation18 + $0x3c8] ss:$16 sps:$4 sm:$0xff]   ;;  %v4901_v39 = vld [vmem:[#allocation18 + $0x3ec] ss:$16 sps:$4 sm:$0xff]  }
 0x1e3   :  { %3242 = vmatprep.subr.bf16.mxu0 %v4844_v40  ;;  %3488 = vmatprep.subr.bf16.mxu1 %v4847_v41  ;;  %v750_v57 = vpop.f32.mrb[11].mxu0  ;;  %v5961_v59 = vadd.f32 %v786_v56, %v618_v48  ;;  %v788_v60 = vpop.f32.mrb[9].mxu1  ;;  %v521_v40 = vadd.f32 %v5943_v16, %v407_v35  ;;  %v365_v41 = vmax.f32 %v357_v36, 0.0  ;;  %v4896_v48 = vld [vmem:[#allocation18 + $0x3e0] ss:$16 sps:$4 sm:$0xff]  }
 0x1e4   :  { %v5963_v61 = vadd.f32 %v788_v60, %v622_v50  ;;  %v790_v62 = vpop.f32.mrb[10].mxu1  ;;  %v4899_v50 = vld [vmem:[#allocation18 + $0x3e8] ss:$16 sps:$4 sm:$0xff]   ;;  %v4910_v56 = vld [vmem:[#allocation18 + $0x424] ss:$16 sps:$4 sm:$0xff]  }
 0x1e5   :  { %v791_v1 = vpop.f32.mrb[11].mxu1  ;;  %v567_v58 = vmax.f32 %v521_v40, 0.0  ;;  %v4539_v53 = vpack.c.bf16 %v365_v41, %v365_v41  ;;  %v4913_v57 = vld [vmem:[#allocation18 + $0x42c] ss:$16 sps:$4 sm:$0xff]   ;;  %v4908_v60 = vld [vmem:[#allocation18 + $0x420] ss:$16 sps:$4 sm:$0xff]  }
 0x1e6   :  { %3243 = vmatpush1.bf16.msra.mxu0 %v4842_v51  ;;  %3489 = vmatpush1.bf16.msra.mxu1 %v4845_v52  ;;  %v4904_v51 = vld [vmem:[#allocation18 + $0x404] ss:$16 sps:$4 sm:$0xff]   ;;  %v4907_v52 = vld [vmem:[#allocation18 + $0x40c] ss:$16 sps:$4 sm:$0xff]   ;;  %v4911_v62 = vld [vmem:[#allocation18 + $0x428] ss:$16 sps:$4 sm:$0xff]  }
 0x1e7   :  { %3244 = vmatprep.subr.bf16.mxu0 %v4850_v54  ;;  %3490 = vmatprep.subr.bf16.mxu1 %v4853_v55  ;;  %v4902_v54 = vld [vmem:[#allocation18 + $0x400] ss:$16 sps:$4 sm:$0xff]   ;;  %v4905_v55 = vld [vmem:[#allocation18 + $0x408] ss:$16 sps:$4 sm:$0xff]   ;;  %v4542_v16 = vpack.c.bf16 %v567_v58, %v567_v58  ;;  %v4970_v40 = vld [vmem:[#allocation18 + $0x564] ss:$16 sps:$4 sm:$0xff]  }
 0x1e8   :  { %v4914_v1 = vld [vmem:[#allocation18 + $0x440] ss:$16 sps:$4 sm:$0xff]   ;;  %v4959_v36 = vld [vmem:[#allocation18 + $0x528] ss:$16 sps:$4 sm:$0xff]   ;;  %v4973_v41 = vld [vmem:[#allocation18 + $0x56c] ss:$16 sps:$4 sm:$0xff]  }
 0x1e9   :  { %v4956_v35 = vld [vmem:[#allocation18 + $0x520] ss:$16 sps:$4 sm:$0xff]  }
 0x1ea   :  { %3245 = vmatpush1.bf16.msra.mxu0 %v4848_v63  ;;  %3491 = vmatpush1.bf16.msra.mxu1 %v4851_v0  ;;  %v4916_v63 = vld [vmem:[#allocation18 + $0x444] ss:$16 sps:$4 sm:$0xff]   ;;  %v4919_v0 = vld [vmem:[#allocation18 + $0x44c] ss:$16 sps:$4 sm:$0xff]   ;;  %v4974_v58 = vld [vmem:[#allocation18 + $0x580] ss:$16 sps:$4 sm:$0xff]  }
 0x1eb   :  { %3246 = vmatprep.subr.bf16.mxu0 %v4856_v2  ;;  %3492 = vmatprep.subr.bf16.mxu1 %v4859_v3  ;;  %v4917_v2 = vld [vmem:[#allocation18 + $0x448] ss:$16 sps:$4 sm:$0xff]   ;;  %v4922_v3 = vld [vmem:[#allocation18 + $0x464] ss:$16 sps:$4 sm:$0xff]  }
 0x1ee   :  { %3247 = vmatpush1.bf16.msra.mxu0 %v4854_v4  ;;  %3493 = vmatpush1.bf16.msra.mxu1 %v4857_v5  ;;  %v4925_v4 = vld [vmem:[#allocation18 + $0x46c] ss:$16 sps:$4 sm:$0xff]   ;;  %v4920_v5 = vld [vmem:[#allocation18 + $0x460] ss:$16 sps:$4 sm:$0xff]  }
 0x1ef   :  { %3248 = vmatprep.subr.bf16.mxu0 %v4862_v6  ;;  %3494 = vmatprep.subr.bf16.mxu1 %v4865_v7  ;;  %v4923_v6 = vld [vmem:[#allocation18 + $0x468] ss:$16 sps:$4 sm:$0xff]   ;;  %v4928_v7 = vld [vmem:[#allocation18 + $0x484] ss:$16 sps:$4 sm:$0xff]  }
 0x1f2   :  { %3249 = vmatpush1.bf16.msra.mxu0 %v4860_v8  ;;  %3495 = vmatpush1.bf16.msra.mxu1 %v4863_v9  ;;  %v4931_v8 = vld [vmem:[#allocation18 + $0x48c] ss:$16 sps:$4 sm:$0xff]   ;;  %v4926_v9 = vld [vmem:[#allocation18 + $0x480] ss:$16 sps:$4 sm:$0xff]  }
 0x1f3   :  { %3250 = vmatprep.subr.bf16.mxu0 %v4868_v10  ;;  %3496 = vmatprep.subr.bf16.mxu1 %v4871_v12  ;;  %v4929_v10 = vld [vmem:[#allocation18 + $0x488] ss:$16 sps:$4 sm:$0xff]   ;;  %v4934_v12 = vld [vmem:[#allocation18 + $0x4a4] ss:$16 sps:$4 sm:$0xff]  }
 0x1f6   :  { %3251 = vmatpush1.bf16.msra.mxu0 %v4866_v15  ;;  %3497 = vmatpush1.bf16.msra.mxu1 %v4869_v17  ;;  %v4937_v15 = vld [vmem:[#allocation18 + $0x4ac] ss:$16 sps:$4 sm:$0xff]   ;;  %v4932_v17 = vld [vmem:[#allocation18 + $0x4a0] ss:$16 sps:$4 sm:$0xff]  }
 0x1f7   :  { %3252 = vmatprep.subr.bf16.mxu0 %v4874_v18  ;;  %3498 = vmatprep.subr.bf16.mxu1 %v4877_v19  ;;  %v4935_v18 = vld [vmem:[#allocation18 + $0x4a8] ss:$16 sps:$4 sm:$0xff]   ;;  %v4940_v19 = vld [vmem:[#allocation18 + $0x4c4] ss:$16 sps:$4 sm:$0xff]  }
 0x1fa   :  { %3253 = vmatpush1.bf16.msra.mxu0 %v4872_v20  ;;  %3499 = vmatpush1.bf16.msra.mxu1 %v4875_v21  ;;  %v4943_v20 = vld [vmem:[#allocation18 + $0x4cc] ss:$16 sps:$4 sm:$0xff]   ;;  %v4938_v21 = vld [vmem:[#allocation18 + $0x4c0] ss:$16 sps:$4 sm:$0xff]  }
 0x1fb   :  { %3254 = vmatprep.subr.bf16.mxu0 %v4880_v22  ;;  %3500 = vmatprep.subr.bf16.mxu1 %v4883_v23  ;;  %v4941_v22 = vld [vmem:[#allocation18 + $0x4c8] ss:$16 sps:$4 sm:$0xff]   ;;  %v4946_v23 = vld [vmem:[#allocation18 + $0x4e4] ss:$16 sps:$4 sm:$0xff]  }
 0x1fe   :  { %3255 = vmatpush1.bf16.msra.mxu0 %v4878_v24  ;;  %3501 = vmatpush1.bf16.msra.mxu1 %v4881_v26  ;;  %v4949_v24 = vld [vmem:[#allocation18 + $0x4ec] ss:$16 sps:$4 sm:$0xff]   ;;  %v4944_v26 = vld [vmem:[#allocation18 + $0x4e0] ss:$16 sps:$4 sm:$0xff]  }
 0x1ff   :  { %3256 = vmatprep.subr.bf16.mxu0 %v4886_v28  ;;  %3502 = vmatprep.subr.bf16.mxu1 %v4889_v29  ;;  %v4947_v28 = vld [vmem:[#allocation18 + $0x4e8] ss:$16 sps:$4 sm:$0xff]   ;;  %v4952_v29 = vld [vmem:[#allocation18 + $0x504] ss:$16 sps:$4 sm:$0xff]  }
 0x202   :  { %3257 = vmatpush1.bf16.msra.mxu0 %v4884_v31  ;;  %3503 = vmatpush1.bf16.msra.mxu1 %v4887_v32  ;;  %v4950_v31 = vld [vmem:[#allocation18 + $0x500] ss:$16 sps:$4 sm:$0xff]   ;;  %v4953_v32 = vld [vmem:[#allocation18 + $0x508] ss:$16 sps:$4 sm:$0xff]  }
 0x203   :  { %3258 = vmatprep.subr.bf16.mxu0 %v4892_v33  ;;  %3504 = vmatprep.subr.bf16.mxu1 %v4895_v34  ;;  %v4958_v33 = vld [vmem:[#allocation18 + $0x524] ss:$16 sps:$4 sm:$0xff]   ;;  %v4961_v34 = vld [vmem:[#allocation18 + $0x52c] ss:$16 sps:$4 sm:$0xff]  }
 0x206   :  { %3259 = vmatpush1.bf16.msra.mxu0 %v4890_v37  ;;  %3505 = vmatpush1.bf16.msra.mxu1 %v4893_v38  ;;  %v4964_v37 = vld [vmem:[#allocation18 + $0x544] ss:$16 sps:$4 sm:$0xff]   ;;  %v4967_v38 = vld [vmem:[#allocation18 + $0x54c] ss:$16 sps:$4 sm:$0xff]  }
 0x207   :  { %3260 = vmatprep.subr.bf16.mxu0 %v4898_v45  ;;  %3506 = vmatprep.subr.bf16.mxu1 %v4901_v39  ;;  %v4962_v45 = vld [vmem:[#allocation18 + $0x540] ss:$16 sps:$4 sm:$0xff]   ;;  %v4965_v39 = vld [vmem:[#allocation18 + $0x548] ss:$16 sps:$4 sm:$0xff]  }
 0x20a   :  { %3261 = vmatpush1.bf16.msra.mxu0 %v4896_v48  ;;  %3507 = vmatpush1.bf16.msra.mxu1 %v4899_v50  ;;  %v4968_v48 = vld [vmem:[#allocation18 + $0x560] ss:$16 sps:$4 sm:$0xff]   ;;  %v4971_v50 = vld [vmem:[#allocation18 + $0x568] ss:$16 sps:$4 sm:$0xff]  }
 0x20b   :  { %3271 = vmatprep.subr.bf16.mxu0 %v4904_v51  ;;  %3517 = vmatprep.subr.bf16.mxu1 %v4907_v52  ;;  %v4976_v51 = vld [vmem:[#allocation18 + $0x584] ss:$16 sps:$4 sm:$0xff]   ;;  %v4979_v52 = vld [vmem:[#allocation18 + $0x58c] ss:$16 sps:$4 sm:$0xff]  }
 0x20d   :  { %3263 = vmatmul.mubr.bf16.vlgmr.msra.gmra.mrb[12].mxu0 %v4539_v53  ;;  %3509 = vmatmul.mubr.bf16.vlgmr.msra.gmra.mrb[12].mxu1 %v4539_v53  ;;  %v4977_v53 = vld [vmem:[#allocation18 + $0x588] ss:$16 sps:$4 sm:$0xff]  }
 0x20e   :  { %3272 = vmatpush1.bf16.msra.mxu0 %v4902_v54  ;;  %3518 = vmatpush1.bf16.msra.mxu1 %v4905_v55  ;;  %v4982_v54 = vld [vmem:[#allocation18 + $0x5a4] ss:$16 sps:$4 sm:$0xff]   ;;  %v4985_v55 = vld [vmem:[#allocation18 + $0x5ac] ss:$16 sps:$4 sm:$0xff]  }
 0x20f   :  { %3273 = vmatprep.subr.bf16.mxu0 %v4910_v56  ;;  %3519 = vmatprep.subr.bf16.mxu1 %v4913_v57  ;;  %v403_v56 = vrot.slane %v5937_v13, %v5919_v44  ;;  %v4980_v57 = vld [vmem:[#allocation18 + $0x5a0] ss:$16 sps:$4 sm:$0xff]  }
 0x210   :  { %3303 = vmatprep.mubr.bf16.mxu0 %v4542_v16  ;;  %3549 = vmatprep.mubr.bf16.mxu1 %v4542_v16  ;;  %v4983_v16 = vld [vmem:[#allocation18 + $0x5a8] ss:$16 sps:$4 sm:$0xff]   ;;  %v4992_v13 = vld [vmem:[#allocation18 + $0x5e0] ss:$16 sps:$4 sm:$0xff]  }
 0x212   :  { %3274 = vmatpush1.bf16.msra.mxu0 %v4908_v60  ;;  %3520 = vmatpush1.bf16.msra.mxu1 %v4911_v62  ;;  %v4988_v60 = vld [vmem:[#allocation18 + $0x5c4] ss:$16 sps:$4 sm:$0xff]   ;;  %v4991_v62 = vld [vmem:[#allocation18 + $0x5cc] ss:$16 sps:$4 sm:$0xff]  }
 0x213   :  { %3275 = vmatprep.subr.bf16.mxu0 %v4916_v63  ;;  %3521 = vmatprep.subr.bf16.mxu1 %v4919_v0  ;;  %v519_v63 = vadd.f32 %v5939_v14, %v403_v56  ;;  %v4986_v0 = vld [vmem:[#allocation18 + $0x5c0] ss:$16 sps:$4 sm:$0xff]  }
 0x214   :  { %v5052_v56 = vld [vmem:[#allocation18 + $0x720] ss:$16 sps:$4 sm:$0xff]  }
 0x216   :  { %3276 = vmatpush1.bf16.msra.mxu0 %v4914_v1  ;;  %3522 = vmatpush1.bf16.msra.mxu1 %v4917_v2  ;;  %v4989_v1 = vld [vmem:[#allocation18 + $0x5c8] ss:$16 sps:$4 sm:$0xff]   ;;  %v4994_v2 = vld [vmem:[#allocation18 + $0x5e4] ss:$16 sps:$4 sm:$0xff]  }
 0x217   :  { %3277 = vmatprep.subr.bf16.mxu0 %v4922_v3  ;;  %3523 = vmatprep.subr.bf16.mxu1 %v4925_v4  ;;  %v4997_v3 = vld [vmem:[#allocation18 + $0x5ec] ss:$16 sps:$4 sm:$0xff]   ;;  %v566_v4 = vmax.f32 %v519_v63, 0.0  ;;  %v5061_v63 = vld [vmem:[#allocation18 + $0x748] ss:$16 sps:$4 sm:$0xff]  }
 0x219   :  { %v4541_v14 = vpack.c.bf16 %v566_v4, %v566_v4  ;;  %v5072_v4 = vld [vmem:[#allocation18 + $0x784] ss:$16 sps:$4 sm:$0xff]  }
 0x21a   :  { %3278 = vmatpush1.bf16.msra.mxu0 %v4920_v5  ;;  %3524 = vmatpush1.bf16.msra.mxu1 %v4923_v6  ;;  %v4995_v5 = vld [vmem:[#allocation18 + $0x5e8] ss:$16 sps:$4 sm:$0xff]   ;;  %v5000_v6 = vld [vmem:[#allocation18 + $0x604] ss:$16 sps:$4 sm:$0xff]  }
 0x21b   :  { %3279 = vmatprep.subr.bf16.mxu0 %v4928_v7  ;;  %3525 = vmatprep.subr.bf16.mxu1 %v4931_v8  ;;  %v5003_v7 = vld [vmem:[#allocation18 + $0x60c] ss:$16 sps:$4 sm:$0xff]   ;;  %v569_v8 = vmax.f32 %v5949_v27, 0.0 }
 0x21c   :  { %v5015_v27 = vld [vmem:[#allocation18 + $0x64c] ss:$16 sps:$4 sm:$0xff]  }
 0x21e   :  { %3280 = vmatpush1.bf16.msra.mxu0 %v4926_v9  ;;  %3526 = vmatpush1.bf16.msra.mxu1 %v4929_v10  ;;  %v4998_v9 = vld [vmem:[#allocation18 + $0x600] ss:$16 sps:$4 sm:$0xff]   ;;  %v5001_v10 = vld [vmem:[#allocation18 + $0x608] ss:$16 sps:$4 sm:$0xff]  }
 0x21f   :  { %3281 = vmatprep.subr.bf16.mxu0 %v4934_v12  ;;  %3527 = vmatprep.subr.bf16.mxu1 %v4937_v15  ;;  %v5006_v12 = vld [vmem:[#allocation18 + $0x624] ss:$16 sps:$4 sm:$0xff]   ;;  %v5009_v15 = vld [vmem:[#allocation18 + $0x62c] ss:$16 sps:$4 sm:$0xff]  }
 0x222   :  { %3282 = vmatpush1.bf16.msra.mxu0 %v4932_v17  ;;  %3528 = vmatpush1.bf16.msra.mxu1 %v4935_v18  ;;  %v4544_v17 = vpack.c.bf16 %v569_v8, %v569_v8  ;;  %v5004_v18 = vld [vmem:[#allocation18 + $0x620] ss:$16 sps:$4 sm:$0xff]   ;;  %v5081_v8 = vld [vmem:[#allocation18 + $0x7ac] ss:$16 sps:$4 sm:$0xff]  }
 0x223   :  { %3283 = vmatprep.subr.bf16.mxu0 %v4940_v19  ;;  %3529 = vmatprep.subr.bf16.mxu1 %v4943_v20  ;;  %v5007_v19 = vld [vmem:[#allocation18 + $0x628] ss:$16 sps:$4 sm:$0xff]   ;;  %v5012_v20 = vld [vmem:[#allocation18 + $0x644] ss:$16 sps:$4 sm:$0xff]  }
 0x226   :  { %3284 = vmatpush1.bf16.msra.mxu0 %v4938_v21  ;;  %3530 = vmatpush1.bf16.msra.mxu1 %v4941_v22  ;;  %v5010_v21 = vld [vmem:[#allocation18 + $0x640] ss:$16 sps:$4 sm:$0xff]   ;;  %v5013_v22 = vld [vmem:[#allocation18 + $0x648] ss:$16 sps:$4 sm:$0xff]  }
 0x227   :  { %3285 = vmatprep.subr.bf16.mxu0 %v4946_v23  ;;  %3531 = vmatprep.subr.bf16.mxu1 %v4949_v24  ;;  %v5018_v23 = vld [vmem:[#allocation18 + $0x664] ss:$16 sps:$4 sm:$0xff]   ;;  %v5021_v24 = vld [vmem:[#allocation18 + $0x66c] ss:$16 sps:$4 sm:$0xff]  }
 0x22a   :  { %3286 = vmatpush1.bf16.msra.mxu0 %v4944_v26  ;;  %3532 = vmatpush1.bf16.msra.mxu1 %v4947_v28  ;;  %v5016_v26 = vld [vmem:[#allocation18 + $0x660] ss:$16 sps:$4 sm:$0xff]   ;;  %v5019_v28 = vld [vmem:[#allocation18 + $0x668] ss:$16 sps:$4 sm:$0xff]  }
 0x22b   :  { %3287 = vmatprep.subr.bf16.mxu0 %v4952_v29  ;;  %3533 = vmatprep.subr.bf16.mxu1 %v4955_v30  ;;  %v5024_v29 = vld [vmem:[#allocation18 + $0x684] ss:$16 sps:$4 sm:$0xff]   ;;  %v5027_v30 = vld [vmem:[#allocation18 + $0x68c] ss:$16 sps:$4 sm:$0xff]  }
 0x22e   :  { %3288 = vmatpush1.bf16.msra.mxu0 %v4950_v31  ;;  %3534 = vmatpush1.bf16.msra.mxu1 %v4953_v32  ;;  %v5022_v31 = vld [vmem:[#allocation18 + $0x680] ss:$16 sps:$4 sm:$0xff]   ;;  %v5025_v32 = vld [vmem:[#allocation18 + $0x688] ss:$16 sps:$4 sm:$0xff]  }
 0x22f   :  { %3289 = vmatprep.subr.bf16.mxu0 %v4958_v33  ;;  %3535 = vmatprep.subr.bf16.mxu1 %v4961_v34  ;;  %v5030_v33 = vld [vmem:[#allocation18 + $0x6a4] ss:$16 sps:$4 sm:$0xff]   ;;  %v5033_v34 = vld [vmem:[#allocation18 + $0x6ac] ss:$16 sps:$4 sm:$0xff]  }
 0x232   :  { %3290 = vmatpush1.bf16.msra.mxu0 %v4956_v35  ;;  %3536 = vmatpush1.bf16.msra.mxu1 %v4959_v36  ;;  %v5028_v35 = vld [vmem:[#allocation18 + $0x6a0] ss:$16 sps:$4 sm:$0xff]   ;;  %v5031_v36 = vld [vmem:[#allocation18 + $0x6a8] ss:$16 sps:$4 sm:$0xff]  }
 0x233   :  { %3291 = vmatprep.subr.bf16.mxu0 %v4964_v37  ;;  %3537 = vmatprep.subr.bf16.mxu1 %v4967_v38  ;;  %v5036_v37 = vld [vmem:[#allocation18 + $0x6c4] ss:$16 sps:$4 sm:$0xff]   ;;  %v5039_v38 = vld [vmem:[#allocation18 + $0x6cc] ss:$16 sps:$4 sm:$0xff]  }
 0x236   :  { %3292 = vmatpush1.bf16.msra.mxu0 %v4962_v45  ;;  %3538 = vmatpush1.bf16.msra.mxu1 %v4965_v39  ;;  %v5034_v45 = vld [vmem:[#allocation18 + $0x6c0] ss:$16 sps:$4 sm:$0xff]   ;;  %v5037_v39 = vld [vmem:[#allocation18 + $0x6c8] ss:$16 sps:$4 sm:$0xff]  }
 0x237   :  { %3293 = vmatprep.subr.bf16.mxu0 %v4970_v40  ;;  %3539 = vmatprep.subr.bf16.mxu1 %v4973_v41  ;;  %v5042_v40 = vld [vmem:[#allocation18 + $0x6e4] ss:$16 sps:$4 sm:$0xff]   ;;  %v5045_v41 = vld [vmem:[#allocation18 + $0x6ec] ss:$16 sps:$4 sm:$0xff]  }
 0x23a   :  { %3294 = vmatpush1.bf16.msra.mxu0 %v4968_v48  ;;  %3540 = vmatpush1.bf16.msra.mxu1 %v4971_v50  ;;  %v5040_v48 = vld [vmem:[#allocation18 + $0x6e0] ss:$16 sps:$4 sm:$0xff]   ;;  %v5043_v50 = vld [vmem:[#allocation18 + $0x6e8] ss:$16 sps:$4 sm:$0xff]  }
 0x23b   :  { %3295 = vmatprep.subr.bf16.mxu0 %v4976_v51  ;;  %3541 = vmatprep.subr.bf16.mxu1 %v4979_v52  ;;  %v5048_v51 = vld [vmem:[#allocation18 + $0x704] ss:$16 sps:$4 sm:$0xff]   ;;  %v5051_v52 = vld [vmem:[#allocation18 + $0x70c] ss:$16 sps:$4 sm:$0xff]  }
 0x23e   :  { %3296 = vmatpush1.bf16.msra.mxu0 %v4974_v58  ;;  %3542 = vmatpush1.bf16.msra.mxu1 %v4977_v53  ;;  %v5046_v58 = vld [vmem:[#allocation18 + $0x700] ss:$16 sps:$4 sm:$0xff]   ;;  %v5049_v53 = vld [vmem:[#allocation18 + $0x708] ss:$16 sps:$4 sm:$0xff]  }
 0x23f   :  { %3297 = vmatprep.subr.bf16.mxu0 %v4982_v54  ;;  %3543 = vmatprep.subr.bf16.mxu1 %v4985_v55  ;;  %v5054_v54 = vld [vmem:[#allocation18 + $0x724] ss:$16 sps:$4 sm:$0xff]   ;;  %v5057_v55 = vld [vmem:[#allocation18 + $0x72c] ss:$16 sps:$4 sm:$0xff]  }
 0x242   :  { %3298 = vmatpush1.bf16.msra.mxu0 %v4980_v57  ;;  %3544 = vmatpush1.bf16.msra.mxu1 %v4983_v16  ;;  %v5055_v57 = vld [vmem:[#allocation18 + $0x728] ss:$16 sps:$4 sm:$0xff]   ;;  %v5060_v16 = vld [vmem:[#allocation18 + $0x744] ss:$16 sps:$4 sm:$0xff]  }
 0x243   :  { %3299 = vmatprep.subr.bf16.mxu0 %v4988_v60  ;;  %3545 = vmatprep.subr.bf16.mxu1 %v4991_v62  ;;  %v5063_v60 = vld [vmem:[#allocation18 + $0x74c] ss:$16 sps:$4 sm:$0xff]   ;;  %v5058_v62 = vld [vmem:[#allocation18 + $0x740] ss:$16 sps:$4 sm:$0xff]  }
 0x246   :  { %3300 = vmatpush1.bf16.msra.mxu0 %v4986_v0  ;;  %3546 = vmatpush1.bf16.msra.mxu1 %v4989_v1  ;;  %v5066_v0 = vld [vmem:[#allocation18 + $0x764] ss:$16 sps:$4 sm:$0xff]   ;;  %v5069_v1 = vld [vmem:[#allocation18 + $0x76c] ss:$16 sps:$4 sm:$0xff]  }
 0x247   :  { %3301 = vmatprep.subr.bf16.mxu0 %v4994_v2  ;;  %3547 = vmatprep.subr.bf16.mxu1 %v4997_v3  ;;  %v5064_v2 = vld [vmem:[#allocation18 + $0x760] ss:$16 sps:$4 sm:$0xff]   ;;  %v5067_v3 = vld [vmem:[#allocation18 + $0x768] ss:$16 sps:$4 sm:$0xff]  }
 0x24a   :  { %3302 = vmatpush1.bf16.msra.mxu0 %v4992_v13  ;;  %3548 = vmatpush1.bf16.msra.mxu1 %v4995_v5  ;;  %v5075_v13 = vld [vmem:[#allocation18 + $0x78c] ss:$16 sps:$4 sm:$0xff]   ;;  %v5070_v5 = vld [vmem:[#allocation18 + $0x780] ss:$16 sps:$4 sm:$0xff]  }
 0x24b   :  { %3312 = vmatprep.subr.bf16.mxu0 %v5000_v6  ;;  %3558 = vmatprep.subr.bf16.mxu1 %v5003_v7  ;;  %v5073_v6 = vld [vmem:[#allocation18 + $0x788] ss:$16 sps:$4 sm:$0xff]   ;;  %v5078_v7 = vld [vmem:[#allocation18 + $0x7a4] ss:$16 sps:$4 sm:$0xff]  }
 0x24d   :  { %3304 = vmatmul.mubr.bf16.vlgmr.msra.gmra.mrb[12].mxu0 %v4541_v14  ;;  %3550 = vmatmul.mubr.bf16.vlgmr.msra.gmra.mrb[12].mxu1 %v4541_v14  ;;  %v5076_v14 = vld [vmem:[#allocation18 + $0x7a0] ss:$16 sps:$4 sm:$0xff]  }
 0x24e   :  { %3313 = vmatpush1.bf16.msra.mxu0 %v4998_v9  ;;  %3559 = vmatpush1.bf16.msra.mxu1 %v5001_v10  ;;  %v5079_v9 = vld [vmem:[#allocation18 + $0x7a8] ss:$16 sps:$4 sm:$0xff]   ;;  %v5084_v10 = vld [vmem:[#allocation18 + $0x7c4] ss:$16 sps:$4 sm:$0xff]  }
 0x24f   :  { %3314 = vmatprep.subr.bf16.mxu0 %v5006_v12  ;;  %3560 = vmatprep.subr.bf16.mxu1 %v5009_v15  ;;  %v5087_v12 = vld [vmem:[#allocation18 + $0x7cc] ss:$16 sps:$4 sm:$0xff]   ;;  %v614_v15 = vrot.slane %v5951_v42, %v5923_v46 }
 0x250   :  { %3344 = vmatprep.mubr.bf16.mxu0 %v4544_v17  ;;  %3590 = vmatprep.mubr.bf16.mxu1 %v4544_v17  ;;  %v5082_v17 = vld [vmem:[#allocation18 + $0x7c0] ss:$16 sps:$4 sm:$0xff]  }
 0x252   :  { %3315 = vmatpush1.bf16.msra.mxu0 %v5004_v18  ;;  %3561 = vmatpush1.bf16.msra.mxu1 %v5007_v19  ;;  %v5085_v18 = vld [vmem:[#allocation18 + $0x7c8] ss:$16 sps:$4 sm:$0xff]   ;;  %v5090_v19 = vld [vmem:[#allocation18 + $0x7e4] ss:$16 sps:$4 sm:$0xff]  }
 0x253   :  { %3316 = vmatprep.subr.bf16.mxu0 %v5012_v20  ;;  %3562 = vmatprep.subr.bf16.mxu1 %v5015_v27  ;;  %v5093_v20 = vld [vmem:[#allocation18 + $0x7ec] ss:$16 sps:$4 sm:$0xff]   ;;  %v748_v27 = vadd.f32 %v5957_v49, %v614_v15  ;;  %v5102_v49 = vld [vmem:[#allocation18 + $0x824] ss:$16 sps:$4 sm:$0xff]  }
 0x254   :  { %v5162_v15 = vld [vmem:[#allocation18 + $0x964] ss:$16 sps:$4 sm:$0xff]  }
 0x256   :  { %3317 = vmatpush1.bf16.msra.mxu0 %v5010_v21  ;;  %3563 = vmatpush1.bf16.msra.mxu1 %v5013_v22  ;;  %v5088_v21 = vld [vmem:[#allocation18 + $0x7e0] ss:$16 sps:$4 sm:$0xff]   ;;  %v5091_v22 = vld [vmem:[#allocation18 + $0x7e8] ss:$16 sps:$4 sm:$0xff]  }
 0x257   :  { %3318 = vmatprep.subr.bf16.mxu0 %v5018_v23  ;;  %3564 = vmatprep.subr.bf16.mxu1 %v5021_v24  ;;  %v568_v23 = vmax.f32 %v5947_v25, 0.0  ;;  %v5096_v24 = vld [vmem:[#allocation18 + $0x804] ss:$16 sps:$4 sm:$0xff]   ;;  %v5100_v25 = vld [vmem:[#allocation18 + $0x820] ss:$16 sps:$4 sm:$0xff]  }
 0x25a   :  { %3319 = vmatpush1.bf16.msra.mxu0 %v5016_v26  ;;  %3565 = vmatpush1.bf16.msra.mxu1 %v5019_v28  ;;  %v5099_v26 = vld [vmem:[#allocation18 + $0x80c] ss:$16 sps:$4 sm:$0xff]   ;;  %v794_v28 = vmax.f32 %v748_v27, 0.0 }
 0x25b   :  { %3320 = vmatprep.subr.bf16.mxu0 %v5024_v29  ;;  %3566 = vmatprep.subr.bf16.mxu1 %v5027_v30  ;;  %v5094_v29 = vld [vmem:[#allocation18 + $0x800] ss:$16 sps:$4 sm:$0xff]   ;;  %v4543_v30 = vpack.c.bf16 %v568_v23, %v568_v23  ;;  %v5171_v27 = vld [vmem:[#allocation18 + $0x98c] ss:$16 sps:$4 sm:$0xff]   ;;  %v5174_v23 = vld [vmem:[#allocation18 + $0x9a4] ss:$16 sps:$4 sm:$0xff]  }
 0x25e   :  { %3321 = vmatpush1.bf16.msra.mxu0 %v5022_v31  ;;  %3567 = vmatpush1.bf16.msra.mxu1 %v5025_v32  ;;  %v5097_v31 = vld [vmem:[#allocation18 + $0x808] ss:$16 sps:$4 sm:$0xff]   ;;  %v4546_v32 = vpack.c.bf16 %v794_v28, %v794_v28  ;;  %v610_v28 = vrot.slane %v5951_v42, %v5919_v44 }
 0x25f   :  { %3322 = vmatprep.subr.bf16.mxu0 %v5030_v33  ;;  %3568 = vmatprep.subr.bf16.mxu1 %v5033_v34  ;;  %v5105_v33 = vld [vmem:[#allocation18 + $0x82c] ss:$16 sps:$4 sm:$0xff]   ;;  %v5103_v34 = vld [vmem:[#allocation18 + $0x828] ss:$16 sps:$4 sm:$0xff]  }
 0x260   :  { %v5187_v42 = vld [vmem:[#allocation18 + $0x9e8] ss:$16 sps:$4 sm:$0xff]  }
 0x262   :  { %3323 = vmatpush1.bf16.msra.mxu0 %v5028_v35  ;;  %3569 = vmatpush1.bf16.msra.mxu1 %v5031_v36  ;;  %v5108_v35 = vld [vmem:[#allocation18 + $0x844] ss:$16 sps:$4 sm:$0xff]   ;;  %v5111_v36 = vld [vmem:[#allocation18 + $0x84c] ss:$16 sps:$4 sm:$0xff]  }
 0x263   :  { %3324 = vmatprep.subr.bf16.mxu0 %v5036_v37  ;;  %3570 = vmatprep.subr.bf16.mxu1 %v5039_v38  ;;  %v5106_v37 = vld [vmem:[#allocation18 + $0x840] ss:$16 sps:$4 sm:$0xff]   ;;  %v5109_v38 = vld [vmem:[#allocation18 + $0x848] ss:$16 sps:$4 sm:$0xff]  }
 0x266   :  { %3325 = vmatpush1.bf16.msra.mxu0 %v5034_v45  ;;  %3571 = vmatpush1.bf16.msra.mxu1 %v5037_v39  ;;  %v5114_v45 = vld [vmem:[#allocation18 + $0x864] ss:$16 sps:$4 sm:$0xff]   ;;  %v5117_v39 = vld [vmem:[#allocation18 + $0x86c] ss:$16 sps:$4 sm:$0xff]  }
 0x267   :  { %3326 = vmatprep.subr.bf16.mxu0 %v5042_v40  ;;  %3572 = vmatprep.subr.bf16.mxu1 %v5045_v41  ;;  %v5112_v40 = vld [vmem:[#allocation18 + $0x860] ss:$16 sps:$4 sm:$0xff]   ;;  %v5115_v41 = vld [vmem:[#allocation18 + $0x868] ss:$16 sps:$4 sm:$0xff]  }
 0x26a   :  { %3327 = vmatpush1.bf16.msra.mxu0 %v5040_v48  ;;  %3573 = vmatpush1.bf16.msra.mxu1 %v5043_v50  ;;  %v5120_v48 = vld [vmem:[#allocation18 + $0x884] ss:$16 sps:$4 sm:$0xff]   ;;  %v5123_v50 = vld [vmem:[#allocation18 + $0x88c] ss:$16 sps:$4 sm:$0xff]  }
 0x26b   :  { %3328 = vmatprep.subr.bf16.mxu0 %v5048_v51  ;;  %3574 = vmatprep.subr.bf16.mxu1 %v5051_v52  ;;  %v5118_v51 = vld [vmem:[#allocation18 + $0x880] ss:$16 sps:$4 sm:$0xff]   ;;  %v5121_v52 = vld [vmem:[#allocation18 + $0x888] ss:$16 sps:$4 sm:$0xff]  }
 0x26e   :  { %3329 = vmatpush1.bf16.msra.mxu0 %v5046_v58  ;;  %3575 = vmatpush1.bf16.msra.mxu1 %v5049_v53  ;;  %v5126_v58 = vld [vmem:[#allocation18 + $0x8a4] ss:$16 sps:$4 sm:$0xff]   ;;  %v5129_v53 = vld [vmem:[#allocation18 + $0x8ac] ss:$16 sps:$4 sm:$0xff]  }
 0x26f   :  { %3330 = vmatprep.subr.bf16.mxu0 %v5054_v54  ;;  %3576 = vmatprep.subr.bf16.mxu1 %v5057_v55  ;;  %v5124_v54 = vld [vmem:[#allocation18 + $0x8a0] ss:$16 sps:$4 sm:$0xff]   ;;  %v5127_v55 = vld [vmem:[#allocation18 + $0x8a8] ss:$16 sps:$4 sm:$0xff]  }
 0x272   :  { %3331 = vmatpush1.bf16.msra.mxu0 %v5052_v56  ;;  %3577 = vmatpush1.bf16.msra.mxu1 %v5055_v57  ;;  %v5132_v56 = vld [vmem:[#allocation18 + $0x8c4] ss:$16 sps:$4 sm:$0xff]   ;;  %v5135_v57 = vld [vmem:[#allocation18 + $0x8cc] ss:$16 sps:$4 sm:$0xff]  }
 0x273   :  { %3332 = vmatprep.subr.bf16.mxu0 %v5060_v16  ;;  %3578 = vmatprep.subr.bf16.mxu1 %v5063_v60  ;;  %v5130_v16 = vld [vmem:[#allocation18 + $0x8c0] ss:$16 sps:$4 sm:$0xff]   ;;  %v5133_v60 = vld [vmem:[#allocation18 + $0x8c8] ss:$16 sps:$4 sm:$0xff]  }
 0x276   :  { %3333 = vmatpush1.bf16.msra.mxu0 %v5058_v62  ;;  %3579 = vmatpush1.bf16.msra.mxu1 %v5061_v63  ;;  %v5138_v62 = vld [vmem:[#allocation18 + $0x8e4] ss:$16 sps:$4 sm:$0xff]   ;;  %v5141_v63 = vld [vmem:[#allocation18 + $0x8ec] ss:$16 sps:$4 sm:$0xff]  }
 0x277   :  { %3334 = vmatprep.subr.bf16.mxu0 %v5066_v0  ;;  %3580 = vmatprep.subr.bf16.mxu1 %v5069_v1  ;;  %v5136_v0 = vld [vmem:[#allocation18 + $0x8e0] ss:$16 sps:$4 sm:$0xff]   ;;  %v5139_v1 = vld [vmem:[#allocation18 + $0x8e8] ss:$16 sps:$4 sm:$0xff]  }
 0x27a   :  { %3335 = vmatpush1.bf16.msra.mxu0 %v5064_v2  ;;  %3581 = vmatpush1.bf16.msra.mxu1 %v5067_v3  ;;  %v5144_v2 = vld [vmem:[#allocation18 + $0x904] ss:$16 sps:$4 sm:$0xff]   ;;  %v5147_v3 = vld [vmem:[#allocation18 + $0x90c] ss:$16 sps:$4 sm:$0xff]  }
 0x27b   :  { %3336 = vmatprep.subr.bf16.mxu0 %v5072_v4  ;;  %3582 = vmatprep.subr.bf16.mxu1 %v5075_v13  ;;  %v5142_v4 = vld [vmem:[#allocation18 + $0x900] ss:$16 sps:$4 sm:$0xff]   ;;  %v5145_v13 = vld [vmem:[#allocation18 + $0x908] ss:$16 sps:$4 sm:$0xff]  }
 0x27e   :  { %3337 = vmatpush1.bf16.msra.mxu0 %v5070_v5  ;;  %3583 = vmatpush1.bf16.msra.mxu1 %v5073_v6  ;;  %v5150_v5 = vld [vmem:[#allocation18 + $0x924] ss:$16 sps:$4 sm:$0xff]   ;;  %v5153_v6 = vld [vmem:[#allocation18 + $0x92c] ss:$16 sps:$4 sm:$0xff]  }
 0x27f   :  { %3338 = vmatprep.subr.bf16.mxu0 %v5078_v7  ;;  %3584 = vmatprep.subr.bf16.mxu1 %v5081_v8  ;;  %v5148_v7 = vld [vmem:[#allocation18 + $0x920] ss:$16 sps:$4 sm:$0xff]   ;;  %v5151_v8 = vld [vmem:[#allocation18 + $0x928] ss:$16 sps:$4 sm:$0xff]  }
 0x282   :  { %3339 = vmatpush1.bf16.msra.mxu0 %v5076_v14  ;;  %3585 = vmatpush1.bf16.msra.mxu1 %v5079_v9  ;;  %v5156_v14 = vld [vmem:[#allocation18 + $0x944] ss:$16 sps:$4 sm:$0xff]   ;;  %v5159_v9 = vld [vmem:[#allocation18 + $0x94c] ss:$16 sps:$4 sm:$0xff]  }
 0x283   :  { %3340 = vmatprep.subr.bf16.mxu0 %v5084_v10  ;;  %3586 = vmatprep.subr.bf16.mxu1 %v5087_v12  ;;  %v5154_v10 = vld [vmem:[#allocation18 + $0x940] ss:$16 sps:$4 sm:$0xff]   ;;  %v5157_v12 = vld [vmem:[#allocation18 + $0x948] ss:$16 sps:$4 sm:$0xff]  }
 0x286   :  { %3341 = vmatpush1.bf16.msra.mxu0 %v5082_v17  ;;  %3587 = vmatpush1.bf16.msra.mxu1 %v5085_v18  ;;  %v5165_v17 = vld [vmem:[#allocation18 + $0x96c] ss:$16 sps:$4 sm:$0xff]   ;;  %v5160_v18 = vld [vmem:[#allocation18 + $0x960] ss:$16 sps:$4 sm:$0xff]  }
 0x287   :  { %3342 = vmatprep.subr.bf16.mxu0 %v5090_v19  ;;  %3588 = vmatprep.subr.bf16.mxu1 %v5093_v20  ;;  %v5163_v19 = vld [vmem:[#allocation18 + $0x968] ss:$16 sps:$4 sm:$0xff]   ;;  %v5168_v20 = vld [vmem:[#allocation18 + $0x984] ss:$16 sps:$4 sm:$0xff]  }
 0x28a   :  { %3343 = vmatpush1.bf16.msra.mxu0 %v5088_v21  ;;  %3589 = vmatpush1.bf16.msra.mxu1 %v5091_v22  ;;  %v5166_v21 = vld [vmem:[#allocation18 + $0x980] ss:$16 sps:$4 sm:$0xff]   ;;  %v5169_v22 = vld [vmem:[#allocation18 + $0x988] ss:$16 sps:$4 sm:$0xff]  }
 0x28b   :  { %3353 = vmatprep.subr.bf16.mxu0 %v5096_v24  ;;  %3599 = vmatprep.subr.bf16.mxu1 %v5099_v26  ;;  %v5177_v24 = vld [vmem:[#allocation18 + $0x9ac] ss:$16 sps:$4 sm:$0xff]   ;;  %v5172_v26 = vld [vmem:[#allocation18 + $0x9a0] ss:$16 sps:$4 sm:$0xff]  }
 0x28d   :  { %3345 = vmatmul.mubr.bf16.vlgmr.msra.gmra.mrb[12].mxu0 %v4543_v30  ;;  %3591 = vmatmul.mubr.bf16.vlgmr.msra.gmra.mrb[12].mxu1 %v4543_v30  ;;  %v5180_v30 = vld [vmem:[#allocation18 + $0x9c4] ss:$16 sps:$4 sm:$0xff]  }
 0x28e   :  { %3354 = vmatpush1.bf16.msra.mxu0 %v5094_v29  ;;  %3385 = vmatprep.mubr.bf16.mxu0 %v4546_v32  ;;  %v5175_v29 = vld [vmem:[#allocation18 + $0x9a8] ss:$16 sps:$4 sm:$0xff]  }
 0x28f   :  { %3600 = vmatpush1.bf16.msra.mxu1 %v5097_v31  ;;  %3631 = vmatprep.mubr.bf16.mxu1 %v4546_v32  ;;  %v5183_v31 = vld [vmem:[#allocation18 + $0x9cc] ss:$16 sps:$4 sm:$0xff]   ;;  %v5178_v32 = vld [vmem:[#allocation18 + $0x9c0] ss:$16 sps:$4 sm:$0xff]  }
 0x290   :  { %3355 = vmatprep.subr.bf16.mxu0 %v5102_v49  ;;  %3601 = vmatprep.subr.bf16.mxu1 %v5105_v33  ;;  %v746_v49 = vadd.f32 %v5953_v43, %v610_v28  ;;  %v5181_v33 = vld [vmem:[#allocation18 + $0x9c8] ss:$16 sps:$4 sm:$0xff]   ;;  %v5258_v28 = vld [vmem:[#allocation18 + $0xb64] ss:$16 sps:$4 sm:$0xff]  }
 0x292   :  { %3356 = vmatpush1.bf16.msra.mxu0 %v5100_v25  ;;  %v5186_v25 = vld [vmem:[#allocation18 + $0x9e4] ss:$16 sps:$4 sm:$0xff]  }
 0x293   :  { %3602 = vmatpush1.bf16.msra.mxu1 %v5103_v34  ;;  %3357 = vmatprep.subr.bf16.mxu0 %v5108_v35  ;;  %v5189_v34 = vld [vmem:[#allocation18 + $0x9ec] ss:$16 sps:$4 sm:$0xff]   ;;  %v5184_v35 = vld [vmem:[#allocation18 + $0x9e0] ss:$16 sps:$4 sm:$0xff]  }
 0x294   :  { %3603 = vmatprep.subr.bf16.mxu1 %v5111_v36  ;;  %v793_v36 = vmax.f32 %v746_v49, 0.0  ;;  %v5267_v49 = vld [vmem:[#allocation18 + $0xb8c] ss:$16 sps:$4 sm:$0xff]  }
 0x296   :  { %3358 = vmatpush1.bf16.msra.mxu0 %v5106_v37  ;;  %v5192_v37 = vld [vmem:[#allocation18 + $0xa04] ss:$16 sps:$4 sm:$0xff]   ;;  %v4545_v43 = vpack.c.bf16 %v793_v36, %v793_v36  ;;  %v5268_v36 = vld [vmem:[#allocation18 + $0xba0] ss:$16 sps:$4 sm:$0xff]  }
 0x297   :  { %3604 = vmatpush1.bf16.msra.mxu1 %v5109_v38  ;;  %3359 = vmatprep.subr.bf16.mxu0 %v5114_v45  ;;  %v5195_v38 = vld [vmem:[#allocation18 + $0xa0c] ss:$16 sps:$4 sm:$0xff]   ;;  %v796_v45 = vmax.f32 %v5963_v61, 0.0 }
 0x298   :  { %3605 = vmatprep.subr.bf16.mxu1 %v5117_v39  ;;  %v5190_v39 = vld [vmem:[#allocation18 + $0xa00] ss:$16 sps:$4 sm:$0xff]   ;;  %v5207_v61 = vld [vmem:[#allocation18 + $0xa4c] ss:$16 sps:$4 sm:$0xff]  }
 0x29a   :  { %3360 = vmatpush1.bf16.msra.mxu0 %v5112_v40  ;;  %v5193_v40 = vld [vmem:[#allocation18 + $0xa08] ss:$16 sps:$4 sm:$0xff]  }
 0x29b   :  { %3606 = vmatpush1.bf16.msra.mxu1 %v5115_v41  ;;  %3361 = vmatprep.subr.bf16.mxu0 %v5120_v48  ;;  %v5198_v41 = vld [vmem:[#allocation18 + $0xa24] ss:$16 sps:$4 sm:$0xff]   ;;  %v4548_v48 = vpack.c.bf16 %v796_v45, %v796_v45  ;;  %v5274_v45 = vld [vmem:[#allocation18 + $0xbc0] ss:$16 sps:$4 sm:$0xff]  }
 0x29c   :  { %3607 = vmatprep.subr.bf16.mxu1 %v5123_v50  ;;  %v5201_v50 = vld [vmem:[#allocation18 + $0xa2c] ss:$16 sps:$4 sm:$0xff]  }
 0x29e   :  { %3362 = vmatpush1.bf16.msra.mxu0 %v5118_v51  ;;  %v5196_v51 = vld [vmem:[#allocation18 + $0xa20] ss:$16 sps:$4 sm:$0xff]  }
 0x29f   :  { %3608 = vmatpush1.bf16.msra.mxu1 %v5121_v52  ;;  %3363 = vmatprep.subr.bf16.mxu0 %v5126_v58  ;;  %v5199_v52 = vld [vmem:[#allocation18 + $0xa28] ss:$16 sps:$4 sm:$0xff]   ;;  %v5204_v58 = vld [vmem:[#allocation18 + $0xa44] ss:$16 sps:$4 sm:$0xff]  }
 0x2a0   :  { %3609 = vmatprep.subr.bf16.mxu1 %v5129_v53  ;;  %v5202_v53 = vld [vmem:[#allocation18 + $0xa40] ss:$16 sps:$4 sm:$0xff]  }
 0x2a2   :  { %3364 = vmatpush1.bf16.msra.mxu0 %v5124_v54  ;;  %v5205_v54 = vld [vmem:[#allocation18 + $0xa48] ss:$16 sps:$4 sm:$0xff]  }
 0x2a3   :  { %3610 = vmatpush1.bf16.msra.mxu1 %v5127_v55  ;;  %3365 = vmatprep.subr.bf16.mxu0 %v5132_v56  ;;  %v5210_v55 = vld [vmem:[#allocation18 + $0xa64] ss:$16 sps:$4 sm:$0xff]   ;;  %v5213_v56 = vld [vmem:[#allocation18 + $0xa6c] ss:$16 sps:$4 sm:$0xff]  }
 0x2a4   :  { %3611 = vmatprep.subr.bf16.mxu1 %v5135_v57  ;;  %v5208_v57 = vld [vmem:[#allocation18 + $0xa60] ss:$16 sps:$4 sm:$0xff]  }
 0x2a6   :  { %3366 = vmatpush1.bf16.msra.mxu0 %v5130_v16  ;;  %v5211_v16 = vld [vmem:[#allocation18 + $0xa68] ss:$16 sps:$4 sm:$0xff]  }
 0x2a7   :  { %3612 = vmatpush1.bf16.msra.mxu1 %v5133_v60  ;;  %3367 = vmatprep.subr.bf16.mxu0 %v5138_v62  ;;  %v5216_v60 = vld [vmem:[#allocation18 + $0xa84] ss:$16 sps:$4 sm:$0xff]   ;;  %v5219_v62 = vld [vmem:[#allocation18 + $0xa8c] ss:$16 sps:$4 sm:$0xff]  }
 0x2a8   :  { %3613 = vmatprep.subr.bf16.mxu1 %v5141_v63  ;;  %v5214_v63 = vld [vmem:[#allocation18 + $0xa80] ss:$16 sps:$4 sm:$0xff]  }
 0x2aa   :  { %3368 = vmatpush1.bf16.msra.mxu0 %v5136_v0  ;;  %v5217_v0 = vld [vmem:[#allocation18 + $0xa88] ss:$16 sps:$4 sm:$0xff]  }
 0x2ab   :  { %3614 = vmatpush1.bf16.msra.mxu1 %v5139_v1  ;;  %3369 = vmatprep.subr.bf16.mxu0 %v5144_v2  ;;  %v5222_v1 = vld [vmem:[#allocation18 + $0xaa4] ss:$16 sps:$4 sm:$0xff]   ;;  %v5225_v2 = vld [vmem:[#allocation18 + $0xaac] ss:$16 sps:$4 sm:$0xff]  }
 0x2ac   :  { %3615 = vmatprep.subr.bf16.mxu1 %v5147_v3  ;;  %v5220_v3 = vld [vmem:[#allocation18 + $0xaa0] ss:$16 sps:$4 sm:$0xff]  }
 0x2ae   :  { %3370 = vmatpush1.bf16.msra.mxu0 %v5142_v4  ;;  %v5223_v4 = vld [vmem:[#allocation18 + $0xaa8] ss:$16 sps:$4 sm:$0xff]  }
 0x2af   :  { %3616 = vmatpush1.bf16.msra.mxu1 %v5145_v13  ;;  %3371 = vmatprep.subr.bf16.mxu0 %v5150_v5  ;;  %v5228_v13 = vld [vmem:[#allocation18 + $0xac4] ss:$16 sps:$4 sm:$0xff]   ;;  %v5231_v5 = vld [vmem:[#allocation18 + $0xacc] ss:$16 sps:$4 sm:$0xff]  }
 0x2b0   :  { %3617 = vmatprep.subr.bf16.mxu1 %v5153_v6  ;;  %v5226_v6 = vld [vmem:[#allocation18 + $0xac0] ss:$16 sps:$4 sm:$0xff]  }
 0x2b2   :  { %3372 = vmatpush1.bf16.msra.mxu0 %v5148_v7  ;;  %v5229_v7 = vld [vmem:[#allocation18 + $0xac8] ss:$16 sps:$4 sm:$0xff]  }
 0x2b3   :  { %3618 = vmatpush1.bf16.msra.mxu1 %v5151_v8  ;;  %3373 = vmatprep.subr.bf16.mxu0 %v5156_v14  ;;  %v5234_v8 = vld [vmem:[#allocation18 + $0xae4] ss:$16 sps:$4 sm:$0xff]   ;;  %v5237_v14 = vld [vmem:[#allocation18 + $0xaec] ss:$16 sps:$4 sm:$0xff]  }
 0x2b4   :  { %3619 = vmatprep.subr.bf16.mxu1 %v5159_v9  ;;  %v5232_v9 = vld [vmem:[#allocation18 + $0xae0] ss:$16 sps:$4 sm:$0xff]  }
 0x2b6   :  { %3374 = vmatpush1.bf16.msra.mxu0 %v5154_v10  ;;  %v5235_v10 = vld [vmem:[#allocation18 + $0xae8] ss:$16 sps:$4 sm:$0xff]  }
 0x2b7   :  { %3620 = vmatpush1.bf16.msra.mxu1 %v5157_v12  ;;  %3375 = vmatprep.subr.bf16.mxu0 %v5162_v15  ;;  %v5240_v12 = vld [vmem:[#allocation18 + $0xb04] ss:$16 sps:$4 sm:$0xff]   ;;  %v5243_v15 = vld [vmem:[#allocation18 + $0xb0c] ss:$16 sps:$4 sm:$0xff]  }
 0x2b8   :  { %3621 = vmatprep.subr.bf16.mxu1 %v5165_v17  ;;  %v5238_v17 = vld [vmem:[#allocation18 + $0xb00] ss:$16 sps:$4 sm:$0xff]  }
 0x2ba   :  { %3376 = vmatpush1.bf16.msra.mxu0 %v5160_v18  ;;  %v5241_v18 = vld [vmem:[#allocation18 + $0xb08] ss:$16 sps:$4 sm:$0xff]  }
 0x2bb   :  { %3622 = vmatpush1.bf16.msra.mxu1 %v5163_v19  ;;  %3377 = vmatprep.subr.bf16.mxu0 %v5168_v20  ;;  %v5246_v19 = vld [vmem:[#allocation18 + $0xb24] ss:$16 sps:$4 sm:$0xff]   ;;  %v5249_v20 = vld [vmem:[#allocation18 + $0xb2c] ss:$16 sps:$4 sm:$0xff]  }
 0x2bc   :  { %3623 = vmatprep.subr.bf16.mxu1 %v5171_v27  ;;  %v5244_v27 = vld [vmem:[#allocation18 + $0xb20] ss:$16 sps:$4 sm:$0xff]  }
 0x2be   :  { %3378 = vmatpush1.bf16.msra.mxu0 %v5166_v21  ;;  %v5247_v21 = vld [vmem:[#allocation18 + $0xb28] ss:$16 sps:$4 sm:$0xff]  }
 0x2bf   :  { %3624 = vmatpush1.bf16.msra.mxu1 %v5169_v22  ;;  %3379 = vmatprep.subr.bf16.mxu0 %v5174_v23  ;;  %v5252_v22 = vld [vmem:[#allocation18 + $0xb44] ss:$16 sps:$4 sm:$0xff]   ;;  %v5255_v23 = vld [vmem:[#allocation18 + $0xb4c] ss:$16 sps:$4 sm:$0xff]  }
 0x2c0   :  { %3625 = vmatprep.subr.bf16.mxu1 %v5177_v24  ;;  %v5250_v24 = vld [vmem:[#allocation18 + $0xb40] ss:$16 sps:$4 sm:$0xff]  }
 0x2c2   :  { %3380 = vmatpush1.bf16.msra.mxu0 %v5172_v26  ;;  %v5253_v26 = vld [vmem:[#allocation18 + $0xb48] ss:$16 sps:$4 sm:$0xff]  }
 0x2c3   :  { %3626 = vmatpush1.bf16.msra.mxu1 %v5175_v29  ;;  %3381 = vmatprep.subr.bf16.mxu0 %v5180_v30  ;;  %v5261_v29 = vld [vmem:[#allocation18 + $0xb6c] ss:$16 sps:$4 sm:$0xff]   ;;  %v5256_v30 = vld [vmem:[#allocation18 + $0xb60] ss:$16 sps:$4 sm:$0xff]  }
 0x2c4   :  { %3627 = vmatprep.subr.bf16.mxu1 %v5183_v31  ;;  %v5259_v31 = vld [vmem:[#allocation18 + $0xb68] ss:$16 sps:$4 sm:$0xff]  }
 0x2c6   :  { %3382 = vmatpush1.bf16.msra.mxu0 %v5178_v32  ;;  %v5264_v32 = vld [vmem:[#allocation18 + $0xb84] ss:$16 sps:$4 sm:$0xff]  }
 0x2c7   :  { %3628 = vmatpush1.bf16.msra.mxu1 %v5181_v33  ;;  %3383 = vmatprep.subr.bf16.mxu0 %v5186_v25  ;;  %v5262_v33 = vld [vmem:[#allocation18 + $0xb80] ss:$16 sps:$4 sm:$0xff]   ;;  %v5265_v25 = vld [vmem:[#allocation18 + $0xb88] ss:$16 sps:$4 sm:$0xff]  }
 0x2c8   :  { %3629 = vmatprep.subr.bf16.mxu1 %v5189_v34  ;;  %v5270_v34 = vld [vmem:[#allocation18 + $0xba4] ss:$16 sps:$4 sm:$0xff]  }
 0x2ca   :  { %3384 = vmatpush1.bf16.msra.mxu0 %v5184_v35  ;;  %v5273_v35 = vld [vmem:[#allocation18 + $0xbac] ss:$16 sps:$4 sm:$0xff]  }
 0x2cb   :  { %3630 = vmatpush1.bf16.msra.mxu1 %v5187_v42  ;;  %3394 = vmatprep.subr.bf16.mxu0 %v5192_v37  ;;  %v5271_v42 = vld [vmem:[#allocation18 + $0xba8] ss:$16 sps:$4 sm:$0xff]   ;;  %v5276_v37 = vld [vmem:[#allocation18 + $0xbc4] ss:$16 sps:$4 sm:$0xff]  }
 0x2cc   :  { %3640 = vmatprep.subr.bf16.mxu1 %v5195_v38  ;;  %v5279_v38 = vld [vmem:[#allocation18 + $0xbcc] ss:$16 sps:$4 sm:$0xff]  }
 0x2cd   :  { %3386 = vmatmul.mubr.bf16.vlgmr.msra.gmra.mrb[12].mxu0 %v4545_v43 }
 0x2ce   :  { %3632 = vmatmul.mubr.bf16.vlgmr.msra.gmra.mrb[12].mxu1 %v4545_v43  ;;  %3395 = vmatpush1.bf16.msra.mxu0 %v5190_v39  ;;  %v5277_v39 = vld [vmem:[#allocation18 + $0xbc8] ss:$16 sps:$4 sm:$0xff]   ;;  %v5282_v43 = vld [vmem:[#allocation18 + $0xbe4] ss:$16 sps:$4 sm:$0xff]  }
 0x2cf   :  { %3426 = vmatprep.mubr.bf16.mxu0 %v4548_v48  ;;  %3641 = vmatpush1.bf16.msra.mxu1 %v5193_v40  ;;  %v5285_v40 = vld [vmem:[#allocation18 + $0xbec] ss:$16 sps:$4 sm:$0xff]  }
 0x2d0   :  { %3672 = vmatprep.mubr.bf16.mxu1 %v4548_v48  ;;  %3396 = vmatprep.subr.bf16.mxu0 %v5198_v41  ;;  %v5280_v41 = vld [vmem:[#allocation18 + $0xbe0] ss:$16 sps:$4 sm:$0xff]   ;;  %v795_v48 = vmax.f32 %v5961_v59, 0.0 }
 0x2d1   :  { %3642 = vmatprep.subr.bf16.mxu1 %v5201_v50  ;;  %v5283_v50 = vld [vmem:[#allocation18 + $0xbe8] ss:$16 sps:$4 sm:$0xff]   ;;  %v5293_v59 = vld [vmem:[#allocation21 + $0x88] sm:$0xff]  }
 0x2d2   :  { %3397 = vmatpush1.bf16.msra.mxu0 %v5196_v51  ;;  %v5286_v51 = vld [vmem:[#allocation21 + $0x40] sm:$0xff]  }
 0x2d3   :  { %3643 = vmatpush1.bf16.msra.mxu1 %v5199_v52  ;;  %3398 = vmatprep.subr.bf16.mxu0 %v5204_v58  ;;  %v5287_v52 = vld [vmem:[#allocation21 + $0xc0] sm:$0xff]  }
 0x2d4   :  { %3644 = vmatprep.subr.bf16.mxu1 %v5207_v61  ;;  %v5288_v58 = vld [vmem:[#allocation21] sm:$0xff]   ;;  %v4547_v61 = vpack.c.bf16 %v795_v48, %v795_v48 }
 0x2d6   :  { %3399 = vmatpush1.bf16.msra.mxu0 %v5202_v53  ;;  %v5289_v53 = vld [vmem:[#allocation21 + $0x80] sm:$0xff]  }
 0x2d7   :  { %3645 = vmatpush1.bf16.msra.mxu1 %v5205_v54  ;;  %3400 = vmatprep.subr.bf16.mxu0 %v5210_v55  ;;  %v5290_v54 = vld [vmem:[#allocation21 + $0x48] sm:$0xff]  }
 0x2d8   :  { %3646 = vmatprep.subr.bf16.mxu1 %v5213_v56  ;;  %v5291_v55 = vld [vmem:[#allocation21 + $0xc8] sm:$0xff]  }
 0x2d9   :  { %v5292_v56 = vld [vmem:[#allocation21 + $0x8] sm:$0xff]  }
 0x2da   :  { %3401 = vmatpush1.bf16.msra.mxu0 %v5208_v57  ;;  %v5294_v57 = vld [vmem:[#allocation21 + $0x50] sm:$0xff]  }
 0x2db   :  { %3647 = vmatpush1.bf16.msra.mxu1 %v5211_v16  ;;  %3402 = vmatprep.subr.bf16.mxu0 %v5216_v60  ;;  %v5295_v16 = vld [vmem:[#allocation21 + $0xd0] sm:$0xff]  }
 0x2dc   :  { %3648 = vmatprep.subr.bf16.mxu1 %v5219_v62  ;;  %v5296_v60 = vld [vmem:[#allocation21 + $0x10] sm:$0xff]  }
 0x2dd   :  { %v5297_v62 = vld [vmem:[#allocation21 + $0x90] sm:$0xff]  }
 0x2de   :  { %3403 = vmatpush1.bf16.msra.mxu0 %v5214_v63  ;;  %v5298_v63 = vld [vmem:[#allocation21 + $0x58] sm:$0xff]  }
 0x2df   :  { %3649 = vmatpush1.bf16.msra.mxu1 %v5217_v0  ;;  %3404 = vmatprep.subr.bf16.mxu0 %v5222_v1  ;;  %v5299_v0 = vld [vmem:[#allocation21 + $0xd8] sm:$0xff]  }
 0x2e0   :  { %3650 = vmatprep.subr.bf16.mxu1 %v5225_v2  ;;  %v5300_v1 = vld [vmem:[#allocation21 + $0x18] sm:$0xff]  }
 0x2e1   :  { %v5301_v2 = vld [vmem:[#allocation21 + $0x98] sm:$0xff]  }
 0x2e2   :  { %3405 = vmatpush1.bf16.msra.mxu0 %v5220_v3  ;;  %v5302_v3 = vld [vmem:[#allocation21 + $0x60] sm:$0xff]  }
 0x2e3   :  { %3651 = vmatpush1.bf16.msra.mxu1 %v5223_v4  ;;  %3406 = vmatprep.subr.bf16.mxu0 %v5228_v13  ;;  %v5303_v4 = vld [vmem:[#allocation21 + $0xe0] sm:$0xff]  }
 0x2e4   :  { %3652 = vmatprep.subr.bf16.mxu1 %v5231_v5  ;;  %v5304_v13 = vld [vmem:[#allocation21 + $0x20] sm:$0xff]  }
 0x2e5   :  { %v5305_v5 = vld [vmem:[#allocation21 + $0xa0] sm:$0xff]  }
 0x2e6   :  { %3407 = vmatpush1.bf16.msra.mxu0 %v5226_v6  ;;  %v5306_v6 = vld [vmem:[#allocation21 + $0x68] sm:$0xff]  }
 0x2e7   :  { %3653 = vmatpush1.bf16.msra.mxu1 %v5229_v7  ;;  %3408 = vmatprep.subr.bf16.mxu0 %v5234_v8  ;;  %v5307_v7 = vld [vmem:[#allocation21 + $0xe8] sm:$0xff]  }
 0x2e8   :  { %3654 = vmatprep.subr.bf16.mxu1 %v5237_v14  ;;  %v5308_v8 = vld [vmem:[#allocation21 + $0x28] sm:$0xff]  }
 0x2e9   :  { %v5309_v14 = vld [vmem:[#allocation21 + $0xa8] sm:$0xff]  }
 0x2ea   :  { %3409 = vmatpush1.bf16.msra.mxu0 %v5232_v9  ;;  %v5310_v9 = vld [vmem:[#allocation21 + $0x70] sm:$0xff]  }
 0x2eb   :  { %3655 = vmatpush1.bf16.msra.mxu1 %v5235_v10  ;;  %3410 = vmatprep.subr.bf16.mxu0 %v5240_v12  ;;  %v5311_v10 = vld [vmem:[#allocation21 + $0xf0] sm:$0xff]  }
 0x2ec   :  { %3656 = vmatprep.subr.bf16.mxu1 %v5243_v15  ;;  %v5312_v12 = vld [vmem:[#allocation21 + $0x30] sm:$0xff]  }
 0x2ed   :  { %v5313_v15 = vld [vmem:[#allocation21 + $0xb0] sm:$0xff]  }
 0x2ee   :  { %3411 = vmatpush1.bf16.msra.mxu0 %v5238_v17  ;;  %v5314_v17 = vld [vmem:[#allocation21 + $0x78] sm:$0xff]  }
 0x2ef   :  { %3657 = vmatpush1.bf16.msra.mxu1 %v5241_v18  ;;  %3412 = vmatprep.subr.bf16.mxu0 %v5246_v19  ;;  %v5315_v18 = vld [vmem:[#allocation21 + $0xf8] sm:$0xff]  }
 0x2f0   :  { %3658 = vmatprep.subr.bf16.mxu1 %v5249_v20  ;;  %v5316_v19 = vld [vmem:[#allocation21 + $0x38] sm:$0xff]  }
 0x2f1   :  { %v5317_v20 = vld [vmem:[#allocation21 + $0xb8] sm:$0xff]  }
 0x2f2   :  { %3413 = vmatpush1.bf16.msra.mxu0 %v5244_v27  ;;  %v1205_v27 = vld [vmem:[#allocation20] sm:$0xf] }
 0x2f3   :  { %3659 = vmatpush1.bf16.msra.mxu1 %v5247_v21  ;;  %3414 = vmatprep.subr.bf16.mxu0 %v5252_v22  ;;  %v1210_v21 = vrot.slane %v1205_v27, %v5919_v44  ;;  %v1218_v22 = vrot.slane %v1205_v27, %v5935_v11 }
 0x2f4   :  { %3660 = vmatprep.subr.bf16.mxu1 %v5255_v23  ;;  %v1214_v23 = vrot.slane %v1205_v27, %v5923_v46 }
 0x2f6   :  { %3415 = vmatpush1.bf16.msra.mxu0 %v5250_v24  ;;  %v1222_v24 = vrot.slane %v1205_v27, %v5925_v47 }
 0x2f7   :  { %3661 = vmatpush1.bf16.msra.mxu1 %v5253_v26  ;;  %3416 = vmatprep.subr.bf16.mxu0 %v5258_v28 }
 0x2f8   :  { %3662 = vmatprep.subr.bf16.mxu1 %v5261_v29 }
 0x2fa   :  { %3417 = vmatpush1.bf16.msra.mxu0 %v5256_v30 }
 0x2fb   :  { %3663 = vmatpush1.bf16.msra.mxu1 %v5259_v31  ;;  %3418 = vmatprep.subr.bf16.mxu0 %v5264_v32 }
 0x2fc   :  { %3664 = vmatprep.subr.bf16.mxu1 %v5267_v49 }
 0x2fe   :  { %3419 = vmatpush1.bf16.msra.mxu0 %v5262_v33 }
 0x2ff   :  { %3665 = vmatpush1.bf16.msra.mxu1 %v5265_v25  ;;  %3420 = vmatprep.subr.bf16.mxu0 %v5270_v34 }
 0x300   :  { %3666 = vmatprep.subr.bf16.mxu1 %v5273_v35 }
 0x302   :  { %3421 = vmatpush1.bf16.msra.mxu0 %v5268_v36 }
 0x303   :  { %3667 = vmatpush1.bf16.msra.mxu1 %v5271_v42  ;;  %3422 = vmatprep.subr.bf16.mxu0 %v5276_v37 }
 0x304   :  { %3668 = vmatprep.subr.bf16.mxu1 %v5279_v38 }
 0x306   :  { %3423 = vmatpush1.bf16.msra.mxu0 %v5274_v45 }
 0x307   :  { %3669 = vmatpush1.bf16.msra.mxu1 %v5277_v39  ;;  %3424 = vmatprep.subr.bf16.mxu0 %v5282_v43 }
 0x308   :  { %3670 = vmatprep.subr.bf16.mxu1 %v5285_v40  ;;  %v4498_v40 = vld [vmem:[#allocation23] ss:$0 sm:$0xff] }
 0x30a   :  { %3425 = vmatpush1.bf16.msra.mxu0 %v5280_v41 }
 0x30b   :  { %3671 = vmatpush1.bf16.msra.mxu1 %v5283_v50  ;;  %4549 = vmatprep.subr.bf16.mxu0 %v5286_v51 }
 0x30c   :  { %4571 = vmatprep.subr.bf16.mxu1 %v5287_v52 }
 0x30d   :  { %3427 = vmatmul.mubr.bf16.vlgmr.msra.gmra.mrb[12].mxu0 %v4547_v61 }
 0x30e   :  { %3673 = vmatmul.mubr.bf16.vlgmr.msra.gmra.mrb[12].mxu1 %v4547_v61  ;;  %4550 = vmatpush3.bf16.msra.mxu0 %v5288_v58 }
 0x30f   :  { %4572 = vmatpush3.bf16.msra.mxu1 %v5289_v53  ;;  %4551 = vmatprep.subr.bf16.mxu0 %v5290_v54 }
 0x310   :  { %4573 = vmatprep.subr.bf16.mxu1 %v5291_v55 }
 0x312   :  { %4552 = vmatpush3.bf16.msra.mxu0 %v5292_v56 }
 0x313   :  { %4574 = vmatpush3.bf16.msra.mxu1 %v5293_v59  ;;  %4553 = vmatprep.subr.bf16.mxu0 %v5294_v57 }
 0x314   :  { %4575 = vmatprep.subr.bf16.mxu1 %v5295_v16 }
 0x316   :  { %4554 = vmatpush3.bf16.msra.mxu0 %v5296_v60 }
 0x317   :  { %4576 = vmatpush3.bf16.msra.mxu1 %v5297_v62  ;;  %4555 = vmatprep.subr.bf16.mxu0 %v5298_v63 }
 0x318   :  { %4577 = vmatprep.subr.bf16.mxu1 %v5299_v0 }
 0x31a   :  { %4556 = vmatpush3.bf16.msra.mxu0 %v5300_v1 }
 0x31b   :  { %4578 = vmatpush3.bf16.msra.mxu1 %v5301_v2  ;;  %4557 = vmatprep.subr.bf16.mxu0 %v5302_v3 }
 0x31c   :  { %4579 = vmatprep.subr.bf16.mxu1 %v5303_v4 }
 0x31e   :  { %4558 = vmatpush3.bf16.msra.mxu0 %v5304_v13 }
 0x31f   :  { %4580 = vmatpush3.bf16.msra.mxu1 %v5305_v5  ;;  %4559 = vmatprep.subr.bf16.mxu0 %v5306_v6 }
 0x320   :  { %4581 = vmatprep.subr.bf16.mxu1 %v5307_v7 }
 0x322   :  { %4560 = vmatpush3.bf16.msra.mxu0 %v5308_v8 }
 0x323   :  { %4582 = vmatpush3.bf16.msra.mxu1 %v5309_v14  ;;  %4561 = vmatprep.subr.bf16.mxu0 %v5310_v9 }
 0x324   :  { %4583 = vmatprep.subr.bf16.mxu1 %v5311_v10 }
 0x326   :  { %4562 = vmatpush3.bf16.msra.mxu0 %v5312_v12 }
 0x327   :  { %4584 = vmatpush3.bf16.msra.mxu1 %v5313_v15  ;;  %4563 = vmatprep.subr.bf16.mxu0 %v5314_v17 }
 0x328   :  { %4585 = vmatprep.subr.bf16.mxu1 %v5315_v18 }
 0x32a   :  { %4564 = vmatpush3.bf16.msra.mxu0 %v5316_v19 }
 0x32b   :  { %4586 = vmatpush3.bf16.msra.mxu1 %v5317_v20 }
 0x3e0   :  { %v3428_v26 = vpop.f32.mrb[12].mxu0 }
 0x3e1   :  { %v4593_v28 = vadd.f32 %v3428_v26, %v1210_v21  ;;  %v3674_v29 = vpop.f32.mrb[12].mxu1  ;;  %v3430_v30 = vpop.f32.mrb[13].mxu0 }
 0x3e2   :  { %v4595_v31 = vadd.f32 %v3674_v29, %v1218_v22  ;;  %v4594_v32 = vadd.f32 %v3430_v30, %v1214_v23  ;;  %v3676_v49 = vpop.f32.mrb[13].mxu1  ;;  %v3432_v33 = vpop.f32.mrb[14].mxu0 }
 0x3e3   :  { %v3681_v25 = vmax.f32 %v4593_v28, 0.0  ;;  %v4596_v34 = vadd.f32 %v3676_v49, %v1222_v24  ;;  %v3678_v35 = vpop.f32.mrb[14].mxu1  ;;  %v3433_v36 = vpop.f32.mrb[15].mxu0 }
 0x3e4   :  { %v3683_v42 = vmax.f32 %v4595_v31, 0.0  ;;  %v3682_v44 = vmax.f32 %v4594_v32, 0.0  ;;  %v3679_v37 = vpop.f32.mrb[15].mxu1 }
 0x3e5   :  { %v3684_v11 = vmax.f32 %v4596_v34, 0.0  ;;  %v3685_v46 = vpack.c.bf16 %v3681_v25, %v3681_v25 }
 0x3e6   :  { %v3686_v38 = vpack.c.bf16 %v3682_v44, %v3682_v44  ;;  %v3687_v47 = vpack.c.bf16 %v3683_v42, %v3683_v42 }
 0x3e7   :  { %v3688_v45 = vpack.c.bf16 %v3684_v11, %v3684_v11 }
 0x3e8   :  { %3984 = vmatprep.mubr.bf16.mxu0 %v3686_v38 }
 0x3e9   :  { %4024 = vmatprep.mubr.bf16.mxu1 %v3688_v45  ;;  %3985 = vmatmul.mubr.bf16.vlgmr.msra.gmra.mrb[16].mxu0 %v3685_v46 }
 0x3ea   :  { %4025 = vmatmul.mubr.bf16.vlgmr.msra.gmra.mrb[16].mxu1 %v3687_v47 }
 0x4bc   :  { %v4565_v39 = vpop.f32.mrb[16].mxu0 }
 0x4bd   :  { %v4587_v43 = vpop.f32.mrb[16].mxu1  ;;  %v4566_v41 = vpop.f32.mrb[17].mxu0 }
 0x4be   :  { %v4567_v48 = vadd.f32 %v4566_v41, %v4565_v39  ;;  %v4588_v50 = vpop.f32.mrb[17].mxu1  ;;  %v4568_v51 = vpop.f32.mrb[18].mxu0 }
 0x4bf   :  { %v4589_v52 = vadd.f32 %v4588_v50, %v4587_v43  ;;  %v4590_v58 = vpop.f32.mrb[18].mxu1  ;;  %v4569_v61 = vpop.f32.mrb[19].mxu0 }
 0x4c0   :  { %v3987_v53 = vadd.f32 %v4567_v48, %v4498_v40  ;;  %v4591_v54 = vpop.f32.mrb[19].mxu1 }
 0x4c2   :  { %v4027_v55 = vadd.f32 %v4589_v52, %v3987_v53 }
 0x4c4   :  { %4032 = vst [vmem:[#allocation24] sm:$0xff] %v4027_v55 }
 0x4c5   :  { %5615 = shalt.err (!%p5612_p10)
}
 0x4c6   :  { %s5616_s19 = scalar_lea.hbm %s6013_s13, 128 }
 0x4c7   :  { %p5617_p11 = scmp.ne.s32.totalorder %s6013_s13, %s5616_s19  ;;  %p5620_p12 = scmp.lt.u32.totalorder %s5616_s19, %s6013_s13 }
 0x4c9   :  { %p5622_p13 = pnand %p5620_p12, %p5617_p11 }
 0x4cb   :  { %5625 = shalt.err (!%p5622_p13)
}
 0x4cc   :  { %4042 = dma.vmem_to_hbm [thread:$0]  %s4040_s5, 128, %s6013_s13, [#allocation5]  }
 0x4cd   :  { %5640 = dma.done.wait [#allocation5], 128  }
 0x4ce   :  { %5641 = vsyncadd [#allocation5], 4294967168 }
 0x4cf   :  { %4046 = vsyncpa [#allocation4], 1 }
 0x4d0   :  { %4047 = vsyncpa [#allocation7], 1 }
 0x4d1   :  { %4048 = vsyncpa [#allocation10], 1 }
 0x4d2   :  { %4049 = vsyncpa [#allocation13], 1 }
 0x4d3   :  { %4050 = vsyncpa [#allocation16], 1 }
 0x4d4   :  { %4051 = vsyncpa [#allocation19], 1 }
 0x4d5   :  { %4052 = vsyncpa [#allocation22], 1 }
 0x4d6   :  { %4053 = vsyncpa [#allocation5], 1 }

// kernel: tpu_custom_call.1
= control target key start
LH: loop header
LB: loop body
LE: loop exit
PB: predicated region body
PF: predicated region fallthrough
CT: control target
= control target key end

     0   :  { %18 = vsyncpa [#allocation4], 0  ;;  %s6000_s0 = inlined_call_operand.hbm [shape: bf16[8,32], index: 0, kind: input, shape index: {}]   ;;  %s6001_s1 = inlined_call_operand.hbm [shape: bf16[8,48], index: 1, kind: input, shape index: {}]   ;;  %s6002_s2 = inlined_call_operand.hbm [shape: bf16[8,64], index: 2, kind: input, shape index: {}]   ;;  %s6003_s3 = inlined_call_operand.hbm [shape: bf16[32,512], index: 3, kind: input, shape index: {}]   ;;  %s6004_s4 = inlined_call_operand.hbm [shape: bf16[48,512], index: 4, kind: input, shape index: {}]   ;;  %s6005_s5 = inlined_call_operand.hbm [shape: bf16[64,512], index: 5, kind: input, shape index: {}]   ;;  %s6006_s6 = inlined_call_operand.hbm [shape: f32[1,512], index: 6, kind: input, shape index: {}]   ;;  %s6007_s7 = inlined_call_operand.hbm [shape: f32[1,512], index: 7, kind: input, shape index: {}]   ;;  %s6008_s8 = inlined_call_operand.hbm [shape: f32[1,512], index: 8, kind: input, shape index: {}]   ;;  %s6009_s9 = inlined_call_operand.hbm [shape: bf16[1536,512], index: 9, kind: input, shape index: {}]   ;;  %s6010_s10 = inlined_call_operand.hbm [shape: f32[1,512], index: 10, kind: input, shape index: {}]   ;;  %s6011_s11 = inlined_call_operand.hbm [shape: bf16[512,128], index: 11, kind: input, shape index: {}]   ;;  %s6012_s12 = inlined_call_operand.hbm [shape: f32[1,128], index: 12, kind: input, shape index: {}]   ;;  %s6013_s13 = inlined_call_operand.hbm [shape: f32[8,128], index: 13, kind: output, shape index: {}]  }
   0x1   :  { %19 = vsyncpa [#allocation7], 0 }
   0x2   :  { %20 = vsyncpa [#allocation10], 0 }
   0x3   :  { %21 = vsyncpa [#allocation13], 0 }
   0x4   :  { %22 = vsyncpa [#allocation16], 0 }
   0x5   :  { %23 = vsyncpa [#allocation19], 0 }
   0x6   :  { %24 = vsyncpa [#allocation22], 0 }
   0x7   :  { %25 = vsyncpa [#allocation5], 0  ;;  %s5642_s25 = smov [#allocation6]   ;;  %s5643_s27 = smov [#allocation9]  }
   0x8   :  { %s42_s26 = sshll.u32 %s5642_s25, 4  ;;  %s61_s28 = sshll.u32 %s5643_s27, 4  ;;  %s43_s26 = int_to_ptr.vmem [resolvable:$true] %s42_s26  ;;  %s5731_s28 = int_to_ptr.vmem [resolvable:$true] %s61_s28 }
   0x9   :  { %s5318_s14 = scalar_lea.hbm %s6001_s1, 64 }
   0xa   :  { %p5319_p0 = scmp.ne.s32.totalorder %s6001_s1, %s5318_s14  ;;  %p5322_p1 = scmp.lt.u32.totalorder %s5318_s14, %s6001_s1 }
   0xc   :  { %p5324_p2 = pnand %p5322_p1, %p5319_p0 }
   0xe   :  { %5327 = shalt.err (!%p5324_p2)
}
   0xf   :  { %s5328_s19 = scalar_lea.vmem %s43_s26, 64  ;;  %p5333_p4 = scmp.lt.s32.totalorder %s43_s26, %s43_s26 }
  0x10   :  { %p5329_p3 = scmp.ne.s32.totalorder %s43_s26, %s5328_s19  ;;  %p5334_p5 = scmp.lt.s32.totalorder %s5328_s19, %s5328_s19 }
  0x12   :  { %p5335_p6 = por %p5334_p5, %p5333_p4 }
  0x14   :  { %p5336_p7 = pnand %p5335_p6, %p5329_p3 }
  0x16   :  { %5339 = shalt.err (!%p5336_p7)
}
  0x17   :  { %45 = dma.hbm_to_vmem [thread:$0]  %s6001_s1, 64, %s43_s26, [#allocation7]  }
  0x18   :  { %s5340_s24 = scalar_lea.hbm %s6003_s3, 1024 }
  0x19   :  { %p5341_p8 = scmp.ne.s32.totalorder %s6003_s3, %s5340_s24  ;;  %p5344_p9 = scmp.lt.u32.totalorder %s5340_s24, %s6003_s3 }
  0x1b   :  { %p5346_p10 = pnand %p5344_p9, %p5341_p8 }
  0x1d   :  { %5349 = shalt.err (!%p5346_p10)
}
  0x1e   :  { %s5350_s14 = scalar_lea.vmem %s5731_s28, 1024  ;;  %p5355_p12 = scmp.lt.s32.totalorder %s5731_s28, %s5731_s28 }
  0x1f   :  { %p5351_p11 = scmp.ne.s32.totalorder %s5731_s28, %s5350_s14  ;;  %p5356_p13 = scmp.lt.s32.totalorder %s5350_s14, %s5350_s14 }
  0x21   :  { %p5357_p0 = por %p5356_p13, %p5355_p12 }
  0x23   :  { %p5358_p1 = pnand %p5357_p0, %p5351_p11 }
  0x25   :  { %5361 = shalt.err (!%p5358_p1)
}
  0x26   :  { %s5644_s1 = smov 256   ;;  %s5645_s26 = smov 16  }
  0x27   :  { %67 = dma.hbm_to_vmem [thread:$0]  %s6003_s3, 1024, %s5731_s28, [#allocation10], %s5644_s1, %s5644_s1, %s5645_s26  }
  0x28   :  { %s5646_s17 = smov [#allocation12]   ;;  %s5647_s19 = smov [#allocation15]  }
  0x29   :  { %s85_s18 = sshll.u32 %s5646_s17, 4  ;;  %s108_s20 = sshll.u32 %s5647_s19, 4  ;;  %s86_s18 = int_to_ptr.vmem [resolvable:$true] %s85_s18  ;;  %s109_s20 = int_to_ptr.vmem [resolvable:$true] %s108_s20 }
  0x2a   :  { %s5362_s23 = scalar_lea.hbm %s6005_s5, 2048 }
  0x2b   :  { %p5363_p2 = scmp.ne.s32.totalorder %s6005_s5, %s5362_s23  ;;  %p5366_p3 = scmp.lt.u32.totalorder %s5362_s23, %s6005_s5 }
  0x2d   :  { %p5368_p4 = pnand %p5366_p3, %p5363_p2 }
  0x2f   :  { %5371 = shalt.err (!%p5368_p4)
}
  0x30   :  { %s5372_s3 = scalar_lea.vmem %s86_s18, 2048  ;;  %p5377_p6 = scmp.lt.s32.totalorder %s86_s18, %s86_s18 }
  0x31   :  { %p5373_p5 = scmp.ne.s32.totalorder %s86_s18, %s5372_s3  ;;  %p5378_p7 = scmp.lt.s32.totalorder %s5372_s3, %s5372_s3 }
  0x33   :  { %p5379_p8 = por %p5378_p7, %p5377_p6 }
  0x35   :  { %p5380_p9 = pnand %p5379_p8, %p5373_p5 }
  0x37   :  { %5383 = shalt.err (!%p5380_p9)
}
  0x38   :  { %91 = dma.hbm_to_vmem [thread:$0]  %s6005_s5, 2048, %s86_s18, [#allocation13], %s5644_s1, %s5644_s1, %s5645_s26  }
  0x39   :  { %s5384_s16 = scalar_lea.hbm %s6007_s7, 64 }
  0x3a   :  { %p5385_p10 = scmp.ne.s32.totalorder %s6007_s7, %s5384_s16  ;;  %p5388_p11 = scmp.lt.u32.totalorder %s5384_s16, %s6007_s7 }
  0x3c   :  { %p5390_p12 = pnand %p5388_p11, %p5385_p10 }
  0x3e   :  { %5393 = shalt.err (!%p5390_p12)
}
  0x3f   :  { %s5394_s23 = scalar_lea.vmem %s109_s20, 64  ;;  %p5399_p0 = scmp.lt.s32.totalorder %s109_s20, %s109_s20 }
  0x40   :  { %p5395_p13 = scmp.ne.s32.totalorder %s109_s20, %s5394_s23  ;;  %p5400_p1 = scmp.lt.s32.totalorder %s5394_s23, %s5394_s23 }
  0x42   :  { %p5401_p2 = por %p5400_p1, %p5399_p0 }
  0x44   :  { %p5402_p3 = pnand %p5401_p2, %p5395_p13 }
  0x46   :  { %5405 = shalt.err (!%p5402_p3)
}
  0x47   :  { %111 = dma.hbm_to_vmem [thread:$0]  %s6007_s7, 64, %s109_s20, [#allocation16]  }
  0x48   :  { %s5648_s24 = smov [#allocation18]   ;;  %s5649_s27 = smov [#allocation21]  }
  0x49   :  { %s127_s25 = sshll.u32 %s5648_s24, 4  ;;  %s149_s29 = sshll.u32 %s5649_s27, 4  ;;  %s128_s25 = int_to_ptr.vmem [resolvable:$true] %s127_s25  ;;  %s5792_s29 = int_to_ptr.vmem [resolvable:$true] %s149_s29 }
  0x4a   :  { %s5406_s30 = scalar_lea.hbm %s6009_s9, 49152 }
  0x4b   :  { %p5407_p4 = scmp.ne.s32.totalorder %s6009_s9, %s5406_s30  ;;  %p5410_p5 = scmp.lt.u32.totalorder %s5406_s30, %s6009_s9 }
  0x4d   :  { %p5412_p6 = pnand %p5410_p5, %p5407_p4 }
  0x4f   :  { %5415 = shalt.err (!%p5412_p6)
}
  0x50   :  { %s5416_s7 = scalar_lea.vmem %s128_s25, 49152  ;;  %p5421_p8 = scmp.lt.s32.totalorder %s128_s25, %s128_s25 }
  0x51   :  { %p5417_p7 = scmp.ne.s32.totalorder %s128_s25, %s5416_s7  ;;  %p5422_p9 = scmp.lt.s32.totalorder %s5416_s7, %s5416_s7 }
  0x53   :  { %p5423_p10 = por %p5422_p9, %p5421_p8 }
  0x55   :  { %p5424_p11 = pnand %p5423_p10, %p5417_p7 }
  0x57   :  { %5427 = shalt.err (!%p5424_p11)
}
  0x58   :  { %133 = dma.hbm_to_vmem [thread:$0]  %s6009_s9, 49152, %s128_s25, [#allocation19], %s5644_s1, %s5644_s1, %s5645_s26  }
  0x59   :  { %s5428_s23 = scalar_lea.hbm %s6011_s11, 4096 }
  0x5a   :  { %p5429_p12 = scmp.ne.s32.totalorder %s6011_s11, %s5428_s23  ;;  %p5432_p13 = scmp.lt.u32.totalorder %s5428_s23, %s6011_s11 }
  0x5c   :  { %p5434_p0 = pnand %p5432_p13, %p5429_p12 }
  0x5e   :  { %5437 = shalt.err (!%p5434_p0)
}
  0x5f   :  { %s5438_s3 = scalar_lea.vmem %s5792_s29, 4096  ;;  %p5443_p2 = scmp.lt.s32.totalorder %s5792_s29, %s5792_s29 }
  0x60   :  { %p5439_p1 = scmp.ne.s32.totalorder %s5792_s29, %s5438_s3  ;;  %p5444_p3 = scmp.lt.s32.totalorder %s5438_s3, %s5438_s3 }
  0x62   :  { %p5445_p4 = por %p5444_p3, %p5443_p2 }
  0x64   :  { %p5446_p5 = pnand %p5445_p4, %p5439_p1 }
  0x66   :  { %5449 = shalt.err (!%p5446_p5)
}
  0x67   :  { %s5650_s9 = smov 64   ;;  %s5651_s25 = smov 4  }
  0x68   :  { %155 = dma.hbm_to_vmem [thread:$0]  %s6011_s11, 4096, %s5792_s29, [#allocation22], %s5650_s9, %s5650_s9, %s5651_s25  }
  0x69   :  { %s5652_s14 = smov [#allocation3]   ;;  %s5653_s16 = smov [#allocation8]  }
  0x6a   :  { %s32_s15 = sshll.u32 %s5652_s14, 4  ;;  %s52_s17 = sshll.u32 %s5653_s16, 4  ;;  %s33_s15 = int_to_ptr.vmem [resolvable:$true] %s32_s15  ;;  %s53_s17 = int_to_ptr.vmem [resolvable:$true] %s52_s17 }
  0x6b   :  { %s5450_s19 = scalar_lea.hbm %s6000_s0, 64 }
  0x6c   :  { %p5451_p6 = scmp.ne.s32.totalorder %s6000_s0, %s5450_s19  ;;  %p5454_p7 = scmp.lt.u32.totalorder %s5450_s19, %s6000_s0 }
  0x6e   :  { %p5456_p8 = pnand %p5454_p7, %p5451_p6 }
  0x70   :  { %5459 = shalt.err (!%p5456_p8)
}
  0x71   :  { %s5460_s11 = scalar_lea.vmem %s33_s15, 64  ;;  %p5465_p10 = scmp.lt.s32.totalorder %s33_s15, %s33_s15 }
  0x72   :  { %p5461_p9 = scmp.ne.s32.totalorder %s33_s15, %s5460_s11  ;;  %p5466_p11 = scmp.lt.s32.totalorder %s5460_s11, %s5460_s11 }
  0x74   :  { %p5467_p12 = por %p5466_p11, %p5465_p10 }
  0x76   :  { %p5468_p13 = pnand %p5467_p12, %p5461_p9 }
  0x78   :  { %5471 = shalt.err (!%p5468_p13)
}
  0x79   :  { %35 = dma.hbm_to_vmem [thread:$0]  %s6000_s0, 64, %s33_s15, [#allocation4]  }
  0x7a   :  { %s5472_s3 = scalar_lea.hbm %s6002_s2, 64 }
  0x7b   :  { %p5473_p0 = scmp.ne.s32.totalorder %s6002_s2, %s5472_s3  ;;  %p5476_p1 = scmp.lt.u32.totalorder %s5472_s3, %s6002_s2 }
  0x7d   :  { %p5478_p2 = pnand %p5476_p1, %p5473_p0 }
  0x7f   :  { %5481 = shalt.err (!%p5478_p2)
}
  0x80   :  { %s5482_s14 = scalar_lea.vmem %s53_s17, 64  ;;  %p5487_p4 = scmp.lt.s32.totalorder %s53_s17, %s53_s17 }
  0x81   :  { %p5483_p3 = scmp.ne.s32.totalorder %s53_s17, %s5482_s14  ;;  %p5488_p5 = scmp.lt.s32.totalorder %s5482_s14, %s5482_s14 }
  0x83   :  { %p5489_p6 = por %p5488_p5, %p5487_p4 }
  0x85   :  { %p5490_p7 = pnand %p5489_p6, %p5483_p3 }
  0x87   :  { %5493 = shalt.err (!%p5490_p7)
}
  0x88   :  { %55 = dma.hbm_to_vmem [thread:$0]  %s6002_s2, 64, %s53_s17, [#allocation7]  }
  0x89   :  { %s5654_s16 = smov [#allocation11]   ;;  %s5655_s20 = smov [#allocation14]  }
  0x8a   :  { %s73_s7 = sshll.u32 %s5654_s16, 4  ;;  %s98_s19 = sshll.u32 %s5655_s20, 4  ;;  %s74_s7 = int_to_ptr.vmem [resolvable:$true] %s73_s7  ;;  %s99_s19 = int_to_ptr.vmem [resolvable:$true] %s98_s19 }
  0x8b   :  { %s5494_s23 = scalar_lea.hbm %s6004_s4, 1536 }
  0x8c   :  { %p5495_p8 = scmp.ne.s32.totalorder %s6004_s4, %s5494_s23  ;;  %p5498_p9 = scmp.lt.u32.totalorder %s5494_s23, %s6004_s4 }
  0x8e   :  { %p5500_p10 = pnand %p5498_p9, %p5495_p8 }
  0x90   :  { %5503 = shalt.err (!%p5500_p10)
}
  0x91   :  { %s5504_s2 = scalar_lea.vmem %s74_s7, 1536  ;;  %p5509_p12 = scmp.lt.s32.totalorder %s74_s7, %s74_s7 }
  0x92   :  { %p5505_p11 = scmp.ne.s32.totalorder %s74_s7, %s5504_s2  ;;  %p5510_p13 = scmp.lt.s32.totalorder %s5504_s2, %s5504_s2 }
  0x94   :  { %p5511_p0 = por %p5510_p13, %p5509_p12 }
  0x96   :  { %p5512_p1 = pnand %p5511_p0, %p5505_p11 }
  0x98   :  { %5515 = shalt.err (!%p5512_p1)
}
  0x99   :  { %79 = dma.hbm_to_vmem [thread:$0]  %s6004_s4, 1536, %s74_s7, [#allocation10], %s5644_s1, %s5644_s1, %s5645_s26  }
  0x9a   :  { %s5516_s9 = scalar_lea.hbm %s6006_s6, 64 }
  0x9b   :  { %p5517_p2 = scmp.ne.s32.totalorder %s6006_s6, %s5516_s9  ;;  %p5520_p3 = scmp.lt.u32.totalorder %s5516_s9, %s6006_s6 }
  0x9d   :  { %p5522_p4 = pnand %p5520_p3, %p5517_p2 }
  0x9f   :  { %5525 = shalt.err (!%p5522_p4)
}
  0xa0   :  { %s5526_s0 = scalar_lea.vmem %s99_s19, 64  ;;  %p5531_p6 = scmp.lt.s32.totalorder %s99_s19, %s99_s19 }
  0xa1   :  { %p5527_p5 = scmp.ne.s32.totalorder %s99_s19, %s5526_s0  ;;  %p5532_p7 = scmp.lt.s32.totalorder %s5526_s0, %s5526_s0 }
  0xa3   :  { %p5533_p8 = por %p5532_p7, %p5531_p6 }
  0xa5   :  { %p5534_p9 = pnand %p5533_p8, %p5527_p5 }
  0xa7   :  { %5537 = shalt.err (!%p5534_p9)
}
  0xa8   :  { %101 = dma.hbm_to_vmem [thread:$0]  %s6006_s6, 64, %s99_s19, [#allocation13]  }
  0xa9   :  { %s5656_s26 = smov [#allocation17]   ;;  %s5657_s16 = smov [#allocation20]  }
  0xaa   :  { %s118_s15 = sshll.u32 %s5656_s26, 4  ;;  %s140_s7 = sshll.u32 %s5657_s16, 4  ;;  %s119_s15 = int_to_ptr.vmem [resolvable:$true] %s118_s15  ;;  %s141_s7 = int_to_ptr.vmem [resolvable:$true] %s140_s7 }
  0xab   :  { %s5538_s22 = scalar_lea.hbm %s6008_s8, 64 }
  0xac   :  { %p5539_p10 = scmp.ne.s32.totalorder %s6008_s8, %s5538_s22  ;;  %p5542_p11 = scmp.lt.u32.totalorder %s5538_s22, %s6008_s8 }
  0xae   :  { %p5544_p12 = pnand %p5542_p11, %p5539_p10 }
  0xb0   :  { %5547 = shalt.err (!%p5544_p12)
}
  0xb1   :  { %s5548_s6 = scalar_lea.vmem %s119_s15, 64  ;;  %p5553_p0 = scmp.lt.s32.totalorder %s119_s15, %s119_s15 }
  0xb2   :  { %p5549_p13 = scmp.ne.s32.totalorder %s119_s15, %s5548_s6  ;;  %p5554_p1 = scmp.lt.s32.totalorder %s5548_s6, %s5548_s6 }
  0xb4   :  { %p5555_p2 = por %p5554_p1, %p5553_p0 }
  0xb6   :  { %p5556_p3 = pnand %p5555_p2, %p5549_p13 }
  0xb8   :  { %5559 = shalt.err (!%p5556_p3)
}
  0xb9   :  { %121 = dma.hbm_to_vmem [thread:$0]  %s6008_s8, 64, %s119_s15, [#allocation16]  }
  0xba   :  { %s5560_s24 = scalar_lea.hbm %s6010_s10, 64 }
  0xbb   :  { %p5561_p4 = scmp.ne.s32.totalorder %s6010_s10, %s5560_s24  ;;  %p5564_p5 = scmp.lt.u32.totalorder %s5560_s24, %s6010_s10 }
  0xbd   :  { %p5566_p6 = pnand %p5564_p5, %p5561_p4 }
  0xbf   :  { %5569 = shalt.err (!%p5566_p6)
}
  0xc0   :  { %s5570_s28 = scalar_lea.vmem %s141_s7, 64  ;;  %p5575_p8 = scmp.lt.s32.totalorder %s141_s7, %s141_s7 }
  0xc1   :  { %p5571_p7 = scmp.ne.s32.totalorder %s141_s7, %s5570_s28  ;;  %p5576_p9 = scmp.lt.s32.totalorder %s5570_s28, %s5570_s28 }
  0xc3   :  { %p5577_p10 = por %p5576_p9, %p5575_p8 }
  0xc5   :  { %p5578_p11 = pnand %p5577_p10, %p5571_p7 }
  0xc7   :  { %5581 = shalt.err (!%p5578_p11)
}
  0xc8   :  { %143 = dma.hbm_to_vmem [thread:$0]  %s6010_s10, 64, %s141_s7, [#allocation19]  }
  0xc9   :  { %s5658_s14 = smov [#allocation23]   ;;  %s5582_s26 = scalar_lea.hbm %s6012_s12, 16 }
  0xca   :  { %s162_s0 = sshll.u32 %s5658_s14, 4  ;;  %p5583_p12 = scmp.ne.s32.totalorder %s6012_s12, %s5582_s26  ;;  %s163_s0 = int_to_ptr.vmem [resolvable:$true] %s162_s0 }
  0xcb   :  { %p5586_p13 = scmp.lt.u32.totalorder %s5582_s26, %s6012_s12 }
  0xcd   :  { %p5588_p0 = pnand %p5586_p13, %p5583_p12 }
  0xcf   :  { %5591 = shalt.err (!%p5588_p0)
}
  0xd0   :  { %s5592_s22 = scalar_lea.vmem %s163_s0, 16  ;;  %s5596_s10 = scalar_lea.vmem %s163_s0, 32 }
  0xd1   :  { %p5593_p1 = scmp.ne.s32.totalorder %s163_s0, %s5592_s22  ;;  %p5597_p2 = scmp.lt.s32.totalorder %s163_s0, %s163_s0 }
  0xd2   :  { %p5598_p3 = scmp.lt.s32.totalorder %s5596_s10, %s5592_s22 }
  0xd4   :  { %p5599_p4 = por %p5598_p3, %p5597_p2 }
  0xd6   :  { %p5600_p5 = pnand %p5599_p4, %p5593_p1 }
  0xd8   :  { %5603 = shalt.err (!%p5600_p5)
}
  0xd9   :  { %165 = dma.hbm_to_vmem [thread:$0]  %s6012_s12, 16, %s163_s0, [#allocation22]  }
  0xda   :  { %5626 = dma.done.wait [#allocation4], 64  }
  0xdb   :  { %5627 = vsyncadd [#allocation4], 4294967232 }
  0xdc   :  { %5628 = dma.done.wait [#allocation7], 128  }
  0xdd   :  { %5629 = vsyncadd [#allocation7], 4294967168 }
  0xde   :  { %5630 = dma.done.wait [#allocation10], 2560  }
  0xdf   :  { %5631 = vsyncadd [#allocation10], 4294964736 }
  0xe0   :  { %5632 = dma.done.wait [#allocation13], 2112  }
  0xe1   :  { %5633 = vsyncadd [#allocation13], 4294965184 }
  0xe2   :  { %5634 = dma.done.wait [#allocation16], 128  }
  0xe3   :  { %5635 = vsyncadd [#allocation16], 4294967168 }
  0xe4   :  { %5636 = dma.done.wait [#allocation19], 49216  }
  0xe5   :  { %5637 = vsyncadd [#allocation19], 4294918080 }
  0xe6   :  { %5638 = dma.done.wait [#allocation22], 4112  }
  0xe7   :  { %5639 = vsyncadd [#allocation22], 4294963184  ;;  %v5659_v0 = vmov 0   ;;  %v4656_v1 = vld [vmem:[#allocation9 + $0x4] ss:$16 sps:$4 sm:$0xff]   ;;  %vm277_vm0 = vcmask 261120  }
  0xe8   :  { %313 = vmatprep.mubr.bf16.mxu0 %v5659_v0  ;;  %354 = vmatprep.mubr.bf16.mxu1 %v5659_v0  ;;  %v4658_v2 = vld [vmem:[#allocation9] ss:$16 sps:$4 sm:$0xff]   ;;  %v4659_v3 = vld [vmem:[#allocation9 + $0x24] ss:$16 sps:$4 sm:$0xff]   ;;  %v4662_v5 = vld [vmem:[#allocation9 + $0xc] ss:$16 sps:$4 sm:$0xff]  }
  0xe9   :  { %281 = vmatprep.subr.bf16.mxu0 %v4656_v1  ;;  %v4661_v4 = vld [vmem:[#allocation9 + $0x20] ss:$16 sps:$4 sm:$0xff]   ;;  %v4664_v6 = vld [vmem:[#allocation9 + $0x8] ss:$16 sps:$4 sm:$0xff]   ;;  %v206_v7 = vld [vmem:[#allocation3] sm:$0xf]  ;;  %322 = vmatprep.subr.bf16.mxu1 %v4662_v5 }
  0xea   :  { %282 = vmatpush1.bf16.msra.mxu0 %v4658_v2  ;;  %v4665_v8 = vld [vmem:[#allocation9 + $0x2c] ss:$16 sps:$4 sm:$0xff]   ;;  %323 = vmatpush1.bf16.msra.mxu1 %v4664_v6  ;;  %v4667_v9 = vld [vmem:[#allocation9 + $0x28] ss:$16 sps:$4 sm:$0xff]   ;;  %v4670_v10 = vld [vmem:[#allocation11 + $0x4] ss:$16 sps:$4 sm:$0xff]  }
  0xeb   :  { %283 = vmatprep.subr.bf16.mxu0 %v4659_v3  ;;  %324 = vmatprep.subr.bf16.mxu1 %v4665_v8  ;;  %v4668_v11 = vld [vmem:[#allocation11] ss:$16 sps:$4 sm:$0xff]   ;;  %v4673_v12 = vld [vmem:[#allocation11 + $0x24] ss:$16 sps:$4 sm:$0xff]   ;;  %v4677_v14 = vld [vmem:[#allocation11 + $0x8] ss:$16 sps:$4 sm:$0xff]  }
  0xec   :  { %v4671_v13 = vld [vmem:[#allocation11 + $0x20] ss:$16 sps:$4 sm:$0xff]   ;;  %v4679_v15 = vld [vmem:[#allocation11 + $0xc] ss:$16 sps:$4 sm:$0xff]   ;;  %v4676_v16 = vld [vmem:[#allocation11 + $0x44] ss:$16 sps:$4 sm:$0xff]  }
  0xed   :  { %v4682_v17 = vld [vmem:[#allocation11 + $0x2c] ss:$16 sps:$4 sm:$0xff]   ;;  %v4674_v18 = vld [vmem:[#allocation11 + $0x40] ss:$16 sps:$4 sm:$0xff]   ;;  %v4680_v19 = vld [vmem:[#allocation11 + $0x28] ss:$16 sps:$4 sm:$0xff]  }
  0xee   :  { %284 = vmatpush1.bf16.msra.mxu0 %v4661_v4  ;;  %325 = vmatpush1.bf16.msra.mxu1 %v4667_v9  ;;  %v4685_v20 = vld [vmem:[#allocation11 + $0x4c] ss:$16 sps:$4 sm:$0xff]   ;;  %v4688_v21 = vld [vmem:[#allocation12 + $0x4] ss:$16 sps:$4 sm:$0xff]   ;;  %v385_v22 = vld [vmem:[#allocation6] sm:$0xf] }
  0xef   :  { %484 = vmatprep.subr.bf16.mxu0 %v4670_v10  ;;  %525 = vmatprep.subr.bf16.mxu1 %v4679_v15  ;;  %v4683_v23 = vld [vmem:[#allocation11 + $0x48] ss:$16 sps:$4 sm:$0xff]   ;;  %v4686_v24 = vld [vmem:[#allocation12] ss:$16 sps:$4 sm:$0xff]   ;;  %vm480_vm1 = vcmask 392192   ;;  %vm707_vm2 = vcmask 523264  }
  0xf0   :  { %v4691_v25 = vld [vmem:[#allocation12 + $0xc] ss:$16 sps:$4 sm:$0xff]   ;;  %v4694_v26 = vld [vmem:[#allocation12 + $0x24] ss:$16 sps:$4 sm:$0xff]   ;;  %v4689_v27 = vld [vmem:[#allocation12 + $0x8] ss:$16 sps:$4 sm:$0xff]  }
  0xf1   :  { %4062 = vmatmul.mubr.msk.bf16.vlgmr.msra.gmra.mrb[0].mxu0 %vm277_vm0, %v206_v7  ;;  %4063 = vmatmul.mubr.msk.bf16.vlgmr.msra.gmra.mrb[0].mxu1 %vm277_vm0, %v206_v7  ;;  %v4692_v28 = vld [vmem:[#allocation12 + $0x20] ss:$16 sps:$4 sm:$0xff]   ;;  %v4697_v29 = vld [vmem:[#allocation12 + $0x2c] ss:$16 sps:$4 sm:$0xff]   ;;  %v4700_v30 = vld [vmem:[#allocation12 + $0x44] ss:$16 sps:$4 sm:$0xff]  }
  0xf2   :  { %485 = vmatpush1.bf16.msra.mxu0 %v4668_v11  ;;  %516 = vmatprep.mubr.bf16.mxu0 %v5659_v0  ;;  %v4695_v31 = vld [vmem:[#allocation12 + $0x28] ss:$16 sps:$4 sm:$0xff]   ;;  %v4698_v32 = vld [vmem:[#allocation12 + $0x40] ss:$16 sps:$4 sm:$0xff]   ;;  %v4703_v33 = vld [vmem:[#allocation12 + $0x4c] ss:$16 sps:$4 sm:$0xff]  }
  0xf3   :  { %486 = vmatprep.subr.bf16.mxu0 %v4673_v12  ;;  %526 = vmatpush1.bf16.msra.mxu1 %v4677_v14  ;;  %v4706_v34 = vld [vmem:[#allocation12 + $0x64] ss:$16 sps:$4 sm:$0xff]   ;;  %v4701_v35 = vld [vmem:[#allocation12 + $0x48] ss:$16 sps:$4 sm:$0xff]   ;;  %v4704_v36 = vld [vmem:[#allocation12 + $0x60] ss:$16 sps:$4 sm:$0xff]  }
  0xf4   :  { %557 = vmatprep.mubr.bf16.mxu1 %v5659_v0  ;;  %527 = vmatprep.subr.bf16.mxu1 %v4682_v17  ;;  %v4709_v37 = vld [vmem:[#allocation12 + $0x6c] ss:$16 sps:$4 sm:$0xff]   ;;  %v4712_v38 = vld [vmem:[#allocation18 + $0x4] ss:$16 sps:$4 sm:$0xff]   ;;  %v4707_v39 = vld [vmem:[#allocation12 + $0x68] ss:$16 sps:$4 sm:$0xff]  }
  0xf5   :  { %v588_v40 = vld [vmem:[#allocation8] sm:$0xf]  ;;  %v4715_v42 = vld [vmem:[#allocation18 + $0xc] ss:$16 sps:$4 sm:$0xff]   ;;  %v4718_v43 = vld [vmem:[#allocation18 + $0x24] ss:$16 sps:$4 sm:$0xff]  }
  0xf6   :  { %487 = vmatpush1.bf16.msra.mxu0 %v4671_v13  ;;  %v4710_v41 = vld [vmem:[#allocation18] ss:$16 sps:$4 sm:$0xff]   ;;  %v4713_v44 = vld [vmem:[#allocation18 + $0x8] ss:$16 sps:$4 sm:$0xff]   ;;  %v4721_v46 = vld [vmem:[#allocation18 + $0x2c] ss:$16 sps:$4 sm:$0xff]  }
  0xf7   :  { %488 = vmatprep.subr.bf16.mxu0 %v4676_v16  ;;  %528 = vmatpush1.bf16.msra.mxu1 %v4680_v19  ;;  %v4716_v45 = vld [vmem:[#allocation18 + $0x20] ss:$16 sps:$4 sm:$0xff]   ;;  %v4724_v47 = vld [vmem:[#allocation18 + $0x44] ss:$16 sps:$4 sm:$0xff]   ;;  %v4719_v48 = vld [vmem:[#allocation18 + $0x28] ss:$16 sps:$4 sm:$0xff]  }
  0xf8   :  { %529 = vmatprep.subr.bf16.mxu1 %v4685_v20  ;;  %v4722_v49 = vld [vmem:[#allocation18 + $0x40] ss:$16 sps:$4 sm:$0xff]   ;;  %v4727_v50 = vld [vmem:[#allocation18 + $0x4c] ss:$16 sps:$4 sm:$0xff]   ;;  %v4730_v51 = vld [vmem:[#allocation18 + $0x64] ss:$16 sps:$4 sm:$0xff]  }
  0xf9   :  { %v4725_v52 = vld [vmem:[#allocation18 + $0x48] ss:$16 sps:$4 sm:$0xff]   ;;  %v4728_v53 = vld [vmem:[#allocation18 + $0x60] ss:$16 sps:$4 sm:$0xff]   ;;  %v4733_v54 = vld [vmem:[#allocation18 + $0x6c] ss:$16 sps:$4 sm:$0xff]  }
  0xfa   :  { %489 = vmatpush1.bf16.msra.mxu0 %v4674_v18  ;;  %v4736_v55 = vld [vmem:[#allocation18 + $0x84] ss:$16 sps:$4 sm:$0xff]   ;;  %v4731_v56 = vld [vmem:[#allocation18 + $0x68] ss:$16 sps:$4 sm:$0xff]   ;;  %v4734_v57 = vld [vmem:[#allocation18 + $0x80] ss:$16 sps:$4 sm:$0xff]  }
  0xfb   :  { %711 = vmatprep.subr.bf16.mxu0 %v4688_v21  ;;  %530 = vmatpush1.bf16.msra.mxu1 %v4683_v23  ;;  %v4739_v58 = vld [vmem:[#allocation18 + $0x8c] ss:$16 sps:$4 sm:$0xff]   ;;  %v4742_v59 = vld [vmem:[#allocation18 + $0xa4] ss:$16 sps:$4 sm:$0xff]   ;;  %v4737_v60 = vld [vmem:[#allocation18 + $0x88] ss:$16 sps:$4 sm:$0xff]  }
  0xfc   :  { %752 = vmatprep.subr.bf16.mxu1 %v4691_v25  ;;  %v4740_v61 = vld [vmem:[#allocation18 + $0xa0] ss:$16 sps:$4 sm:$0xff]   ;;  %v4745_v62 = vld [vmem:[#allocation18 + $0xac] ss:$16 sps:$4 sm:$0xff]   ;;  %v4748_v63 = vld [vmem:[#allocation18 + $0xc4] ss:$16 sps:$4 sm:$0xff]  }
  0xfd   :  { %4078 = vmatmul.mubr.msk.bf16.vlgmr.msra.gmra.mrb[4].mxu0 %vm480_vm1, %v385_v22  ;;  %v4746_v1 = vld [vmem:[#allocation18 + $0xc0] ss:$16 sps:$4 sm:$0xff]   ;;  %v4751_v2 = vld [vmem:[#allocation18 + $0xcc] ss:$16 sps:$4 sm:$0xff]   ;;  %v4749_v3 = vld [vmem:[#allocation18 + $0xc8] ss:$16 sps:$4 sm:$0xff]  }
  0xfe   :  { %712 = vmatpush1.bf16.msra.mxu0 %v4686_v24  ;;  %743 = vmatprep.mubr.bf16.mxu0 %v5659_v0  ;;  %v4754_v4 = vld [vmem:[#allocation18 + $0xe4] ss:$16 sps:$4 sm:$0xff]   ;;  %v4752_v5 = vld [vmem:[#allocation18 + $0xe0] ss:$16 sps:$4 sm:$0xff]   ;;  %v4757_v6 = vld [vmem:[#allocation18 + $0xec] ss:$16 sps:$4 sm:$0xff]  }
  0xff   :  { %713 = vmatprep.subr.bf16.mxu0 %v4694_v26  ;;  %4079 = vmatmul.mubr.msk.bf16.vlgmr.msra.gmra.mrb[4].mxu1 %vm480_vm1, %v385_v22  ;;  %v4760_v7 = vld [vmem:[#allocation18 + $0x104] ss:$16 sps:$4 sm:$0xff]   ;;  %v4755_v8 = vld [vmem:[#allocation18 + $0xe8] ss:$16 sps:$4 sm:$0xff]   ;;  %v4758_v9 = vld [vmem:[#allocation18 + $0x100] ss:$16 sps:$4 sm:$0xff]  }
 0x100   :  { %753 = vmatpush1.bf16.msra.mxu1 %v4689_v27  ;;  %784 = vmatprep.mubr.bf16.mxu1 %v5659_v0  ;;  %v4743_v0 = vld [vmem:[#allocation18 + $0xa8] ss:$16 sps:$4 sm:$0xff]   ;;  %v4763_v10 = vld [vmem:[#allocation18 + $0x10c] ss:$16 sps:$4 sm:$0xff]   ;;  %v4766_v11 = vld [vmem:[#allocation18 + $0x124] ss:$16 sps:$4 sm:$0xff]  }
 0x101   :  { %754 = vmatprep.subr.bf16.mxu1 %v4697_v29  ;;  %v4761_v12 = vld [vmem:[#allocation18 + $0x108] ss:$16 sps:$4 sm:$0xff]   ;;  %v4764_v13 = vld [vmem:[#allocation18 + $0x120] ss:$16 sps:$4 sm:$0xff]   ;;  %v4769_v14 = vld [vmem:[#allocation18 + $0x12c] ss:$16 sps:$4 sm:$0xff]  }
 0x102   :  { %714 = vmatpush1.bf16.msra.mxu0 %v4692_v28  ;;  %v4772_v15 = vld [vmem:[#allocation18 + $0x144] ss:$16 sps:$4 sm:$0xff]   ;;  %v4767_v16 = vld [vmem:[#allocation18 + $0x128] ss:$16 sps:$4 sm:$0xff]   ;;  %v4770_v17 = vld [vmem:[#allocation18 + $0x140] ss:$16 sps:$4 sm:$0xff]  }
 0x103   :  { %715 = vmatprep.subr.bf16.mxu0 %v4700_v30  ;;  %v4775_v18 = vld [vmem:[#allocation18 + $0x14c] ss:$16 sps:$4 sm:$0xff]   ;;  %v4778_v19 = vld [vmem:[#allocation18 + $0x164] ss:$16 sps:$4 sm:$0xff]   ;;  %v4773_v20 = vld [vmem:[#allocation18 + $0x148] ss:$16 sps:$4 sm:$0xff]  }
 0x104   :  { %755 = vmatpush1.bf16.msra.mxu1 %v4695_v31  ;;  %v4776_v21 = vld [vmem:[#allocation18 + $0x160] ss:$16 sps:$4 sm:$0xff]   ;;  %v4781_v22 = vld [vmem:[#allocation18 + $0x16c] ss:$16 sps:$4 sm:$0xff]   ;;  %v4784_v23 = vld [vmem:[#allocation18 + $0x184] ss:$16 sps:$4 sm:$0xff]  }
 0x105   :  { %756 = vmatprep.subr.bf16.mxu1 %v4703_v33  ;;  %v4779_v24 = vld [vmem:[#allocation18 + $0x168] ss:$16 sps:$4 sm:$0xff]   ;;  %v4782_v25 = vld [vmem:[#allocation18 + $0x180] ss:$16 sps:$4 sm:$0xff]   ;;  %v4787_v26 = vld [vmem:[#allocation18 + $0x18c] ss:$16 sps:$4 sm:$0xff]  }
 0x106   :  { %716 = vmatpush1.bf16.msra.mxu0 %v4698_v32  ;;  %v4790_v27 = vld [vmem:[#allocation18 + $0x1a4] ss:$16 sps:$4 sm:$0xff]   ;;  %v4785_v28 = vld [vmem:[#allocation18 + $0x188] ss:$16 sps:$4 sm:$0xff]   ;;  %v4788_v29 = vld [vmem:[#allocation18 + $0x1a0] ss:$16 sps:$4 sm:$0xff]  }
 0x107   :  { %717 = vmatprep.subr.bf16.mxu0 %v4706_v34  ;;  %v4793_v30 = vld [vmem:[#allocation18 + $0x1ac] ss:$16 sps:$4 sm:$0xff]   ;;  %v4791_v31 = vld [vmem:[#allocation18 + $0x1a8] ss:$16 sps:$4 sm:$0xff]   ;;  %v4796_v32 = vld [vmem:[#allocation18 + $0x1c4] ss:$16 sps:$4 sm:$0xff]  }
 0x108   :  { %757 = vmatpush1.bf16.msra.mxu1 %v4701_v35  ;;  %v4799_v33 = vld [vmem:[#allocation18 + $0x1cc] ss:$16 sps:$4 sm:$0xff]   ;;  %v4794_v34 = vld [vmem:[#allocation18 + $0x1c0] ss:$16 sps:$4 sm:$0xff]   ;;  %v4797_v35 = vld [vmem:[#allocation18 + $0x1c8] ss:$16 sps:$4 sm:$0xff]  }
 0x109   :  { %758 = vmatprep.subr.bf16.mxu1 %v4709_v37  ;;  %v4805_v37 = vld [vmem:[#allocation18 + $0x1ec] ss:$16 sps:$4 sm:$0xff]   ;;  %s5660_s12 = smov [#allocation24]  }
 0x10a   :  { %718 = vmatpush1.bf16.msra.mxu0 %v4704_v36  ;;  %v4802_v36 = vld [vmem:[#allocation18 + $0x1e4] ss:$16 sps:$4 sm:$0xff]   ;;  %s4039_s5 = sshll.u32 %s5660_s12, 4  ;;  %s4040_s5 = int_to_ptr.vmem [resolvable:$true] %s4039_s5 }
 0x10b   :  { %3189 = vmatprep.subr.bf16.mxu0 %v4712_v38  ;;  %v4800_v38 = vld [vmem:[#allocation18 + $0x1e0] ss:$16 sps:$4 sm:$0xff]   ;;  %s5604_s11 = scalar_lea.vmem %s4040_s5, 128  ;;  %p5609_p7 = scmp.lt.s32.totalorder %s4040_s5, %s4040_s5 }
 0x10c   :  { %759 = vmatpush1.bf16.msra.mxu1 %v4707_v39  ;;  %v4803_v39 = vld [vmem:[#allocation18 + $0x1e8] ss:$16 sps:$4 sm:$0xff]   ;;  %p5605_p6 = scmp.ne.s32.totalorder %s4040_s5, %s5604_s11  ;;  %p5610_p8 = scmp.lt.s32.totalorder %s5604_s11, %s5604_s11 }
 0x10d   :  { %4098 = vmatmul.mubr.msk.bf16.vlgmr.msra.gmra.mrb[8].mxu0 %vm707_vm2, %v588_v40  ;;  %3435 = vmatprep.subr.bf16.mxu1 %v4715_v42  ;;  %v217_v42 = vlaneseq }
 0x10e   :  { %3190 = vmatpush1.bf16.msra.mxu0 %v4710_v41  ;;  %v4811_v41 = vld [vmem:[#allocation18 + $0x20c] ss:$16 sps:$4 sm:$0xff]   ;;  %p5611_p9 = por %p5610_p8, %p5609_p7 }
 0x10f   :  { %3191 = vmatprep.subr.bf16.mxu0 %v4718_v43  ;;  %4099 = vmatmul.mubr.msk.bf16.vlgmr.msra.gmra.mrb[8].mxu1 %vm707_vm2, %v588_v40  ;;  %v4808_v40 = vld [vmem:[#allocation18 + $0x204] ss:$16 sps:$4 sm:$0xff]   ;;  %v218_v43 = vshrl.u32 %v217_v42, 7  ;;  %v5951_v42 = vld [vmem:[#allocation17] sm:$0xf] }
 0x110   :  { %3436 = vmatpush1.bf16.msra.mxu1 %v4713_v44  ;;  %p5612_p10 = pnand %p5611_p9, %p5605_p6 }
 0x111   :  { %3437 = vmatprep.subr.bf16.mxu1 %v4721_v46  ;;  %v5919_v44 = vsub.s32 0, %v218_v43  ;;  %v5923_v46 = vsub.s32 1, %v218_v43 }
 0x112   :  { %3192 = vmatpush1.bf16.msra.mxu0 %v4716_v45  ;;  %v5921_v45 = vld [vmem:[#allocation14] sm:$0xf] }
 0x113   :  { %3193 = vmatprep.subr.bf16.mxu0 %v4724_v47  ;;  %v5925_v47 = vsub.s32 3, %v218_v43 }
 0x114   :  { %3438 = vmatpush1.bf16.msra.mxu1 %v4719_v48  ;;  %v220_v48 = vrot.slane %v5921_v45, %v5919_v44 }
 0x115   :  { %3439 = vmatprep.subr.bf16.mxu1 %v4727_v50 }
 0x116   :  { %3194 = vmatpush1.bf16.msra.mxu0 %v4722_v49  ;;  %v224_v49 = vrot.slane %v5921_v45, %v5923_v46 }
 0x117   :  { %3195 = vmatprep.subr.bf16.mxu0 %v4730_v51 }
 0x118   :  { %3440 = vmatpush1.bf16.msra.mxu1 %v4725_v52 }
 0x119   :  { %3441 = vmatprep.subr.bf16.mxu1 %v4733_v54 }
 0x11a   :  { %3196 = vmatpush1.bf16.msra.mxu0 %v4728_v53  ;;  %v232_v53 = vrot.slane %v5921_v45, %v5925_v47 }
 0x11b   :  { %3197 = vmatprep.subr.bf16.mxu0 %v4736_v55 }
 0x11c   :  { %3442 = vmatpush1.bf16.msra.mxu1 %v4731_v56 }
 0x11d   :  { %3443 = vmatprep.subr.bf16.mxu1 %v4739_v58 }
 0x11e   :  { %3198 = vmatpush1.bf16.msra.mxu0 %v4734_v57 }
 0x11f   :  { %3199 = vmatprep.subr.bf16.mxu0 %v4742_v59 }
 0x120   :  { %3444 = vmatpush1.bf16.msra.mxu1 %v4737_v60  ;;  %v4806_v60 = vld [vmem:[#allocation18 + $0x200] ss:$16 sps:$4 sm:$0xff]  }
 0x121   :  { %3445 = vmatprep.subr.bf16.mxu1 %v4745_v62 }
 0x122   :  { %3200 = vmatpush1.bf16.msra.mxu0 %v4740_v61  ;;  %v4809_v61 = vld [vmem:[#allocation18 + $0x208] ss:$16 sps:$4 sm:$0xff]  }
 0x123   :  { %3201 = vmatprep.subr.bf16.mxu0 %v4748_v63 }
 0x124   :  { %3446 = vmatpush1.bf16.msra.mxu1 %v4743_v0 }
 0x125   :  { %3447 = vmatprep.subr.bf16.mxu1 %v4751_v2 }
 0x126   :  { %3202 = vmatpush1.bf16.msra.mxu0 %v4746_v1 }
 0x127   :  { %3203 = vmatprep.subr.bf16.mxu0 %v4754_v4  ;;  %v4814_v4 = vld [vmem:[#allocation18 + $0x224] ss:$16 sps:$4 sm:$0xff]  }
 0x128   :  { %3448 = vmatpush1.bf16.msra.mxu1 %v4749_v3 }
 0x129   :  { %3449 = vmatprep.subr.bf16.mxu1 %v4757_v6 }
 0x12a   :  { %3204 = vmatpush1.bf16.msra.mxu0 %v4752_v5  ;;  %v4817_v5 = vld [vmem:[#allocation18 + $0x22c] ss:$16 sps:$4 sm:$0xff]  }
 0x12b   :  { %3205 = vmatprep.subr.bf16.mxu0 %v4760_v7  ;;  %v4812_v7 = vld [vmem:[#allocation18 + $0x220] ss:$16 sps:$4 sm:$0xff]  }
 0x12c   :  { %3450 = vmatpush1.bf16.msra.mxu1 %v4755_v8  ;;  %v4815_v8 = vld [vmem:[#allocation18 + $0x228] ss:$16 sps:$4 sm:$0xff]  }
 0x12d   :  { %3451 = vmatprep.subr.bf16.mxu1 %v4763_v10  ;;  %v4820_v10 = vld [vmem:[#allocation18 + $0x244] ss:$16 sps:$4 sm:$0xff]  }
 0x12e   :  { %3206 = vmatpush1.bf16.msra.mxu0 %v4758_v9 }
 0x12f   :  { %3207 = vmatprep.subr.bf16.mxu0 %v4766_v11  ;;  %v5935_v11 = vsub.s32 2, %v218_v43 }
 0x130   :  { %3452 = vmatpush1.bf16.msra.mxu1 %v4761_v12  ;;  %v4823_v12 = vld [vmem:[#allocation18 + $0x24c] ss:$16 sps:$4 sm:$0xff]  }
 0x131   :  { %3453 = vmatprep.subr.bf16.mxu1 %v4769_v14 }
 0x132   :  { %3208 = vmatpush1.bf16.msra.mxu0 %v4764_v13  ;;  %v5937_v13 = vld [vmem:[#allocation15] sm:$0xf] }
 0x133   :  { %3209 = vmatprep.subr.bf16.mxu0 %v4772_v15  ;;  %v411_v15 = vrot.slane %v5937_v13, %v5935_v11 }
 0x134   :  { %3454 = vmatpush1.bf16.msra.mxu1 %v4767_v16 }
 0x135   :  { %3455 = vmatprep.subr.bf16.mxu1 %v4775_v18  ;;  %v4818_v18 = vld [vmem:[#allocation18 + $0x240] ss:$16 sps:$4 sm:$0xff]  }
 0x136   :  { %3210 = vmatpush1.bf16.msra.mxu0 %v4770_v17  ;;  %v415_v17 = vrot.slane %v5937_v13, %v5925_v47 }
 0x137   :  { %3211 = vmatprep.subr.bf16.mxu0 %v4778_v19  ;;  %v4821_v19 = vld [vmem:[#allocation18 + $0x248] ss:$16 sps:$4 sm:$0xff]  }
 0x138   :  { %3456 = vmatpush1.bf16.msra.mxu1 %v4773_v20 }
 0x139   :  { %3457 = vmatprep.subr.bf16.mxu1 %v4781_v22  ;;  %v4829_v22 = vld [vmem:[#allocation18 + $0x26c] ss:$16 sps:$4 sm:$0xff]  }
 0x13a   :  { %3212 = vmatpush1.bf16.msra.mxu0 %v4776_v21  ;;  %v4826_v21 = vld [vmem:[#allocation18 + $0x264] ss:$16 sps:$4 sm:$0xff]  }
 0x13b   :  { %3213 = vmatprep.subr.bf16.mxu0 %v4784_v23 }
 0x13c   :  { %3458 = vmatpush1.bf16.msra.mxu1 %v4779_v24 }
 0x13d   :  { %3459 = vmatprep.subr.bf16.mxu1 %v4787_v26 }
 0x13e   :  { %3214 = vmatpush1.bf16.msra.mxu0 %v4782_v25 }
 0x13f   :  { %3215 = vmatprep.subr.bf16.mxu0 %v4790_v27 }
 0x140   :  { %3460 = vmatpush1.bf16.msra.mxu1 %v4785_v28 }
 0x141   :  { %3461 = vmatprep.subr.bf16.mxu1 %v4793_v30  ;;  %v4827_v30 = vld [vmem:[#allocation18 + $0x268] ss:$16 sps:$4 sm:$0xff]  }
 0x142   :  { %3216 = vmatpush1.bf16.msra.mxu0 %v4788_v29  ;;  %v4824_v29 = vld [vmem:[#allocation18 + $0x260] ss:$16 sps:$4 sm:$0xff]  }
 0x143   :  { %3217 = vmatprep.subr.bf16.mxu0 %v4796_v32  ;;  %v4832_v32 = vld [vmem:[#allocation18 + $0x284] ss:$16 sps:$4 sm:$0xff]  }
 0x144   :  { %3462 = vmatpush1.bf16.msra.mxu1 %v4791_v31 }
 0x145   :  { %3463 = vmatprep.subr.bf16.mxu1 %v4799_v33  ;;  %v4835_v33 = vld [vmem:[#allocation18 + $0x28c] ss:$16 sps:$4 sm:$0xff]  }
 0x146   :  { %3218 = vmatpush1.bf16.msra.mxu0 %v4794_v34  ;;  %v4830_v34 = vld [vmem:[#allocation18 + $0x280] ss:$16 sps:$4 sm:$0xff]  }
 0x147   :  { %3219 = vmatprep.subr.bf16.mxu0 %v4802_v36  ;;  %v4838_v36 = vld [vmem:[#allocation18 + $0x2a4] ss:$16 sps:$4 sm:$0xff]  }
 0x148   :  { %3464 = vmatpush1.bf16.msra.mxu1 %v4797_v35  ;;  %v4833_v35 = vld [vmem:[#allocation18 + $0x288] ss:$16 sps:$4 sm:$0xff]  }
 0x149   :  { %3465 = vmatprep.subr.bf16.mxu1 %v4805_v37  ;;  %v4841_v37 = vld [vmem:[#allocation18 + $0x2ac] ss:$16 sps:$4 sm:$0xff]  }
 0x14a   :  { %3220 = vmatpush1.bf16.msra.mxu0 %v4800_v38  ;;  %v4836_v38 = vld [vmem:[#allocation18 + $0x2a0] ss:$16 sps:$4 sm:$0xff]  }
 0x14b   :  { %3230 = vmatprep.subr.bf16.mxu0 %v4808_v40  ;;  %v4844_v40 = vld [vmem:[#allocation18 + $0x2c4] ss:$16 sps:$4 sm:$0xff]  }
 0x14c   :  { %3466 = vmatpush1.bf16.msra.mxu1 %v4803_v39  ;;  %v4839_v39 = vld [vmem:[#allocation18 + $0x2a8] ss:$16 sps:$4 sm:$0xff]  }
 0x14d   :  { %3476 = vmatprep.subr.bf16.mxu1 %v4811_v41  ;;  %v4847_v41 = vld [vmem:[#allocation18 + $0x2cc] ss:$16 sps:$4 sm:$0xff]  }
 0x1c4   :  { %v315_v50 = vpop.f32.mrb[0].mxu0  ;;  %v5933_v58 = vpop.f32.mrb[0].mxu1 }
 0x1c5   :  { %v316_v51 = vadd.f32 %v315_v50, %v220_v48  ;;  %v317_v52 = vpop.f32.mrb[1].mxu0  ;;  %v358_v62 = vpop.f32.mrb[1].mxu1  ;;  %v618_v48 = vrot.slane %v5951_v42, %v5935_v11  ;;  %v622_v50 = vrot.slane %v5951_v42, %v5925_v47 }
 0x1c6   :  { %v318_v54 = vadd.f32 %v317_v52, %v224_v49  ;;  %v319_v55 = vpop.f32.mrb[2].mxu0  ;;  %v359_v63 = vadd.f32 %v358_v62, %v232_v53  ;;  %v360_v0 = vpop.f32.mrb[2].mxu1  ;;  %v4845_v52 = vld [vmem:[#allocation18 + $0x2c8] ss:$16 sps:$4 sm:$0xff]  }
 0x1c7   :  { %v363_v56 = vmax.f32 %v316_v51, 0.0  ;;  %v320_v57 = vpop.f32.mrb[3].mxu0  ;;  %v361_v2 = vpop.f32.mrb[3].mxu1  ;;  %v4842_v51 = vld [vmem:[#allocation18 + $0x2c0] ss:$16 sps:$4 sm:$0xff]  }
 0x1c8   :  { %v364_v59 = vmax.f32 %v318_v54, 0.0  ;;  %v366_v6 = vmax.f32 %v359_v63, 0.0  ;;  %v4850_v54 = vld [vmem:[#allocation18 + $0x2e4] ss:$16 sps:$4 sm:$0xff]   ;;  %v4853_v55 = vld [vmem:[#allocation18 + $0x2ec] ss:$16 sps:$4 sm:$0xff]  }
 0x1c9   :  { %v4537_v3 = vpack.c.bf16 %v363_v56, %v363_v56  ;;  %v4848_v63 = vld [vmem:[#allocation18 + $0x2e0] ss:$16 sps:$4 sm:$0xff]   ;;  %v4851_v0 = vld [vmem:[#allocation18 + $0x2e8] ss:$16 sps:$4 sm:$0xff]   ;;  %v4856_v2 = vld [vmem:[#allocation18 + $0x304] ss:$16 sps:$4 sm:$0xff]  }
 0x1ca   :  { %v4538_v1 = vpack.c.bf16 %v364_v59, %v364_v59  ;;  %v4540_v9 = vpack.c.bf16 %v366_v6, %v366_v6  ;;  %v4862_v6 = vld [vmem:[#allocation18 + $0x324] ss:$16 sps:$4 sm:$0xff]  }
 0x1cc   :  { %3221 = vmatprep.mubr.bf16.mxu0 %v4538_v1  ;;  %3467 = vmatprep.mubr.bf16.mxu1 %v4538_v1 }
 0x1cd   :  { %3222 = vmatmul.mubr.bf16.vlgmr.msra.gmra.mrb[12].mxu0 %v4537_v3  ;;  %3468 = vmatmul.mubr.bf16.vlgmr.msra.gmra.mrb[12].mxu1 %v4537_v3  ;;  %v4859_v3 = vld [vmem:[#allocation18 + $0x30c] ss:$16 sps:$4 sm:$0xff]  }
 0x1ce   :  { %3231 = vmatpush1.bf16.msra.mxu0 %v4806_v60  ;;  %3477 = vmatpush1.bf16.msra.mxu1 %v4809_v61 }
 0x1cf   :  { %3232 = vmatprep.subr.bf16.mxu0 %v4814_v4  ;;  %3478 = vmatprep.subr.bf16.mxu1 %v4817_v5  ;;  %v4854_v4 = vld [vmem:[#allocation18 + $0x300] ss:$16 sps:$4 sm:$0xff]   ;;  %v4857_v5 = vld [vmem:[#allocation18 + $0x308] ss:$16 sps:$4 sm:$0xff]  }
 0x1d0   :  { %3262 = vmatprep.mubr.bf16.mxu0 %v4540_v9  ;;  %3508 = vmatprep.mubr.bf16.mxu1 %v4540_v9  ;;  %v5939_v14 = vpop.f32.mrb[4].mxu0  ;;  %v4863_v9 = vld [vmem:[#allocation18 + $0x328] ss:$16 sps:$4 sm:$0xff]  }
 0x1d1   :  { %v5943_v16 = vpop.f32.mrb[5].mxu0 }
 0x1d2   :  { %3233 = vmatpush1.bf16.msra.mxu0 %v4812_v7  ;;  %3479 = vmatpush1.bf16.msra.mxu1 %v4815_v8  ;;  %v522_v20 = vpop.f32.mrb[6].mxu0  ;;  %v559_v24 = vpop.f32.mrb[4].mxu1  ;;  %v4865_v7 = vld [vmem:[#allocation18 + $0x32c] ss:$16 sps:$4 sm:$0xff]   ;;  %v4860_v8 = vld [vmem:[#allocation18 + $0x320] ss:$16 sps:$4 sm:$0xff]  }
 0x1d3   :  { %3234 = vmatprep.subr.bf16.mxu0 %v4820_v10  ;;  %3480 = vmatprep.subr.bf16.mxu1 %v4823_v12  ;;  %v523_v23 = vpop.f32.mrb[7].mxu0  ;;  %v5947_v25 = vadd.f32 %v559_v24, %v411_v15  ;;  %v561_v26 = vpop.f32.mrb[5].mxu1  ;;  %v4868_v10 = vld [vmem:[#allocation18 + $0x344] ss:$16 sps:$4 sm:$0xff]   ;;  %v4871_v12 = vld [vmem:[#allocation18 + $0x34c] ss:$16 sps:$4 sm:$0xff]  }
 0x1d4   :  { %v5949_v27 = vadd.f32 %v561_v26, %v415_v17  ;;  %v563_v28 = vpop.f32.mrb[6].mxu1  ;;  %v4866_v15 = vld [vmem:[#allocation18 + $0x340] ss:$16 sps:$4 sm:$0xff]   ;;  %v4869_v17 = vld [vmem:[#allocation18 + $0x348] ss:$16 sps:$4 sm:$0xff]  }
 0x1d5   :  { %v564_v31 = vpop.f32.mrb[7].mxu1  ;;  %v4872_v20 = vld [vmem:[#allocation18 + $0x360] ss:$16 sps:$4 sm:$0xff]   ;;  %v4883_v23 = vld [vmem:[#allocation18 + $0x38c] ss:$16 sps:$4 sm:$0xff]  }
 0x1d6   :  { %3235 = vmatpush1.bf16.msra.mxu0 %v4818_v18  ;;  %3481 = vmatpush1.bf16.msra.mxu1 %v4821_v19  ;;  %v4874_v18 = vld [vmem:[#allocation18 + $0x364] ss:$16 sps:$4 sm:$0xff]   ;;  %v4877_v19 = vld [vmem:[#allocation18 + $0x36c] ss:$16 sps:$4 sm:$0xff]   ;;  %v4878_v24 = vld [vmem:[#allocation18 + $0x380] ss:$16 sps:$4 sm:$0xff]  }
 0x1d7   :  { %3236 = vmatprep.subr.bf16.mxu0 %v4826_v21  ;;  %3482 = vmatprep.subr.bf16.mxu1 %v4829_v22  ;;  %v4875_v21 = vld [vmem:[#allocation18 + $0x368] ss:$16 sps:$4 sm:$0xff]   ;;  %v4880_v22 = vld [vmem:[#allocation18 + $0x384] ss:$16 sps:$4 sm:$0xff]   ;;  %v4884_v31 = vld [vmem:[#allocation18 + $0x3a0] ss:$16 sps:$4 sm:$0xff]  }
 0x1d8   :  { %v4881_v26 = vld [vmem:[#allocation18 + $0x388] ss:$16 sps:$4 sm:$0xff]   ;;  %v4886_v28 = vld [vmem:[#allocation18 + $0x3a4] ss:$16 sps:$4 sm:$0xff]  }
 0x1da   :  { %3237 = vmatpush1.bf16.msra.mxu0 %v4824_v29  ;;  %3483 = vmatpush1.bf16.msra.mxu1 %v4827_v30  ;;  %v4889_v29 = vld [vmem:[#allocation18 + $0x3ac] ss:$16 sps:$4 sm:$0xff]   ;;  %v228_v30 = vrot.slane %v5921_v45, %v5935_v11  ;;  %v4898_v45 = vld [vmem:[#allocation18 + $0x3e4] ss:$16 sps:$4 sm:$0xff]  }
 0x1db   :  { %3238 = vmatprep.subr.bf16.mxu0 %v4832_v32  ;;  %3484 = vmatprep.subr.bf16.mxu1 %v4835_v33  ;;  %v4887_v32 = vld [vmem:[#allocation18 + $0x3a8] ss:$16 sps:$4 sm:$0xff]   ;;  %v4892_v33 = vld [vmem:[#allocation18 + $0x3c4] ss:$16 sps:$4 sm:$0xff]  }
 0x1de   :  { %3239 = vmatpush1.bf16.msra.mxu0 %v4830_v34  ;;  %3485 = vmatpush1.bf16.msra.mxu1 %v4833_v35  ;;  %v4895_v34 = vld [vmem:[#allocation18 + $0x3cc] ss:$16 sps:$4 sm:$0xff]   ;;  %v407_v35 = vrot.slane %v5937_v13, %v5923_v46 }
 0x1df   :  { %3240 = vmatprep.subr.bf16.mxu0 %v4838_v36  ;;  %3486 = vmatprep.subr.bf16.mxu1 %v4841_v37  ;;  %v357_v36 = vadd.f32 %v5933_v58, %v228_v30  ;;  %v4890_v37 = vld [vmem:[#allocation18 + $0x3c0] ss:$16 sps:$4 sm:$0xff]   ;;  %v4955_v30 = vld [vmem:[#allocation18 + $0x50c] ss:$16 sps:$4 sm:$0xff]  }
 0x1e0   :  { %v5953_v43 = vpop.f32.mrb[8].mxu0 }
 0x1e1   :  { %v5957_v49 = vpop.f32.mrb[9].mxu0 }
 0x1e2   :  { %3241 = vmatpush1.bf16.msra.mxu0 %v4836_v38  ;;  %3487 = vmatpush1.bf16.msra.mxu1 %v4839_v39  ;;  %v749_v53 = vpop.f32.mrb[10].mxu0  ;;  %v786_v56 = vpop.f32.mrb[8].mxu1  ;;  %v4893_v38 = vld [vmem:[#allocation18 + $0x3c8] ss:$16 sps:$4 sm:$0xff]   ;;  %v4901_v39 = vld [vmem:[#allocation18 + $0x3ec] ss:$16 sps:$4 sm:$0xff]  }
 0x1e3   :  { %3242 = vmatprep.subr.bf16.mxu0 %v4844_v40  ;;  %3488 = vmatprep.subr.bf16.mxu1 %v4847_v41  ;;  %v750_v57 = vpop.f32.mrb[11].mxu0  ;;  %v5961_v59 = vadd.f32 %v786_v56, %v618_v48  ;;  %v788_v60 = vpop.f32.mrb[9].mxu1  ;;  %v521_v40 = vadd.f32 %v5943_v16, %v407_v35  ;;  %v365_v41 = vmax.f32 %v357_v36, 0.0  ;;  %v4896_v48 = vld [vmem:[#allocation18 + $0x3e0] ss:$16 sps:$4 sm:$0xff]  }
 0x1e4   :  { %v5963_v61 = vadd.f32 %v788_v60, %v622_v50  ;;  %v790_v62 = vpop.f32.mrb[10].mxu1  ;;  %v4899_v50 = vld [vmem:[#allocation18 + $0x3e8] ss:$16 sps:$4 sm:$0xff]   ;;  %v4910_v56 = vld [vmem:[#allocation18 + $0x424] ss:$16 sps:$4 sm:$0xff]  }
 0x1e5   :  { %v791_v1 = vpop.f32.mrb[11].mxu1  ;;  %v567_v58 = vmax.f32 %v521_v40, 0.0  ;;  %v4539_v53 = vpack.c.bf16 %v365_v41, %v365_v41  ;;  %v4913_v57 = vld [vmem:[#allocation18 + $0x42c] ss:$16 sps:$4 sm:$0xff]   ;;  %v4908_v60 = vld [vmem:[#allocation18 + $0x420] ss:$16 sps:$4 sm:$0xff]  }
 0x1e6   :  { %3243 = vmatpush1.bf16.msra.mxu0 %v4842_v51  ;;  %3489 = vmatpush1.bf16.msra.mxu1 %v4845_v52  ;;  %v4904_v51 = vld [vmem:[#allocation18 + $0x404] ss:$16 sps:$4 sm:$0xff]   ;;  %v4907_v52 = vld [vmem:[#allocation18 + $0x40c] ss:$16 sps:$4 sm:$0xff]   ;;  %v4911_v62 = vld [vmem:[#allocation18 + $0x428] ss:$16 sps:$4 sm:$0xff]  }
 0x1e7   :  { %3244 = vmatprep.subr.bf16.mxu0 %v4850_v54  ;;  %3490 = vmatprep.subr.bf16.mxu1 %v4853_v55  ;;  %v4902_v54 = vld [vmem:[#allocation18 + $0x400] ss:$16 sps:$4 sm:$0xff]   ;;  %v4905_v55 = vld [vmem:[#allocation18 + $0x408] ss:$16 sps:$4 sm:$0xff]   ;;  %v4542_v16 = vpack.c.bf16 %v567_v58, %v567_v58  ;;  %v4970_v40 = vld [vmem:[#allocation18 + $0x564] ss:$16 sps:$4 sm:$0xff]  }
 0x1e8   :  { %v4914_v1 = vld [vmem:[#allocation18 + $0x440] ss:$16 sps:$4 sm:$0xff]   ;;  %v4959_v36 = vld [vmem:[#allocation18 + $0x528] ss:$16 sps:$4 sm:$0xff]   ;;  %v4973_v41 = vld [vmem:[#allocation18 + $0x56c] ss:$16 sps:$4 sm:$0xff]  }
 0x1e9   :  { %v4956_v35 = vld [vmem:[#allocation18 + $0x520] ss:$16 sps:$4 sm:$0xff]  }
 0x1ea   :  { %3245 = vmatpush1.bf16.msra.mxu0 %v4848_v63  ;;  %3491 = vmatpush1.bf16.msra.mxu1 %v4851_v0  ;;  %v4916_v63 = vld [vmem:[#allocation18 + $0x444] ss:$16 sps:$4 sm:$0xff]   ;;  %v4919_v0 = vld [vmem:[#allocation18 + $0x44c] ss:$16 sps:$4 sm:$0xff]   ;;  %v4974_v58 = vld [vmem:[#allocation18 + $0x580] ss:$16 sps:$4 sm:$0xff]  }
 0x1eb   :  { %3246 = vmatprep.subr.bf16.mxu0 %v4856_v2  ;;  %3492 = vmatprep.subr.bf16.mxu1 %v4859_v3  ;;  %v4917_v2 = vld [vmem:[#allocation18 + $0x448] ss:$16 sps:$4 sm:$0xff]   ;;  %v4922_v3 = vld [vmem:[#allocation18 + $0x464] ss:$16 sps:$4 sm:$0xff]  }
 0x1ee   :  { %3247 = vmatpush1.bf16.msra.mxu0 %v4854_v4  ;;  %3493 = vmatpush1.bf16.msra.mxu1 %v4857_v5  ;;  %v4925_v4 = vld [vmem:[#allocation18 + $0x46c] ss:$16 sps:$4 sm:$0xff]   ;;  %v4920_v5 = vld [vmem:[#allocation18 + $0x460] ss:$16 sps:$4 sm:$0xff]  }
 0x1ef   :  { %3248 = vmatprep.subr.bf16.mxu0 %v4862_v6  ;;  %3494 = vmatprep.subr.bf16.mxu1 %v4865_v7  ;;  %v4923_v6 = vld [vmem:[#allocation18 + $0x468] ss:$16 sps:$4 sm:$0xff]   ;;  %v4928_v7 = vld [vmem:[#allocation18 + $0x484] ss:$16 sps:$4 sm:$0xff]  }
 0x1f2   :  { %3249 = vmatpush1.bf16.msra.mxu0 %v4860_v8  ;;  %3495 = vmatpush1.bf16.msra.mxu1 %v4863_v9  ;;  %v4931_v8 = vld [vmem:[#allocation18 + $0x48c] ss:$16 sps:$4 sm:$0xff]   ;;  %v4926_v9 = vld [vmem:[#allocation18 + $0x480] ss:$16 sps:$4 sm:$0xff]  }
 0x1f3   :  { %3250 = vmatprep.subr.bf16.mxu0 %v4868_v10  ;;  %3496 = vmatprep.subr.bf16.mxu1 %v4871_v12  ;;  %v4929_v10 = vld [vmem:[#allocation18 + $0x488] ss:$16 sps:$4 sm:$0xff]   ;;  %v4934_v12 = vld [vmem:[#allocation18 + $0x4a4] ss:$16 sps:$4 sm:$0xff]  }
 0x1f6   :  { %3251 = vmatpush1.bf16.msra.mxu0 %v4866_v15  ;;  %3497 = vmatpush1.bf16.msra.mxu1 %v4869_v17  ;;  %v4937_v15 = vld [vmem:[#allocation18 + $0x4ac] ss:$16 sps:$4 sm:$0xff]   ;;  %v4932_v17 = vld [vmem:[#allocation18 + $0x4a0] ss:$16 sps:$4 sm:$0xff]  }
 0x1f7   :  { %3252 = vmatprep.subr.bf16.mxu0 %v4874_v18  ;;  %3498 = vmatprep.subr.bf16.mxu1 %v4877_v19  ;;  %v4935_v18 = vld [vmem:[#allocation18 + $0x4a8] ss:$16 sps:$4 sm:$0xff]   ;;  %v4940_v19 = vld [vmem:[#allocation18 + $0x4c4] ss:$16 sps:$4 sm:$0xff]  }
 0x1fa   :  { %3253 = vmatpush1.bf16.msra.mxu0 %v4872_v20  ;;  %3499 = vmatpush1.bf16.msra.mxu1 %v4875_v21  ;;  %v4943_v20 = vld [vmem:[#allocation18 + $0x4cc] ss:$16 sps:$4 sm:$0xff]   ;;  %v4938_v21 = vld [vmem:[#allocation18 + $0x4c0] ss:$16 sps:$4 sm:$0xff]  }
 0x1fb   :  { %3254 = vmatprep.subr.bf16.mxu0 %v4880_v22  ;;  %3500 = vmatprep.subr.bf16.mxu1 %v4883_v23  ;;  %v4941_v22 = vld [vmem:[#allocation18 + $0x4c8] ss:$16 sps:$4 sm:$0xff]   ;;  %v4946_v23 = vld [vmem:[#allocation18 + $0x4e4] ss:$16 sps:$4 sm:$0xff]  }
 0x1fe   :  { %3255 = vmatpush1.bf16.msra.mxu0 %v4878_v24  ;;  %3501 = vmatpush1.bf16.msra.mxu1 %v4881_v26  ;;  %v4949_v24 = vld [vmem:[#allocation18 + $0x4ec] ss:$16 sps:$4 sm:$0xff]   ;;  %v4944_v26 = vld [vmem:[#allocation18 + $0x4e0] ss:$16 sps:$4 sm:$0xff]  }
 0x1ff   :  { %3256 = vmatprep.subr.bf16.mxu0 %v4886_v28  ;;  %3502 = vmatprep.subr.bf16.mxu1 %v4889_v29  ;;  %v4947_v28 = vld [vmem:[#allocation18 + $0x4e8] ss:$16 sps:$4 sm:$0xff]   ;;  %v4952_v29 = vld [vmem:[#allocation18 + $0x504] ss:$16 sps:$4 sm:$0xff]  }
 0x202   :  { %3257 = vmatpush1.bf16.msra.mxu0 %v4884_v31  ;;  %3503 = vmatpush1.bf16.msra.mxu1 %v4887_v32  ;;  %v4950_v31 = vld [vmem:[#allocation18 + $0x500] ss:$16 sps:$4 sm:$0xff]   ;;  %v4953_v32 = vld [vmem:[#allocation18 + $0x508] ss:$16 sps:$4 sm:$0xff]  }
 0x203   :  { %3258 = vmatprep.subr.bf16.mxu0 %v4892_v33  ;;  %3504 = vmatprep.subr.bf16.mxu1 %v4895_v34  ;;  %v4958_v33 = vld [vmem:[#allocation18 + $0x524] ss:$16 sps:$4 sm:$0xff]   ;;  %v4961_v34 = vld [vmem:[#allocation18 + $0x52c] ss:$16 sps:$4 sm:$0xff]  }
 0x206   :  { %3259 = vmatpush1.bf16.msra.mxu0 %v4890_v37  ;;  %3505 = vmatpush1.bf16.msra.mxu1 %v4893_v38  ;;  %v4964_v37 = vld [vmem:[#allocation18 + $0x544] ss:$16 sps:$4 sm:$0xff]   ;;  %v4967_v38 = vld [vmem:[#allocation18 + $0x54c] ss:$16 sps:$4 sm:$0xff]  }
 0x207   :  { %3260 = vmatprep.subr.bf16.mxu0 %v4898_v45  ;;  %3506 = vmatprep.subr.bf16.mxu1 %v4901_v39  ;;  %v4962_v45 = vld [vmem:[#allocation18 + $0x540] ss:$16 sps:$4 sm:$0xff]   ;;  %v4965_v39 = vld [vmem:[#allocation18 + $0x548] ss:$16 sps:$4 sm:$0xff]  }
 0x20a   :  { %3261 = vmatpush1.bf16.msra.mxu0 %v4896_v48  ;;  %3507 = vmatpush1.bf16.msra.mxu1 %v4899_v50  ;;  %v4968_v48 = vld [vmem:[#allocation18 + $0x560] ss:$16 sps:$4 sm:$0xff]   ;;  %v4971_v50 = vld [vmem:[#allocation18 + $0x568] ss:$16 sps:$4 sm:$0xff]  }
 0x20b   :  { %3271 = vmatprep.subr.bf16.mxu0 %v4904_v51  ;;  %3517 = vmatprep.subr.bf16.mxu1 %v4907_v52  ;;  %v4976_v51 = vld [vmem:[#allocation18 + $0x584] ss:$16 sps:$4 sm:$0xff]   ;;  %v4979_v52 = vld [vmem:[#allocation18 + $0x58c] ss:$16 sps:$4 sm:$0xff]  }
 0x20d   :  { %3263 = vmatmul.mubr.bf16.vlgmr.msra.gmra.mrb[12].mxu0 %v4539_v53  ;;  %3509 = vmatmul.mubr.bf16.vlgmr.msra.gmra.mrb[12].mxu1 %v4539_v53  ;;  %v4977_v53 = vld [vmem:[#allocation18 + $0x588] ss:$16 sps:$4 sm:$0xff]  }
 0x20e   :  { %3272 = vmatpush1.bf16.msra.mxu0 %v4902_v54  ;;  %3518 = vmatpush1.bf16.msra.mxu1 %v4905_v55  ;;  %v4982_v54 = vld [vmem:[#allocation18 + $0x5a4] ss:$16 sps:$4 sm:$0xff]   ;;  %v4985_v55 = vld [vmem:[#allocation18 + $0x5ac] ss:$16 sps:$4 sm:$0xff]  }
 0x20f   :  { %3273 = vmatprep.subr.bf16.mxu0 %v4910_v56  ;;  %3519 = vmatprep.subr.bf16.mxu1 %v4913_v57  ;;  %v403_v56 = vrot.slane %v5937_v13, %v5919_v44  ;;  %v4980_v57 = vld [vmem:[#allocation18 + $0x5a0] ss:$16 sps:$4 sm:$0xff]  }
 0x210   :  { %3303 = vmatprep.mubr.bf16.mxu0 %v4542_v16  ;;  %3549 = vmatprep.mubr.bf16.mxu1 %v4542_v16  ;;  %v4983_v16 = vld [vmem:[#allocation18 + $0x5a8] ss:$16 sps:$4 sm:$0xff]   ;;  %v4992_v13 = vld [vmem:[#allocation18 + $0x5e0] ss:$16 sps:$4 sm:$0xff]  }
 0x212   :  { %3274 = vmatpush1.bf16.msra.mxu0 %v4908_v60  ;;  %3520 = vmatpush1.bf16.msra.mxu1 %v4911_v62  ;;  %v4988_v60 = vld [vmem:[#allocation18 + $0x5c4] ss:$16 sps:$4 sm:$0xff]   ;;  %v4991_v62 = vld [vmem:[#allocation18 + $0x5cc] ss:$16 sps:$4 sm:$0xff]  }
 0x213   :  { %3275 = vmatprep.subr.bf16.mxu0 %v4916_v63  ;;  %3521 = vmatprep.subr.bf16.mxu1 %v4919_v0  ;;  %v519_v63 = vadd.f32 %v5939_v14, %v403_v56  ;;  %v4986_v0 = vld [vmem:[#allocation18 + $0x5c0] ss:$16 sps:$4 sm:$0xff]  }
 0x214   :  { %v5052_v56 = vld [vmem:[#allocation18 + $0x720] ss:$16 sps:$4 sm:$0xff]  }
 0x216   :  { %3276 = vmatpush1.bf16.msra.mxu0 %v4914_v1  ;;  %3522 = vmatpush1.bf16.msra.mxu1 %v4917_v2  ;;  %v4989_v1 = vld [vmem:[#allocation18 + $0x5c8] ss:$16 sps:$4 sm:$0xff]   ;;  %v4994_v2 = vld [vmem:[#allocation18 + $0x5e4] ss:$16 sps:$4 sm:$0xff]  }
 0x217   :  { %3277 = vmatprep.subr.bf16.mxu0 %v4922_v3  ;;  %3523 = vmatprep.subr.bf16.mxu1 %v4925_v4  ;;  %v4997_v3 = vld [vmem:[#allocation18 + $0x5ec] ss:$16 sps:$4 sm:$0xff]   ;;  %v566_v4 = vmax.f32 %v519_v63, 0.0  ;;  %v5061_v63 = vld [vmem:[#allocation18 + $0x748] ss:$16 sps:$4 sm:$0xff]  }
 0x219   :  { %v4541_v14 = vpack.c.bf16 %v566_v4, %v566_v4  ;;  %v5072_v4 = vld [vmem:[#allocation18 + $0x784] ss:$16 sps:$4 sm:$0xff]  }
 0x21a   :  { %3278 = vmatpush1.bf16.msra.mxu0 %v4920_v5  ;;  %3524 = vmatpush1.bf16.msra.mxu1 %v4923_v6  ;;  %v4995_v5 = vld [vmem:[#allocation18 + $0x5e8] ss:$16 sps:$4 sm:$0xff]   ;;  %v5000_v6 = vld [vmem:[#allocation18 + $0x604] ss:$16 sps:$4 sm:$0xff]  }
 0x21b   :  { %3279 = vmatprep.subr.bf16.mxu0 %v4928_v7  ;;  %3525 = vmatprep.subr.bf16.mxu1 %v4931_v8  ;;  %v5003_v7 = vld [vmem:[#allocation18 + $0x60c] ss:$16 sps:$4 sm:$0xff]   ;;  %v569_v8 = vmax.f32 %v5949_v27, 0.0 }
 0x21c   :  { %v5015_v27 = vld [vmem:[#allocation18 + $0x64c] ss:$16 sps:$4 sm:$0xff]  }
 0x21e   :  { %3280 = vmatpush1.bf16.msra.mxu0 %v4926_v9  ;;  %3526 = vmatpush1.bf16.msra.mxu1 %v4929_v10  ;;  %v4998_v9 = vld [vmem:[#allocation18 + $0x600] ss:$16 sps:$4 sm:$0xff]   ;;  %v5001_v10 = vld [vmem:[#allocation18 + $0x608] ss:$16 sps:$4 sm:$0xff]  }
 0x21f   :  { %3281 = vmatprep.subr.bf16.mxu0 %v4934_v12  ;;  %3527 = vmatprep.subr.bf16.mxu1 %v4937_v15  ;;  %v5006_v12 = vld [vmem:[#allocation18 + $0x624] ss:$16 sps:$4 sm:$0xff]   ;;  %v5009_v15 = vld [vmem:[#allocation18 + $0x62c] ss:$16 sps:$4 sm:$0xff]  }
 0x222   :  { %3282 = vmatpush1.bf16.msra.mxu0 %v4932_v17  ;;  %3528 = vmatpush1.bf16.msra.mxu1 %v4935_v18  ;;  %v4544_v17 = vpack.c.bf16 %v569_v8, %v569_v8  ;;  %v5004_v18 = vld [vmem:[#allocation18 + $0x620] ss:$16 sps:$4 sm:$0xff]   ;;  %v5081_v8 = vld [vmem:[#allocation18 + $0x7ac] ss:$16 sps:$4 sm:$0xff]  }
 0x223   :  { %3283 = vmatprep.subr.bf16.mxu0 %v4940_v19  ;;  %3529 = vmatprep.subr.bf16.mxu1 %v4943_v20  ;;  %v5007_v19 = vld [vmem:[#allocation18 + $0x628] ss:$16 sps:$4 sm:$0xff]   ;;  %v5012_v20 = vld [vmem:[#allocation18 + $0x644] ss:$16 sps:$4 sm:$0xff]  }
 0x226   :  { %3284 = vmatpush1.bf16.msra.mxu0 %v4938_v21  ;;  %3530 = vmatpush1.bf16.msra.mxu1 %v4941_v22  ;;  %v5010_v21 = vld [vmem:[#allocation18 + $0x640] ss:$16 sps:$4 sm:$0xff]   ;;  %v5013_v22 = vld [vmem:[#allocation18 + $0x648] ss:$16 sps:$4 sm:$0xff]  }
 0x227   :  { %3285 = vmatprep.subr.bf16.mxu0 %v4946_v23  ;;  %3531 = vmatprep.subr.bf16.mxu1 %v4949_v24  ;;  %v5018_v23 = vld [vmem:[#allocation18 + $0x664] ss:$16 sps:$4 sm:$0xff]   ;;  %v5021_v24 = vld [vmem:[#allocation18 + $0x66c] ss:$16 sps:$4 sm:$0xff]  }
 0x22a   :  { %3286 = vmatpush1.bf16.msra.mxu0 %v4944_v26  ;;  %3532 = vmatpush1.bf16.msra.mxu1 %v4947_v28  ;;  %v5016_v26 = vld [vmem:[#allocation18 + $0x660] ss:$16 sps:$4 sm:$0xff]   ;;  %v5019_v28 = vld [vmem:[#allocation18 + $0x668] ss:$16 sps:$4 sm:$0xff]  }
 0x22b   :  { %3287 = vmatprep.subr.bf16.mxu0 %v4952_v29  ;;  %3533 = vmatprep.subr.bf16.mxu1 %v4955_v30  ;;  %v5024_v29 = vld [vmem:[#allocation18 + $0x684] ss:$16 sps:$4 sm:$0xff]   ;;  %v5027_v30 = vld [vmem:[#allocation18 + $0x68c] ss:$16 sps:$4 sm:$0xff]  }
 0x22e   :  { %3288 = vmatpush1.bf16.msra.mxu0 %v4950_v31  ;;  %3534 = vmatpush1.bf16.msra.mxu1 %v4953_v32  ;;  %v5022_v31 = vld [vmem:[#allocation18 + $0x680] ss:$16 sps:$4 sm:$0xff]   ;;  %v5025_v32 = vld [vmem:[#allocation18 + $0x688] ss:$16 sps:$4 sm:$0xff]  }
 0x22f   :  { %3289 = vmatprep.subr.bf16.mxu0 %v4958_v33  ;;  %3535 = vmatprep.subr.bf16.mxu1 %v4961_v34  ;;  %v5030_v33 = vld [vmem:[#allocation18 + $0x6a4] ss:$16 sps:$4 sm:$0xff]   ;;  %v5033_v34 = vld [vmem:[#allocation18 + $0x6ac] ss:$16 sps:$4 sm:$0xff]  }
 0x232   :  { %3290 = vmatpush1.bf16.msra.mxu0 %v4956_v35  ;;  %3536 = vmatpush1.bf16.msra.mxu1 %v4959_v36  ;;  %v5028_v35 = vld [vmem:[#allocation18 + $0x6a0] ss:$16 sps:$4 sm:$0xff]   ;;  %v5031_v36 = vld [vmem:[#allocation18 + $0x6a8] ss:$16 sps:$4 sm:$0xff]  }
 0x233   :  { %3291 = vmatprep.subr.bf16.mxu0 %v4964_v37  ;;  %3537 = vmatprep.subr.bf16.mxu1 %v4967_v38  ;;  %v5036_v37 = vld [vmem:[#allocation18 + $0x6c4] ss:$16 sps:$4 sm:$0xff]   ;;  %v5039_v38 = vld [vmem:[#allocation18 + $0x6cc] ss:$16 sps:$4 sm:$0xff]  }
 0x236   :  { %3292 = vmatpush1.bf16.msra.mxu0 %v4962_v45  ;;  %3538 = vmatpush1.bf16.msra.mxu1 %v4965_v39  ;;  %v5034_v45 = vld [vmem:[#allocation18 + $0x6c0] ss:$16 sps:$4 sm:$0xff]   ;;  %v5037_v39 = vld [vmem:[#allocation18 + $0x6c8] ss:$16 sps:$4 sm:$0xff]  }
 0x237   :  { %3293 = vmatprep.subr.bf16.mxu0 %v4970_v40  ;;  %3539 = vmatprep.subr.bf16.mxu1 %v4973_v41  ;;  %v5042_v40 = vld [vmem:[#allocation18 + $0x6e4] ss:$16 sps:$4 sm:$0xff]   ;;  %v5045_v41 = vld [vmem:[#allocation18 + $0x6ec] ss:$16 sps:$4 sm:$0xff]  }
 0x23a   :  { %3294 = vmatpush1.bf16.msra.mxu0 %v4968_v48  ;;  %3540 = vmatpush1.bf16.msra.mxu1 %v4971_v50  ;;  %v5040_v48 = vld [vmem:[#allocation18 + $0x6e0] ss:$16 sps:$4 sm:$0xff]   ;;  %v5043_v50 = vld [vmem:[#allocation18 + $0x6e8] ss:$16 sps:$4 sm:$0xff]  }
 0x23b   :  { %3295 = vmatprep.subr.bf16.mxu0 %v4976_v51  ;;  %3541 = vmatprep.subr.bf16.mxu1 %v4979_v52  ;;  %v5048_v51 = vld [vmem:[#allocation18 + $0x704] ss:$16 sps:$4 sm:$0xff]   ;;  %v5051_v52 = vld [vmem:[#allocation18 + $0x70c] ss:$16 sps:$4 sm:$0xff]  }
 0x23e   :  { %3296 = vmatpush1.bf16.msra.mxu0 %v4974_v58  ;;  %3542 = vmatpush1.bf16.msra.mxu1 %v4977_v53  ;;  %v5046_v58 = vld [vmem:[#allocation18 + $0x700] ss:$16 sps:$4 sm:$0xff]   ;;  %v5049_v53 = vld [vmem:[#allocation18 + $0x708] ss:$16 sps:$4 sm:$0xff]  }
 0x23f   :  { %3297 = vmatprep.subr.bf16.mxu0 %v4982_v54  ;;  %3543 = vmatprep.subr.bf16.mxu1 %v4985_v55  ;;  %v5054_v54 = vld [vmem:[#allocation18 + $0x724] ss:$16 sps:$4 sm:$0xff]   ;;  %v5057_v55 = vld [vmem:[#allocation18 + $0x72c] ss:$16 sps:$4 sm:$0xff]  }
 0x242   :  { %3298 = vmatpush1.bf16.msra.mxu0 %v4980_v57  ;;  %3544 = vmatpush1.bf16.msra.mxu1 %v4983_v16  ;;  %v5055_v57 = vld [vmem:[#allocation18 + $0x728] ss:$16 sps:$4 sm:$0xff]   ;;  %v5060_v16 = vld [vmem:[#allocation18 + $0x744] ss:$16 sps:$4 sm:$0xff]  }
 0x243   :  { %3299 = vmatprep.subr.bf16.mxu0 %v4988_v60  ;;  %3545 = vmatprep.subr.bf16.mxu1 %v4991_v62  ;;  %v5063_v60 = vld [vmem:[#allocation18 + $0x74c] ss:$16 sps:$4 sm:$0xff]   ;;  %v5058_v62 = vld [vmem:[#allocation18 + $0x740] ss:$16 sps:$4 sm:$0xff]  }
 0x246   :  { %3300 = vmatpush1.bf16.msra.mxu0 %v4986_v0  ;;  %3546 = vmatpush1.bf16.msra.mxu1 %v4989_v1  ;;  %v5066_v0 = vld [vmem:[#allocation18 + $0x764] ss:$16 sps:$4 sm:$0xff]   ;;  %v5069_v1 = vld [vmem:[#allocation18 + $0x76c] ss:$16 sps:$4 sm:$0xff]  }
 0x247   :  { %3301 = vmatprep.subr.bf16.mxu0 %v4994_v2  ;;  %3547 = vmatprep.subr.bf16.mxu1 %v4997_v3  ;;  %v5064_v2 = vld [vmem:[#allocation18 + $0x760] ss:$16 sps:$4 sm:$0xff]   ;;  %v5067_v3 = vld [vmem:[#allocation18 + $0x768] ss:$16 sps:$4 sm:$0xff]  }
 0x24a   :  { %3302 = vmatpush1.bf16.msra.mxu0 %v4992_v13  ;;  %3548 = vmatpush1.bf16.msra.mxu1 %v4995_v5  ;;  %v5075_v13 = vld [vmem:[#allocation18 + $0x78c] ss:$16 sps:$4 sm:$0xff]   ;;  %v5070_v5 = vld [vmem:[#allocation18 + $0x780] ss:$16 sps:$4 sm:$0xff]  }
 0x24b   :  { %3312 = vmatprep.subr.bf16.mxu0 %v5000_v6  ;;  %3558 = vmatprep.subr.bf16.mxu1 %v5003_v7  ;;  %v5073_v6 = vld [vmem:[#allocation18 + $0x788] ss:$16 sps:$4 sm:$0xff]   ;;  %v5078_v7 = vld [vmem:[#allocation18 + $0x7a4] ss:$16 sps:$4 sm:$0xff]  }
 0x24d   :  { %3304 = vmatmul.mubr.bf16.vlgmr.msra.gmra.mrb[12].mxu0 %v4541_v14  ;;  %3550 = vmatmul.mubr.bf16.vlgmr.msra.gmra.mrb[12].mxu1 %v4541_v14  ;;  %v5076_v14 = vld [vmem:[#allocation18 + $0x7a0] ss:$16 sps:$4 sm:$0xff]  }
 0x24e   :  { %3313 = vmatpush1.bf16.msra.mxu0 %v4998_v9  ;;  %3559 = vmatpush1.bf16.msra.mxu1 %v5001_v10  ;;  %v5079_v9 = vld [vmem:[#allocation18 + $0x7a8] ss:$16 sps:$4 sm:$0xff]   ;;  %v5084_v10 = vld [vmem:[#allocation18 + $0x7c4] ss:$16 sps:$4 sm:$0xff]  }
 0x24f   :  { %3314 = vmatprep.subr.bf16.mxu0 %v5006_v12  ;;  %3560 = vmatprep.subr.bf16.mxu1 %v5009_v15  ;;  %v5087_v12 = vld [vmem:[#allocation18 + $0x7cc] ss:$16 sps:$4 sm:$0xff]   ;;  %v614_v15 = vrot.slane %v5951_v42, %v5923_v46 }
 0x250   :  { %3344 = vmatprep.mubr.bf16.mxu0 %v4544_v17  ;;  %3590 = vmatprep.mubr.bf16.mxu1 %v4544_v17  ;;  %v5082_v17 = vld [vmem:[#allocation18 + $0x7c0] ss:$16 sps:$4 sm:$0xff]  }
 0x252   :  { %3315 = vmatpush1.bf16.msra.mxu0 %v5004_v18  ;;  %3561 = vmatpush1.bf16.msra.mxu1 %v5007_v19  ;;  %v5085_v18 = vld [vmem:[#allocation18 + $0x7c8] ss:$16 sps:$4 sm:$0xff]   ;;  %v5090_v19 = vld [vmem:[#allocation18 + $0x7e4] ss:$16 sps:$4 sm:$0xff]  }
 0x253   :  { %3316 = vmatprep.subr.bf16.mxu0 %v5012_v20  ;;  %3562 = vmatprep.subr.bf16.mxu1 %v5015_v27  ;;  %v5093_v20 = vld [vmem:[#allocation18 + $0x7ec] ss:$16 sps:$4 sm:$0xff]   ;;  %v748_v27 = vadd.f32 %v5957_v49, %v614_v15  ;;  %v5102_v49 = vld [vmem:[#allocation18 + $0x824] ss:$16 sps:$4 sm:$0xff]  }
 0x254   :  { %v5162_v15 = vld [vmem:[#allocation18 + $0x964] ss:$16 sps:$4 sm:$0xff]  }
 0x256   :  { %3317 = vmatpush1.bf16.msra.mxu0 %v5010_v21  ;;  %3563 = vmatpush1.bf16.msra.mxu1 %v5013_v22  ;;  %v5088_v21 = vld [vmem:[#allocation18 + $0x7e0] ss:$16 sps:$4 sm:$0xff]   ;;  %v5091_v22 = vld [vmem:[#allocation18 + $0x7e8] ss:$16 sps:$4 sm:$0xff]  }
 0x257   :  { %3318 = vmatprep.subr.bf16.mxu0 %v5018_v23  ;;  %3564 = vmatprep.subr.bf16.mxu1 %v5021_v24  ;;  %v568_v23 = vmax.f32 %v5947_v25, 0.0  ;;  %v5096_v24 = vld [vmem:[#allocation18 + $0x804] ss:$16 sps:$4 sm:$0xff]   ;;  %v5100_v25 = vld [vmem:[#allocation18 + $0x820] ss:$16 sps:$4 sm:$0xff]  }
 0x25a   :  { %3319 = vmatpush1.bf16.msra.mxu0 %v5016_v26  ;;  %3565 = vmatpush1.bf16.msra.mxu1 %v5019_v28  ;;  %v5099_v26 = vld [vmem:[#allocation18 + $0x80c] ss:$16 sps:$4 sm:$0xff]   ;;  %v794_v28 = vmax.f32 %v748_v27, 0.0 }
 0x25b   :  { %3320 = vmatprep.subr.bf16.mxu0 %v5024_v29  ;;  %3566 = vmatprep.subr.bf16.mxu1 %v5027_v30  ;;  %v5094_v29 = vld [vmem:[#allocation18 + $0x800] ss:$16 sps:$4 sm:$0xff]   ;;  %v4543_v30 = vpack.c.bf16 %v568_v23, %v568_v23  ;;  %v5171_v27 = vld [vmem:[#allocation18 + $0x98c] ss:$16 sps:$4 sm:$0xff]   ;;  %v5174_v23 = vld [vmem:[#allocation18 + $0x9a4] ss:$16 sps:$4 sm:$0xff]  }
 0x25e   :  { %3321 = vmatpush1.bf16.msra.mxu0 %v5022_v31  ;;  %3567 = vmatpush1.bf16.msra.mxu1 %v5025_v32  ;;  %v5097_v31 = vld [vmem:[#allocation18 + $0x808] ss:$16 sps:$4 sm:$0xff]   ;;  %v4546_v32 = vpack.c.bf16 %v794_v28, %v794_v28  ;;  %v610_v28 = vrot.slane %v5951_v42, %v5919_v44 }
 0x25f   :  { %3322 = vmatprep.subr.bf16.mxu0 %v5030_v33  ;;  %3568 = vmatprep.subr.bf16.mxu1 %v5033_v34  ;;  %v5105_v33 = vld [vmem:[#allocation18 + $0x82c] ss:$16 sps:$4 sm:$0xff]   ;;  %v5103_v34 = vld [vmem:[#allocation18 + $0x828] ss:$16 sps:$4 sm:$0xff]  }
 0x260   :  { %v5187_v42 = vld [vmem:[#allocation18 + $0x9e8] ss:$16 sps:$4 sm:$0xff]  }
 0x262   :  { %3323 = vmatpush1.bf16.msra.mxu0 %v5028_v35  ;;  %3569 = vmatpush1.bf16.msra.mxu1 %v5031_v36  ;;  %v5108_v35 = vld [vmem:[#allocation18 + $0x844] ss:$16 sps:$4 sm:$0xff]   ;;  %v5111_v36 = vld [vmem:[#allocation18 + $0x84c] ss:$16 sps:$4 sm:$0xff]  }
 0x263   :  { %3324 = vmatprep.subr.bf16.mxu0 %v5036_v37  ;;  %3570 = vmatprep.subr.bf16.mxu1 %v5039_v38  ;;  %v5106_v37 = vld [vmem:[#allocation18 + $0x840] ss:$16 sps:$4 sm:$0xff]   ;;  %v5109_v38 = vld [vmem:[#allocation18 + $0x848] ss:$16 sps:$4 sm:$0xff]  }
 0x266   :  { %3325 = vmatpush1.bf16.msra.mxu0 %v5034_v45  ;;  %3571 = vmatpush1.bf16.msra.mxu1 %v5037_v39  ;;  %v5114_v45 = vld [vmem:[#allocation18 + $0x864] ss:$16 sps:$4 sm:$0xff]   ;;  %v5117_v39 = vld [vmem:[#allocation18 + $0x86c] ss:$16 sps:$4 sm:$0xff]  }
 0x267   :  { %3326 = vmatprep.subr.bf16.mxu0 %v5042_v40  ;;  %3572 = vmatprep.subr.bf16.mxu1 %v5045_v41  ;;  %v5112_v40 = vld [vmem:[#allocation18 + $0x860] ss:$16 sps:$4 sm:$0xff]   ;;  %v5115_v41 = vld [vmem:[#allocation18 + $0x868] ss:$16 sps:$4 sm:$0xff]  }
 0x26a   :  { %3327 = vmatpush1.bf16.msra.mxu0 %v5040_v48  ;;  %3573 = vmatpush1.bf16.msra.mxu1 %v5043_v50  ;;  %v5120_v48 = vld [vmem:[#allocation18 + $0x884] ss:$16 sps:$4 sm:$0xff]   ;;  %v5123_v50 = vld [vmem:[#allocation18 + $0x88c] ss:$16 sps:$4 sm:$0xff]  }
 0x26b   :  { %3328 = vmatprep.subr.bf16.mxu0 %v5048_v51  ;;  %3574 = vmatprep.subr.bf16.mxu1 %v5051_v52  ;;  %v5118_v51 = vld [vmem:[#allocation18 + $0x880] ss:$16 sps:$4 sm:$0xff]   ;;  %v5121_v52 = vld [vmem:[#allocation18 + $0x888] ss:$16 sps:$4 sm:$0xff]  }
 0x26e   :  { %3329 = vmatpush1.bf16.msra.mxu0 %v5046_v58  ;;  %3575 = vmatpush1.bf16.msra.mxu1 %v5049_v53  ;;  %v5126_v58 = vld [vmem:[#allocation18 + $0x8a4] ss:$16 sps:$4 sm:$0xff]   ;;  %v5129_v53 = vld [vmem:[#allocation18 + $0x8ac] ss:$16 sps:$4 sm:$0xff]  }
 0x26f   :  { %3330 = vmatprep.subr.bf16.mxu0 %v5054_v54  ;;  %3576 = vmatprep.subr.bf16.mxu1 %v5057_v55  ;;  %v5124_v54 = vld [vmem:[#allocation18 + $0x8a0] ss:$16 sps:$4 sm:$0xff]   ;;  %v5127_v55 = vld [vmem:[#allocation18 + $0x8a8] ss:$16 sps:$4 sm:$0xff]  }
 0x272   :  { %3331 = vmatpush1.bf16.msra.mxu0 %v5052_v56  ;;  %3577 = vmatpush1.bf16.msra.mxu1 %v5055_v57  ;;  %v5132_v56 = vld [vmem:[#allocation18 + $0x8c4] ss:$16 sps:$4 sm:$0xff]   ;;  %v5135_v57 = vld [vmem:[#allocation18 + $0x8cc] ss:$16 sps:$4 sm:$0xff]  }
 0x273   :  { %3332 = vmatprep.subr.bf16.mxu0 %v5060_v16  ;;  %3578 = vmatprep.subr.bf16.mxu1 %v5063_v60  ;;  %v5130_v16 = vld [vmem:[#allocation18 + $0x8c0] ss:$16 sps:$4 sm:$0xff]   ;;  %v5133_v60 = vld [vmem:[#allocation18 + $0x8c8] ss:$16 sps:$4 sm:$0xff]  }
 0x276   :  { %3333 = vmatpush1.bf16.msra.mxu0 %v5058_v62  ;;  %3579 = vmatpush1.bf16.msra.mxu1 %v5061_v63  ;;  %v5138_v62 = vld [vmem:[#allocation18 + $0x8e4] ss:$16 sps:$4 sm:$0xff]   ;;  %v5141_v63 = vld [vmem:[#allocation18 + $0x8ec] ss:$16 sps:$4 sm:$0xff]  }
 0x277   :  { %3334 = vmatprep.subr.bf16.mxu0 %v5066_v0  ;;  %3580 = vmatprep.subr.bf16.mxu1 %v5069_v1  ;;  %v5136_v0 = vld [vmem:[#allocation18 + $0x8e0] ss:$16 sps:$4 sm:$0xff]   ;;  %v5139_v1 = vld [vmem:[#allocation18 + $0x8e8] ss:$16 sps:$4 sm:$0xff]  }
 0x27a   :  { %3335 = vmatpush1.bf16.msra.mxu0 %v5064_v2  ;;  %3581 = vmatpush1.bf16.msra.mxu1 %v5067_v3  ;;  %v5144_v2 = vld [vmem:[#allocation18 + $0x904] ss:$16 sps:$4 sm:$0xff]   ;;  %v5147_v3 = vld [vmem:[#allocation18 + $0x90c] ss:$16 sps:$4 sm:$0xff]  }
 0x27b   :  { %3336 = vmatprep.subr.bf16.mxu0 %v5072_v4  ;;  %3582 = vmatprep.subr.bf16.mxu1 %v5075_v13  ;;  %v5142_v4 = vld [vmem:[#allocation18 + $0x900] ss:$16 sps:$4 sm:$0xff]   ;;  %v5145_v13 = vld [vmem:[#allocation18 + $0x908] ss:$16 sps:$4 sm:$0xff]  }
 0x27e   :  { %3337 = vmatpush1.bf16.msra.mxu0 %v5070_v5  ;;  %3583 = vmatpush1.bf16.msra.mxu1 %v5073_v6  ;;  %v5150_v5 = vld [vmem:[#allocation18 + $0x924] ss:$16 sps:$4 sm:$0xff]   ;;  %v5153_v6 = vld [vmem:[#allocation18 + $0x92c] ss:$16 sps:$4 sm:$0xff]  }
 0x27f   :  { %3338 = vmatprep.subr.bf16.mxu0 %v5078_v7  ;;  %3584 = vmatprep.subr.bf16.mxu1 %v5081_v8  ;;  %v5148_v7 = vld [vmem:[#allocation18 + $0x920] ss:$16 sps:$4 sm:$0xff]   ;;  %v5151_v8 = vld [vmem:[#allocation18 + $0x928] ss:$16 sps:$4 sm:$0xff]  }
 0x282   :  { %3339 = vmatpush1.bf16.msra.mxu0 %v5076_v14  ;;  %3585 = vmatpush1.bf16.msra.mxu1 %v5079_v9  ;;  %v5156_v14 = vld [vmem:[#allocation18 + $0x944] ss:$16 sps:$4 sm:$0xff]   ;;  %v5159_v9 = vld [vmem:[#allocation18 + $0x94c] ss:$16 sps:$4 sm:$0xff]  }
 0x283   :  { %3340 = vmatprep.subr.bf16.mxu0 %v5084_v10  ;;  %3586 = vmatprep.subr.bf16.mxu1 %v5087_v12  ;;  %v5154_v10 = vld [vmem:[#allocation18 + $0x940] ss:$16 sps:$4 sm:$0xff]   ;;  %v5157_v12 = vld [vmem:[#allocation18 + $0x948] ss:$16 sps:$4 sm:$0xff]  }
 0x286   :  { %3341 = vmatpush1.bf16.msra.mxu0 %v5082_v17  ;;  %3587 = vmatpush1.bf16.msra.mxu1 %v5085_v18  ;;  %v5165_v17 = vld [vmem:[#allocation18 + $0x96c] ss:$16 sps:$4 sm:$0xff]   ;;  %v5160_v18 = vld [vmem:[#allocation18 + $0x960] ss:$16 sps:$4 sm:$0xff]  }
 0x287   :  { %3342 = vmatprep.subr.bf16.mxu0 %v5090_v19  ;;  %3588 = vmatprep.subr.bf16.mxu1 %v5093_v20  ;;  %v5163_v19 = vld [vmem:[#allocation18 + $0x968] ss:$16 sps:$4 sm:$0xff]   ;;  %v5168_v20 = vld [vmem:[#allocation18 + $0x984] ss:$16 sps:$4 sm:$0xff]  }
 0x28a   :  { %3343 = vmatpush1.bf16.msra.mxu0 %v5088_v21  ;;  %3589 = vmatpush1.bf16.msra.mxu1 %v5091_v22  ;;  %v5166_v21 = vld [vmem:[#allocation18 + $0x980] ss:$16 sps:$4 sm:$0xff]   ;;  %v5169_v22 = vld [vmem:[#allocation18 + $0x988] ss:$16 sps:$4 sm:$0xff]  }
 0x28b   :  { %3353 = vmatprep.subr.bf16.mxu0 %v5096_v24  ;;  %3599 = vmatprep.subr.bf16.mxu1 %v5099_v26  ;;  %v5177_v24 = vld [vmem:[#allocation18 + $0x9ac] ss:$16 sps:$4 sm:$0xff]   ;;  %v5172_v26 = vld [vmem:[#allocation18 + $0x9a0] ss:$16 sps:$4 sm:$0xff]  }
 0x28d   :  { %3345 = vmatmul.mubr.bf16.vlgmr.msra.gmra.mrb[12].mxu0 %v4543_v30  ;;  %3591 = vmatmul.mubr.bf16.vlgmr.msra.gmra.mrb[12].mxu1 %v4543_v30  ;;  %v5180_v30 = vld [vmem:[#allocation18 + $0x9c4] ss:$16 sps:$4 sm:$0xff]  }
 0x28e   :  { %3354 = vmatpush1.bf16.msra.mxu0 %v5094_v29  ;;  %3385 = vmatprep.mubr.bf16.mxu0 %v4546_v32  ;;  %v5175_v29 = vld [vmem:[#allocation18 + $0x9a8] ss:$16 sps:$4 sm:$0xff]  }
 0x28f   :  { %3600 = vmatpush1.bf16.msra.mxu1 %v5097_v31  ;;  %3631 = vmatprep.mubr.bf16.mxu1 %v4546_v32  ;;  %v5183_v31 = vld [vmem:[#allocation18 + $0x9cc] ss:$16 sps:$4 sm:$0xff]   ;;  %v5178_v32 = vld [vmem:[#allocation18 + $0x9c0] ss:$16 sps:$4 sm:$0xff]  }
 0x290   :  { %3355 = vmatprep.subr.bf16.mxu0 %v5102_v49  ;;  %3601 = vmatprep.subr.bf16.mxu1 %v5105_v33  ;;  %v746_v49 = vadd.f32 %v5953_v43, %v610_v28  ;;  %v5181_v33 = vld [vmem:[#allocation18 + $0x9c8] ss:$16 sps:$4 sm:$0xff]   ;;  %v5258_v28 = vld [vmem:[#allocation18 + $0xb64] ss:$16 sps:$4 sm:$0xff]  }
 0x292   :  { %3356 = vmatpush1.bf16.msra.mxu0 %v5100_v25  ;;  %v5186_v25 = vld [vmem:[#allocation18 + $0x9e4] ss:$16 sps:$4 sm:$0xff]  }
 0x293   :  { %3602 = vmatpush1.bf16.msra.mxu1 %v5103_v34  ;;  %3357 = vmatprep.subr.bf16.mxu0 %v5108_v35  ;;  %v5189_v34 = vld [vmem:[#allocation18 + $0x9ec] ss:$16 sps:$4 sm:$0xff]   ;;  %v5184_v35 = vld [vmem:[#allocation18 + $0x9e0] ss:$16 sps:$4 sm:$0xff]  }
 0x294   :  { %3603 = vmatprep.subr.bf16.mxu1 %v5111_v36  ;;  %v793_v36 = vmax.f32 %v746_v49, 0.0  ;;  %v5267_v49 = vld [vmem:[#allocation18 + $0xb8c] ss:$16 sps:$4 sm:$0xff]  }
 0x296   :  { %3358 = vmatpush1.bf16.msra.mxu0 %v5106_v37  ;;  %v5192_v37 = vld [vmem:[#allocation18 + $0xa04] ss:$16 sps:$4 sm:$0xff]   ;;  %v4545_v43 = vpack.c.bf16 %v793_v36, %v793_v36  ;;  %v5268_v36 = vld [vmem:[#allocation18 + $0xba0] ss:$16 sps:$4 sm:$0xff]  }
 0x297   :  { %3604 = vmatpush1.bf16.msra.mxu1 %v5109_v38  ;;  %3359 = vmatprep.subr.bf16.mxu0 %v5114_v45  ;;  %v5195_v38 = vld [vmem:[#allocation18 + $0xa0c] ss:$16 sps:$4 sm:$0xff]   ;;  %v796_v45 = vmax.f32 %v5963_v61, 0.0 }
 0x298   :  { %3605 = vmatprep.subr.bf16.mxu1 %v5117_v39  ;;  %v5190_v39 = vld [vmem:[#allocation18 + $0xa00] ss:$16 sps:$4 sm:$0xff]   ;;  %v5207_v61 = vld [vmem:[#allocation18 + $0xa4c] ss:$16 sps:$4 sm:$0xff]  }
 0x29a   :  { %3360 = vmatpush1.bf16.msra.mxu0 %v5112_v40  ;;  %v5193_v40 = vld [vmem:[#allocation18 + $0xa08] ss:$16 sps:$4 sm:$0xff]  }
 0x29b   :  { %3606 = vmatpush1.bf16.msra.mxu1 %v5115_v41  ;;  %3361 = vmatprep.subr.bf16.mxu0 %v5120_v48  ;;  %v5198_v41 = vld [vmem:[#allocation18 + $0xa24] ss:$16 sps:$4 sm:$0xff]   ;;  %v4548_v48 = vpack.c.bf16 %v796_v45, %v796_v45  ;;  %v5274_v45 = vld [vmem:[#allocation18 + $0xbc0] ss:$16 sps:$4 sm:$0xff]  }
 0x29c   :  { %3607 = vmatprep.subr.bf16.mxu1 %v5123_v50  ;;  %v5201_v50 = vld [vmem:[#allocation18 + $0xa2c] ss:$16 sps:$4 sm:$0xff]  }
 0x29e   :  { %3362 = vmatpush1.bf16.msra.mxu0 %v5118_v51  ;;  %v5196_v51 = vld [vmem:[#allocation18 + $0xa20] ss:$16 sps:$4 sm:$0xff]  }
 0x29f   :  { %3608 = vmatpush1.bf16.msra.mxu1 %v5121_v52  ;;  %3363 = vmatprep.subr.bf16.mxu0 %v5126_v58  ;;  %v5199_v52 = vld [vmem:[#allocation18 + $0xa28] ss:$16 sps:$4 sm:$0xff]   ;;  %v5204_v58 = vld [vmem:[#allocation18 + $0xa44] ss:$16 sps:$4 sm:$0xff]  }
 0x2a0   :  { %3609 = vmatprep.subr.bf16.mxu1 %v5129_v53  ;;  %v5202_v53 = vld [vmem:[#allocation18 + $0xa40] ss:$16 sps:$4 sm:$0xff]  }
 0x2a2   :  { %3364 = vmatpush1.bf16.msra.mxu0 %v5124_v54  ;;  %v5205_v54 = vld [vmem:[#allocation18 + $0xa48] ss:$16 sps:$4 sm:$0xff]  }
 0x2a3   :  { %3610 = vmatpush1.bf16.msra.mxu1 %v5127_v55  ;;  %3365 = vmatprep.subr.bf16.mxu0 %v5132_v56  ;;  %v5210_v55 = vld [vmem:[#allocation18 + $0xa64] ss:$16 sps:$4 sm:$0xff]   ;;  %v5213_v56 = vld [vmem:[#allocation18 + $0xa6c] ss:$16 sps:$4 sm:$0xff]  }
 0x2a4   :  { %3611 = vmatprep.subr.bf16.mxu1 %v5135_v57  ;;  %v5208_v57 = vld [vmem:[#allocation18 + $0xa60] ss:$16 sps:$4 sm:$0xff]  }
 0x2a6   :  { %3366 = vmatpush1.bf16.msra.mxu0 %v5130_v16  ;;  %v5211_v16 = vld [vmem:[#allocation18 + $0xa68] ss:$16 sps:$4 sm:$0xff]  }
 0x2a7   :  { %3612 = vmatpush1.bf16.msra.mxu1 %v5133_v60  ;;  %3367 = vmatprep.subr.bf16.mxu0 %v5138_v62  ;;  %v5216_v60 = vld [vmem:[#allocation18 + $0xa84] ss:$16 sps:$4 sm:$0xff]   ;;  %v5219_v62 = vld [vmem:[#allocation18 + $0xa8c] ss:$16 sps:$4 sm:$0xff]  }
 0x2a8   :  { %3613 = vmatprep.subr.bf16.mxu1 %v5141_v63  ;;  %v5214_v63 = vld [vmem:[#allocation18 + $0xa80] ss:$16 sps:$4 sm:$0xff]  }
 0x2aa   :  { %3368 = vmatpush1.bf16.msra.mxu0 %v5136_v0  ;;  %v5217_v0 = vld [vmem:[#allocation18 + $0xa88] ss:$16 sps:$4 sm:$0xff]  }
 0x2ab   :  { %3614 = vmatpush1.bf16.msra.mxu1 %v5139_v1  ;;  %3369 = vmatprep.subr.bf16.mxu0 %v5144_v2  ;;  %v5222_v1 = vld [vmem:[#allocation18 + $0xaa4] ss:$16 sps:$4 sm:$0xff]   ;;  %v5225_v2 = vld [vmem:[#allocation18 + $0xaac] ss:$16 sps:$4 sm:$0xff]  }
 0x2ac   :  { %3615 = vmatprep.subr.bf16.mxu1 %v5147_v3  ;;  %v5220_v3 = vld [vmem:[#allocation18 + $0xaa0] ss:$16 sps:$4 sm:$0xff]  }
 0x2ae   :  { %3370 = vmatpush1.bf16.msra.mxu0 %v5142_v4  ;;  %v5223_v4 = vld [vmem:[#allocation18 + $0xaa8] ss:$16 sps:$4 sm:$0xff]  }
 0x2af   :  { %3616 = vmatpush1.bf16.msra.mxu1 %v5145_v13  ;;  %3371 = vmatprep.subr.bf16.mxu0 %v5150_v5  ;;  %v5228_v13 = vld [vmem:[#allocation18 + $0xac4] ss:$16 sps:$4 sm:$0xff]   ;;  %v5231_v5 = vld [vmem:[#allocation18 + $0xacc] ss:$16 sps:$4 sm:$0xff]  }
 0x2b0   :  { %3617 = vmatprep.subr.bf16.mxu1 %v5153_v6  ;;  %v5226_v6 = vld [vmem:[#allocation18 + $0xac0] ss:$16 sps:$4 sm:$0xff]  }
 0x2b2   :  { %3372 = vmatpush1.bf16.msra.mxu0 %v5148_v7  ;;  %v5229_v7 = vld [vmem:[#allocation18 + $0xac8] ss:$16 sps:$4 sm:$0xff]  }
 0x2b3   :  { %3618 = vmatpush1.bf16.msra.mxu1 %v5151_v8  ;;  %3373 = vmatprep.subr.bf16.mxu0 %v5156_v14  ;;  %v5234_v8 = vld [vmem:[#allocation18 + $0xae4] ss:$16 sps:$4 sm:$0xff]   ;;  %v5237_v14 = vld [vmem:[#allocation18 + $0xaec] ss:$16 sps:$4 sm:$0xff]  }
 0x2b4   :  { %3619 = vmatprep.subr.bf16.mxu1 %v5159_v9  ;;  %v5232_v9 = vld [vmem:[#allocation18 + $0xae0] ss:$16 sps:$4 sm:$0xff]  }
 0x2b6   :  { %3374 = vmatpush1.bf16.msra.mxu0 %v5154_v10  ;;  %v5235_v10 = vld [vmem:[#allocation18 + $0xae8] ss:$16 sps:$4 sm:$0xff]  }
 0x2b7   :  { %3620 = vmatpush1.bf16.msra.mxu1 %v5157_v12  ;;  %3375 = vmatprep.subr.bf16.mxu0 %v5162_v15  ;;  %v5240_v12 = vld [vmem:[#allocation18 + $0xb04] ss:$16 sps:$4 sm:$0xff]   ;;  %v5243_v15 = vld [vmem:[#allocation18 + $0xb0c] ss:$16 sps:$4 sm:$0xff]  }
 0x2b8   :  { %3621 = vmatprep.subr.bf16.mxu1 %v5165_v17  ;;  %v5238_v17 = vld [vmem:[#allocation18 + $0xb00] ss:$16 sps:$4 sm:$0xff]  }
 0x2ba   :  { %3376 = vmatpush1.bf16.msra.mxu0 %v5160_v18  ;;  %v5241_v18 = vld [vmem:[#allocation18 + $0xb08] ss:$16 sps:$4 sm:$0xff]  }
 0x2bb   :  { %3622 = vmatpush1.bf16.msra.mxu1 %v5163_v19  ;;  %3377 = vmatprep.subr.bf16.mxu0 %v5168_v20  ;;  %v5246_v19 = vld [vmem:[#allocation18 + $0xb24] ss:$16 sps:$4 sm:$0xff]   ;;  %v5249_v20 = vld [vmem:[#allocation18 + $0xb2c] ss:$16 sps:$4 sm:$0xff]  }
 0x2bc   :  { %3623 = vmatprep.subr.bf16.mxu1 %v5171_v27  ;;  %v5244_v27 = vld [vmem:[#allocation18 + $0xb20] ss:$16 sps:$4 sm:$0xff]  }
 0x2be   :  { %3378 = vmatpush1.bf16.msra.mxu0 %v5166_v21  ;;  %v5247_v21 = vld [vmem:[#allocation18 + $0xb28] ss:$16 sps:$4 sm:$0xff]  }
 0x2bf   :  { %3624 = vmatpush1.bf16.msra.mxu1 %v5169_v22  ;;  %3379 = vmatprep.subr.bf16.mxu0 %v5174_v23  ;;  %v5252_v22 = vld [vmem:[#allocation18 + $0xb44] ss:$16 sps:$4 sm:$0xff]   ;;  %v5255_v23 = vld [vmem:[#allocation18 + $0xb4c] ss:$16 sps:$4 sm:$0xff]  }
 0x2c0   :  { %3625 = vmatprep.subr.bf16.mxu1 %v5177_v24  ;;  %v5250_v24 = vld [vmem:[#allocation18 + $0xb40] ss:$16 sps:$4 sm:$0xff]  }
 0x2c2   :  { %3380 = vmatpush1.bf16.msra.mxu0 %v5172_v26  ;;  %v5253_v26 = vld [vmem:[#allocation18 + $0xb48] ss:$16 sps:$4 sm:$0xff]  }
 0x2c3   :  { %3626 = vmatpush1.bf16.msra.mxu1 %v5175_v29  ;;  %3381 = vmatprep.subr.bf16.mxu0 %v5180_v30  ;;  %v5261_v29 = vld [vmem:[#allocation18 + $0xb6c] ss:$16 sps:$4 sm:$0xff]   ;;  %v5256_v30 = vld [vmem:[#allocation18 + $0xb60] ss:$16 sps:$4 sm:$0xff]  }
 0x2c4   :  { %3627 = vmatprep.subr.bf16.mxu1 %v5183_v31  ;;  %v5259_v31 = vld [vmem:[#allocation18 + $0xb68] ss:$16 sps:$4 sm:$0xff]  }
 0x2c6   :  { %3382 = vmatpush1.bf16.msra.mxu0 %v5178_v32  ;;  %v5264_v32 = vld [vmem:[#allocation18 + $0xb84] ss:$16 sps:$4 sm:$0xff]  }
 0x2c7   :  { %3628 = vmatpush1.bf16.msra.mxu1 %v5181_v33  ;;  %3383 = vmatprep.subr.bf16.mxu0 %v5186_v25  ;;  %v5262_v33 = vld [vmem:[#allocation18 + $0xb80] ss:$16 sps:$4 sm:$0xff]   ;;  %v5265_v25 = vld [vmem:[#allocation18 + $0xb88] ss:$16 sps:$4 sm:$0xff]  }
 0x2c8   :  { %3629 = vmatprep.subr.bf16.mxu1 %v5189_v34  ;;  %v5270_v34 = vld [vmem:[#allocation18 + $0xba4] ss:$16 sps:$4 sm:$0xff]  }
 0x2ca   :  { %3384 = vmatpush1.bf16.msra.mxu0 %v5184_v35  ;;  %v5273_v35 = vld [vmem:[#allocation18 + $0xbac] ss:$16 sps:$4 sm:$0xff]  }
 0x2cb   :  { %3630 = vmatpush1.bf16.msra.mxu1 %v5187_v42  ;;  %3394 = vmatprep.subr.bf16.mxu0 %v5192_v37  ;;  %v5271_v42 = vld [vmem:[#allocation18 + $0xba8] ss:$16 sps:$4 sm:$0xff]   ;;  %v5276_v37 = vld [vmem:[#allocation18 + $0xbc4] ss:$16 sps:$4 sm:$0xff]  }
 0x2cc   :  { %3640 = vmatprep.subr.bf16.mxu1 %v5195_v38  ;;  %v5279_v38 = vld [vmem:[#allocation18 + $0xbcc] ss:$16 sps:$4 sm:$0xff]  }
 0x2cd   :  { %3386 = vmatmul.mubr.bf16.vlgmr.msra.gmra.mrb[12].mxu0 %v4545_v43 }
 0x2ce   :  { %3632 = vmatmul.mubr.bf16.vlgmr.msra.gmra.mrb[12].mxu1 %v4545_v43  ;;  %3395 = vmatpush1.bf16.msra.mxu0 %v5190_v39  ;;  %v5277_v39 = vld [vmem:[#allocation18 + $0xbc8] ss:$16 sps:$4 sm:$0xff]   ;;  %v5282_v43 = vld [vmem:[#allocation18 + $0xbe4] ss:$16 sps:$4 sm:$0xff]  }
 0x2cf   :  { %3426 = vmatprep.mubr.bf16.mxu0 %v4548_v48  ;;  %3641 = vmatpush1.bf16.msra.mxu1 %v5193_v40  ;;  %v5285_v40 = vld [vmem:[#allocation18 + $0xbec] ss:$16 sps:$4 sm:$0xff]  }
 0x2d0   :  { %3672 = vmatprep.mubr.bf16.mxu1 %v4548_v48  ;;  %3396 = vmatprep.subr.bf16.mxu0 %v5198_v41  ;;  %v5280_v41 = vld [vmem:[#allocation18 + $0xbe0] ss:$16 sps:$4 sm:$0xff]   ;;  %v795_v48 = vmax.f32 %v5961_v59, 0.0 }
 0x2d1   :  { %3642 = vmatprep.subr.bf16.mxu1 %v5201_v50  ;;  %v5283_v50 = vld [vmem:[#allocation18 + $0xbe8] ss:$16 sps:$4 sm:$0xff]   ;;  %v5293_v59 = vld [vmem:[#allocation21 + $0x88] sm:$0xff]  }
 0x2d2   :  { %3397 = vmatpush1.bf16.msra.mxu0 %v5196_v51  ;;  %v5286_v51 = vld [vmem:[#allocation21 + $0x40] sm:$0xff]  }
 0x2d3   :  { %3643 = vmatpush1.bf16.msra.mxu1 %v5199_v52  ;;  %3398 = vmatprep.subr.bf16.mxu0 %v5204_v58  ;;  %v5287_v52 = vld [vmem:[#allocation21 + $0xc0] sm:$0xff]  }
 0x2d4   :  { %3644 = vmatprep.subr.bf16.mxu1 %v5207_v61  ;;  %v5288_v58 = vld [vmem:[#allocation21] sm:$0xff]   ;;  %v4547_v61 = vpack.c.bf16 %v795_v48, %v795_v48 }
 0x2d6   :  { %3399 = vmatpush1.bf16.msra.mxu0 %v5202_v53  ;;  %v5289_v53 = vld [vmem:[#allocation21 + $0x80] sm:$0xff]  }
 0x2d7   :  { %3645 = vmatpush1.bf16.msra.mxu1 %v5205_v54  ;;  %3400 = vmatprep.subr.bf16.mxu0 %v5210_v55  ;;  %v5290_v54 = vld [vmem:[#allocation21 + $0x48] sm:$0xff]  }
 0x2d8   :  { %3646 = vmatprep.subr.bf16.mxu1 %v5213_v56  ;;  %v5291_v55 = vld [vmem:[#allocation21 + $0xc8] sm:$0xff]  }
 0x2d9   :  { %v5292_v56 = vld [vmem:[#allocation21 + $0x8] sm:$0xff]  }
 0x2da   :  { %3401 = vmatpush1.bf16.msra.mxu0 %v5208_v57  ;;  %v5294_v57 = vld [vmem:[#allocation21 + $0x50] sm:$0xff]  }
 0x2db   :  { %3647 = vmatpush1.bf16.msra.mxu1 %v5211_v16  ;;  %3402 = vmatprep.subr.bf16.mxu0 %v5216_v60  ;;  %v5295_v16 = vld [vmem:[#allocation21 + $0xd0] sm:$0xff]  }
 0x2dc   :  { %3648 = vmatprep.subr.bf16.mxu1 %v5219_v62  ;;  %v5296_v60 = vld [vmem:[#allocation21 + $0x10] sm:$0xff]  }
 0x2dd   :  { %v5297_v62 = vld [vmem:[#allocation21 + $0x90] sm:$0xff]  }
 0x2de   :  { %3403 = vmatpush1.bf16.msra.mxu0 %v5214_v63  ;;  %v5298_v63 = vld [vmem:[#allocation21 + $0x58] sm:$0xff]  }
 0x2df   :  { %3649 = vmatpush1.bf16.msra.mxu1 %v5217_v0  ;;  %3404 = vmatprep.subr.bf16.mxu0 %v5222_v1  ;;  %v5299_v0 = vld [vmem:[#allocation21 + $0xd8] sm:$0xff]  }
 0x2e0   :  { %3650 = vmatprep.subr.bf16.mxu1 %v5225_v2  ;;  %v5300_v1 = vld [vmem:[#allocation21 + $0x18] sm:$0xff]  }
 0x2e1   :  { %v5301_v2 = vld [vmem:[#allocation21 + $0x98] sm:$0xff]  }
 0x2e2   :  { %3405 = vmatpush1.bf16.msra.mxu0 %v5220_v3  ;;  %v5302_v3 = vld [vmem:[#allocation21 + $0x60] sm:$0xff]  }
 0x2e3   :  { %3651 = vmatpush1.bf16.msra.mxu1 %v5223_v4  ;;  %3406 = vmatprep.subr.bf16.mxu0 %v5228_v13  ;;  %v5303_v4 = vld [vmem:[#allocation21 + $0xe0] sm:$0xff]  }
 0x2e4   :  { %3652 = vmatprep.subr.bf16.mxu1 %v5231_v5  ;;  %v5304_v13 = vld [vmem:[#allocation21 + $0x20] sm:$0xff]  }
 0x2e5   :  { %v5305_v5 = vld [vmem:[#allocation21 + $0xa0] sm:$0xff]  }
 0x2e6   :  { %3407 = vmatpush1.bf16.msra.mxu0 %v5226_v6  ;;  %v5306_v6 = vld [vmem:[#allocation21 + $0x68] sm:$0xff]  }
 0x2e7   :  { %3653 = vmatpush1.bf16.msra.mxu1 %v5229_v7  ;;  %3408 = vmatprep.subr.bf16.mxu0 %v5234_v8  ;;  %v5307_v7 = vld [vmem:[#allocation21 + $0xe8] sm:$0xff]  }
 0x2e8   :  { %3654 = vmatprep.subr.bf16.mxu1 %v5237_v14  ;;  %v5308_v8 = vld [vmem:[#allocation21 + $0x28] sm:$0xff]  }
 0x2e9   :  { %v5309_v14 = vld [vmem:[#allocation21 + $0xa8] sm:$0xff]  }
 0x2ea   :  { %3409 = vmatpush1.bf16.msra.mxu0 %v5232_v9  ;;  %v5310_v9 = vld [vmem:[#allocation21 + $0x70] sm:$0xff]  }
 0x2eb   :  { %3655 = vmatpush1.bf16.msra.mxu1 %v5235_v10  ;;  %3410 = vmatprep.subr.bf16.mxu0 %v5240_v12  ;;  %v5311_v10 = vld [vmem:[#allocation21 + $0xf0] sm:$0xff]  }
 0x2ec   :  { %3656 = vmatprep.subr.bf16.mxu1 %v5243_v15  ;;  %v5312_v12 = vld [vmem:[#allocation21 + $0x30] sm:$0xff]  }
 0x2ed   :  { %v5313_v15 = vld [vmem:[#allocation21 + $0xb0] sm:$0xff]  }
 0x2ee   :  { %3411 = vmatpush1.bf16.msra.mxu0 %v5238_v17  ;;  %v5314_v17 = vld [vmem:[#allocation21 + $0x78] sm:$0xff]  }
 0x2ef   :  { %3657 = vmatpush1.bf16.msra.mxu1 %v5241_v18  ;;  %3412 = vmatprep.subr.bf16.mxu0 %v5246_v19  ;;  %v5315_v18 = vld [vmem:[#allocation21 + $0xf8] sm:$0xff]  }
 0x2f0   :  { %3658 = vmatprep.subr.bf16.mxu1 %v5249_v20  ;;  %v5316_v19 = vld [vmem:[#allocation21 + $0x38] sm:$0xff]  }
 0x2f1   :  { %v5317_v20 = vld [vmem:[#allocation21 + $0xb8] sm:$0xff]  }
 0x2f2   :  { %3413 = vmatpush1.bf16.msra.mxu0 %v5244_v27  ;;  %v1205_v27 = vld [vmem:[#allocation20] sm:$0xf] }
 0x2f3   :  { %3659 = vmatpush1.bf16.msra.mxu1 %v5247_v21  ;;  %3414 = vmatprep.subr.bf16.mxu0 %v5252_v22  ;;  %v1210_v21 = vrot.slane %v1205_v27, %v5919_v44  ;;  %v1218_v22 = vrot.slane %v1205_v27, %v5935_v11 }
 0x2f4   :  { %3660 = vmatprep.subr.bf16.mxu1 %v5255_v23  ;;  %v1214_v23 = vrot.slane %v1205_v27, %v5923_v46 }
 0x2f6   :  { %3415 = vmatpush1.bf16.msra.mxu0 %v5250_v24  ;;  %v1222_v24 = vrot.slane %v1205_v27, %v5925_v47 }
 0x2f7   :  { %3661 = vmatpush1.bf16.msra.mxu1 %v5253_v26  ;;  %3416 = vmatprep.subr.bf16.mxu0 %v5258_v28 }
 0x2f8   :  { %3662 = vmatprep.subr.bf16.mxu1 %v5261_v29 }
 0x2fa   :  { %3417 = vmatpush1.bf16.msra.mxu0 %v5256_v30 }
 0x2fb   :  { %3663 = vmatpush1.bf16.msra.mxu1 %v5259_v31  ;;  %3418 = vmatprep.subr.bf16.mxu0 %v5264_v32 }
 0x2fc   :  { %3664 = vmatprep.subr.bf16.mxu1 %v5267_v49 }
 0x2fe   :  { %3419 = vmatpush1.bf16.msra.mxu0 %v5262_v33 }
 0x2ff   :  { %3665 = vmatpush1.bf16.msra.mxu1 %v5265_v25  ;;  %3420 = vmatprep.subr.bf16.mxu0 %v5270_v34 }
 0x300   :  { %3666 = vmatprep.subr.bf16.mxu1 %v5273_v35 }
 0x302   :  { %3421 = vmatpush1.bf16.msra.mxu0 %v5268_v36 }
 0x303   :  { %3667 = vmatpush1.bf16.msra.mxu1 %v5271_v42  ;;  %3422 = vmatprep.subr.bf16.mxu0 %v5276_v37 }
 0x304   :  { %3668 = vmatprep.subr.bf16.mxu1 %v5279_v38 }
 0x306   :  { %3423 = vmatpush1.bf16.msra.mxu0 %v5274_v45 }
 0x307   :  { %3669 = vmatpush1.bf16.msra.mxu1 %v5277_v39  ;;  %3424 = vmatprep.subr.bf16.mxu0 %v5282_v43 }
 0x308   :  { %3670 = vmatprep.subr.bf16.mxu1 %v5285_v40  ;;  %v4498_v40 = vld [vmem:[#allocation23] ss:$0 sm:$0xff] }
 0x30a   :  { %3425 = vmatpush1.bf16.msra.mxu0 %v5280_v41 }
 0x30b   :  { %3671 = vmatpush1.bf16.msra.mxu1 %v5283_v50  ;;  %4549 = vmatprep.subr.bf16.mxu0 %v5286_v51 }
 0x30c   :  { %4571 = vmatprep.subr.bf16.mxu1 %v5287_v52 }
 0x30d   :  { %3427 = vmatmul.mubr.bf16.vlgmr.msra.gmra.mrb[12].mxu0 %v4547_v61 }
 0x30e   :  { %3673 = vmatmul.mubr.bf16.vlgmr.msra.gmra.mrb[12].mxu1 %v4547_v61  ;;  %4550 = vmatpush3.bf16.msra.mxu0 %v5288_v58 }
 0x30f   :  { %4572 = vmatpush3.bf16.msra.mxu1 %v5289_v53  ;;  %4551 = vmatprep.subr.bf16.mxu0 %v5290_v54 }
 0x310   :  { %4573 = vmatprep.subr.bf16.mxu1 %v5291_v55 }
 0x312   :  { %4552 = vmatpush3.bf16.msra.mxu0 %v5292_v56 }
 0x313   :  { %4574 = vmatpush3.bf16.msra.mxu1 %v5293_v59  ;;  %4553 = vmatprep.subr.bf16.mxu0 %v5294_v57 }
 0x314   :  { %4575 = vmatprep.subr.bf16.mxu1 %v5295_v16 }
 0x316   :  { %4554 = vmatpush3.bf16.msra.mxu0 %v5296_v60 }
 0x317   :  { %4576 = vmatpush3.bf16.msra.mxu1 %v5297_v62  ;;  %4555 = vmatprep.subr.bf16.mxu0 %v5298_v63 }
 0x318   :  { %4577 = vmatprep.subr.bf16.mxu1 %v5299_v0 }
 0x31a   :  { %4556 = vmatpush3.bf16.msra.mxu0 %v5300_v1 }
 0x31b   :  { %4578 = vmatpush3.bf16.msra.mxu1 %v5301_v2  ;;  %4557 = vmatprep.subr.bf16.mxu0 %v5302_v3 }
 0x31c   :  { %4579 = vmatprep.subr.bf16.mxu1 %v5303_v4 }
 0x31e   :  { %4558 = vmatpush3.bf16.msra.mxu0 %v5304_v13 }
 0x31f   :  { %4580 = vmatpush3.bf16.msra.mxu1 %v5305_v5  ;;  %4559 = vmatprep.subr.bf16.mxu0 %v5306_v6 }
 0x320   :  { %4581 = vmatprep.subr.bf16.mxu1 %v5307_v7 }
 0x322   :  { %4560 = vmatpush3.bf16.msra.mxu0 %v5308_v8 }
 0x323   :  { %4582 = vmatpush3.bf16.msra.mxu1 %v5309_v14  ;;  %4561 = vmatprep.subr.bf16.mxu0 %v5310_v9 }
 0x324   :  { %4583 = vmatprep.subr.bf16.mxu1 %v5311_v10 }
 0x326   :  { %4562 = vmatpush3.bf16.msra.mxu0 %v5312_v12 }
 0x327   :  { %4584 = vmatpush3.bf16.msra.mxu1 %v5313_v15  ;;  %4563 = vmatprep.subr.bf16.mxu0 %v5314_v17 }
 0x328   :  { %4585 = vmatprep.subr.bf16.mxu1 %v5315_v18 }
 0x32a   :  { %4564 = vmatpush3.bf16.msra.mxu0 %v5316_v19 }
 0x32b   :  { %4586 = vmatpush3.bf16.msra.mxu1 %v5317_v20 }
 0x3e0   :  { %v3428_v26 = vpop.f32.mrb[12].mxu0 }
 0x3e1   :  { %v4593_v28 = vadd.f32 %v3428_v26, %v1210_v21  ;;  %v3674_v29 = vpop.f32.mrb[12].mxu1  ;;  %v3430_v30 = vpop.f32.mrb[13].mxu0 }
 0x3e2   :  { %v4595_v31 = vadd.f32 %v3674_v29, %v1218_v22  ;;  %v4594_v32 = vadd.f32 %v3430_v30, %v1214_v23  ;;  %v3676_v49 = vpop.f32.mrb[13].mxu1  ;;  %v3432_v33 = vpop.f32.mrb[14].mxu0 }
 0x3e3   :  { %v3681_v25 = vmax.f32 %v4593_v28, 0.0  ;;  %v4596_v34 = vadd.f32 %v3676_v49, %v1222_v24  ;;  %v3678_v35 = vpop.f32.mrb[14].mxu1  ;;  %v3433_v36 = vpop.f32.mrb[15].mxu0 }
 0x3e4   :  { %v3683_v42 = vmax.f32 %v4595_v31, 0.0  ;;  %v3682_v44 = vmax.f32 %v4594_v32, 0.0  ;;  %v3679_v37 = vpop.f32.mrb[15].mxu1 }
 0x3e5   :  { %v3684_v11 = vmax.f32 %v4596_v34, 0.0  ;;  %v3685_v46 = vpack.c.bf16 %v3681_v25, %v3681_v25 }
 0x3e6   :  { %v3686_v38 = vpack.c.bf16 %v3682_v44, %v3682_v44  ;;  %v3687_v47 = vpack.c.bf16 %v3683_v42, %v3683_v42 }
 0x3e7   :  { %v3688_v45 = vpack.c.bf16 %v3684_v11, %v3684_v11 }
 0x3e8   :  { %3984 = vmatprep.mubr.bf16.mxu0 %v3686_v38 }
 0x3e9   :  { %4024 = vmatprep.mubr.bf16.mxu1 %v3688_v45  ;;  %3985 = vmatmul.mubr.bf16.vlgmr.msra.gmra.mrb[16].mxu0 %v3685_v46 }
 0x3ea   :  { %4025 = vmatmul.mubr.bf16.vlgmr.msra.gmra.mrb[16].mxu1 %v3687_v47 }
 0x4bc   :  { %v4565_v39 = vpop.f32.mrb[16].mxu0 }
 0x4bd   :  { %v4587_v43 = vpop.f32.mrb[16].mxu1  ;;  %v4566_v41 = vpop.f32.mrb[17].mxu0 }
 0x4be   :  { %v4567_v48 = vadd.f32 %v4566_v41, %v4565_v39  ;;  %v4588_v50 = vpop.f32.mrb[17].mxu1  ;;  %v4568_v51 = vpop.f32.mrb[18].mxu0 }
 0x4bf   :  { %v4589_v52 = vadd.f32 %v4588_v50, %v4587_v43  ;;  %v4590_v58 = vpop.f32.mrb[18].mxu1  ;;  %v4569_v61 = vpop.f32.mrb[19].mxu0 }
 0x4c0   :  { %v3987_v53 = vadd.f32 %v4567_v48, %v4498_v40  ;;  %v4591_v54 = vpop.f32.mrb[19].mxu1 }
 0x4c2   :  { %v4027_v55 = vadd.f32 %v4589_v52, %v3987_v53 }
 0x4c4   :  { %4032 = vst [vmem:[#allocation24] sm:$0xff] %v4027_v55 }
 0x4c5   :  { %5615 = shalt.err (!%p5612_p10)
}
 0x4c6   :  { %s5616_s19 = scalar_lea.hbm %s6013_s13, 128 }
 0x4c7   :  { %p5617_p11 = scmp.ne.s32.totalorder %s6013_s13, %s5616_s19  ;;  %p5620_p12 = scmp.lt.u32.totalorder %s5616_s19, %s6013_s13 }
 0x4c9   :  { %p5622_p13 = pnand %p5620_p12, %p5617_p11 }
 0x4cb   :  { %5625 = shalt.err (!%p5622_p13)
}
 0x4cc   :  { %4042 = dma.vmem_to_hbm [thread:$0]  %s4040_s5, 128, %s6013_s13, [#allocation5]  }
 0x4cd   :  { %5640 = dma.done.wait [#allocation5], 128  }
 0x4ce   :  { %5641 = vsyncadd [#allocation5], 4294967168 }
 0x4cf   :  { %4046 = vsyncpa [#allocation4], 1 }
 0x4d0   :  { %4047 = vsyncpa [#allocation7], 1 }
 0x4d1   :  { %4048 = vsyncpa [#allocation10], 1 }
 0x4d2   :  { %4049 = vsyncpa [#allocation13], 1 }
 0x4d3   :  { %4050 = vsyncpa [#allocation16], 1 }
 0x4d4   :  { %4051 = vsyncpa [#allocation19], 1 }
 0x4d5   :  { %4052 = vsyncpa [#allocation22], 1 }
 0x4d6   :  { %4053 = vsyncpa [#allocation5], 1 }

</bundles_post_ra>
